<compile_context>
chip_gen: v6e
topology: v6e:2x2x1
jax: 0.10.0
libtpu: 0.0.40
codegen_flags: <defaults>
</compile_context>

<pallas_src>
import math
import functools

import jax
import jax.numpy as jnp
from jax import lax
from jax.experimental import pallas as pl
from jax.experimental.pallas import tpu as pltpu


def _layernorm(h, gamma, beta, eps=1e-5):
    mu = jnp.mean(h, axis=-1, keepdims=True)
    var = jnp.mean((h - mu) ** 2, axis=-1, keepdims=True)
    return (h - mu) * lax.rsqrt(var + eps) * gamma + beta


def block_kernel(
    # inputs
    x_ref,                       # (T, C)  f32 : full sequence for this batch element
    ln1_g_ref, ln1_b_ref,        # (1, C)  f32
    wq_ref, bq_ref,              # (H, C, hd) bf16 / (H, 1, hd) f32
    wk_ref, bk_ref,              # (H, C, hd) bf16 / (H, 1, hd) f32
    wv_ref, bv_ref,              # (H, C, hd) bf16 / (H, 1, hd) f32
    wo_ref, bo_ref,              # (H, hd, C) bf16 / (1, C) f32
    ln2_g_ref, ln2_b_ref,        # (1, C)  f32
    wfc_ref, bfc_ref,            # (C, 4C) bf16 / (1, 4C) f32
    wmp_ref, bmp_ref,            # (4C, C) bf16 / (1, C)  f32
    # outputs (query-tile blocks)
    out_x_ref, out_si_ref, out_so_ref,   # (TQ, C) f32
    # scratch
    k_scr_ref, v_scr_ref,        # (H, T, hd) bf16 : persists across query tiles
    m_scr_ref, l_scr_ref,        # (TQ, 1) f32 online-softmax stats
    acc_scr_ref,                 # (TQ, hd) f32 per-head attention accumulator
    attn_scr_ref,                # (TQ, C) f32 attention output (summed over heads)
    *, n_head, tq,
):
    T, C = x_ref.shape
    hd = C // n_head
    scale = 1.0 / math.sqrt(hd)
    qt = pl.program_id(1)

    ln1_g = ln1_g_ref[...]
    ln1_b = ln1_b_ref[...]

    # ---------- once per sequence: project K / V for all T positions ----------
    @pl.when(qt == 0)
    def _():
        h1_full = _layernorm(x_ref[...], ln1_g, ln1_b).astype(jnp.bfloat16)

        @pl.loop(0, n_head)
        def _(h):
            k_scr_ref[h] = (
                jnp.dot(h1_full, wk_ref[h], preferred_element_type=jnp.float32)
                + bk_ref[h]).astype(jnp.bfloat16)
            v_scr_ref[h] = (
                jnp.dot(h1_full, wv_ref[h], preferred_element_type=jnp.float32)
                + bv_ref[h]).astype(jnp.bfloat16)

    # ---------- this query tile ----------
    q_start = pl.multiple_of(qt * tq, tq)
    x_tile = x_ref[pl.ds(q_start, tq), :]                          # (TQ, C) f32
    h1_t = _layernorm(x_tile, ln1_g, ln1_b).astype(jnp.bfloat16)

    # local tril mask for the diagonal KV tile (independent of qt -> hoisted once)
    local_rows = lax.broadcasted_iota(jnp.int32, (tq, tq), 0)
    local_cols = lax.broadcasted_iota(jnp.int32, (tq, tq), 1)
    causal_mask = local_cols <= local_rows

    # attention accumulator seeded with the residual input + output-proj bias
    # (fuses the first residual add).
    attn_scr_ref[...] = x_tile + bo_ref[...]

    @pl.loop(0, n_head)
    def _(h):
        qh = (jnp.dot(h1_t, wq_ref[h], preferred_element_type=jnp.float32)
              + bq_ref[h]).astype(jnp.bfloat16)                    # (TQ, hd)

        m_scr_ref[...] = jnp.full((tq, 1), -1e30, dtype=jnp.float32)
        l_scr_ref[...] = jnp.zeros((tq, 1), dtype=jnp.float32)
        acc_scr_ref[...] = jnp.zeros((tq, hd), dtype=jnp.float32)

        def kv_step(kv_start, masked):
            kt = k_scr_ref[h, pl.ds(kv_start, tq), :]              # (TK, hd) bf16
            vt = v_scr_ref[h, pl.ds(kv_start, tq), :]
            s = lax.dot_general(qh, kt, (((1,), (1,)), ((), ())),
                                preferred_element_type=jnp.float32) * scale
            if masked:
                s = jnp.where(causal_mask, s, -1e30)
            m_prev = m_scr_ref[...]
            m_new = jnp.maximum(m_prev, jnp.max(s, axis=-1, keepdims=True))
            alpha = jnp.exp(m_prev - m_new)
            p = jnp.exp(s - m_new)
            l_scr_ref[...] = alpha * l_scr_ref[...] + jnp.sum(p, axis=-1, keepdims=True)
            acc_scr_ref[...] = alpha * acc_scr_ref[...] + jnp.dot(
                p.astype(jnp.bfloat16), vt, preferred_element_type=jnp.float32)
            m_scr_ref[...] = m_new

        # fully-visible KV tiles (strictly below the diagonal): no mask needed
        @pl.loop(0, qt)
        def _(j):
            kv_step(pl.multiple_of(j * tq, tq), masked=False)

        # diagonal tile with local causal mask
        kv_step(q_start, masked=True)

        o_h = (acc_scr_ref[...] * pl.reciprocal(l_scr_ref[...], approx=True)
               ).astype(jnp.bfloat16)
        # per-head output-projection partial sum: no head concat, no lane slicing
        attn_scr_ref[...] += jnp.dot(o_h, wo_ref[h],
                                     preferred_element_type=jnp.float32)

    x1 = attn_scr_ref[...]                                         # residual 1 (f32)

    # ---- mlp branch: ln_2 -> c_fc -> GELU(exact erf) -> c_proj ----
    sae_in = _layernorm(x1, ln2_g_ref[...], ln2_b_ref[...])
    hfc = (jnp.dot(sae_in.astype(jnp.bfloat16), wfc_ref[...],
                   preferred_element_type=jnp.float32) + bfc_ref[...])
    gelu = 0.5 * hfc * (1.0 + lax.erf(hfc * (1.0 / math.sqrt(2.0))))
    sae_out = (jnp.dot(gelu.astype(jnp.bfloat16), wmp_ref[...],
                       preferred_element_type=jnp.float32) + bmp_ref[...])

    out_x_ref[...] = x1 + sae_out
    out_si_ref[...] = sae_in
    out_so_ref[...] = sae_out


def _pick_tile(T):
    # 256-row query tiles keep the 256x256 MXU (v6e/v7x) fed; smaller T falls back.
    for t in (256, 128, 64, 32, 16, 8):
        if T % t == 0:
            return t
    return T


def gpt2_block(x, params, n_head, *, tq=None):
    """x: (B, T, C) float32. Returns (x_out, [sae_in, sae_out]) like Block.forward."""
    B, T, C = x.shape
    assert C % n_head == 0
    hd = C // n_head
    if tq is None:
        tq = _pick_tile(T)
    assert T % tq == 0
    n_qt = T // tq

    f32, bf16 = jnp.float32, jnp.bfloat16

    def head_major(w):  # (C, C) -> (H, C, hd), bf16 for the MXU
        return jnp.transpose(w.reshape(C, n_head, hd), (1, 0, 2)).astype(bf16)

    w_qkv = params["w_qkv"]                       # (C, 3C)
    b_qkv = params["b_qkv"].reshape(3 * C)
    wq = head_major(w_qkv[:, 0 * C:1 * C])
    wk = head_major(w_qkv[:, 1 * C:2 * C])
    wv = head_major(w_qkv[:, 2 * C:3 * C])
    bq = b_qkv[0 * C:1 * C].reshape(n_head, 1, hd).astype(f32)
    bk = b_qkv[1 * C:2 * C].reshape(n_head, 1, hd).astype(f32)
    bv = b_qkv[2 * C:3 * C].reshape(n_head, 1, hd).astype(f32)
    wo = params["w_attnproj"].reshape(n_head, hd, C).astype(bf16)

    weight_args = [
        params["ln1_g"].astype(f32), params["ln1_b"].astype(f32),
        wq, bq, wk, bk, wv, bv,
        wo, params["b_attnproj"].astype(f32),
        params["ln2_g"].astype(f32), params["ln2_b"].astype(f32),
        params["w_fc"].astype(bf16), params["b_fc"].astype(f32),
        params["w_mlpproj"].astype(bf16), params["b_mlpproj"].astype(f32),
    ]

    x_spec = pl.BlockSpec((None, T, C), lambda b, q: (b, 0, 0))      # full sequence
    tile_spec = pl.BlockSpec((None, tq, C), lambda b, q: (b, q, 0))  # per-tile outputs
    out_shape = tuple(jax.ShapeDtypeStruct((B, T, C), f32) for _ in range(3))
    scratch = [
        pltpu.VMEM((n_head, T, hd), bf16),    # K (head-major, reused across q tiles)
        pltpu.VMEM((n_head, T, hd), bf16),    # V
        pltpu.VMEM((tq, 1), f32),             # m (online softmax)
        pltpu.VMEM((tq, 1), f32),             # l
        pltpu.VMEM((tq, hd), f32),            # per-head attention accumulator
        pltpu.VMEM((tq, C), f32),             # attention output / residual accumulator
    ]
    kernel = functools.partial(block_kernel, n_head=n_head, tq=tq)

    def build(single_buffer_weights):
        def wspec(arr):
            nd = arr.ndim
            imap = lambda b, q, _nd=nd: (0,) * _nd
            if single_buffer_weights:
                # weights are grid-invariant -> one VMEM buffer is enough
                return pl.BlockSpec(arr.shape, imap, pipeline_mode=pl.Buffered(1))
            return pl.BlockSpec(arr.shape, imap)

        return pl.pallas_call(
            kernel,
            grid=(B, n_qt),
            in_specs=[x_spec] + [wspec(a) for a in weight_args],
            out_specs=(tile_spec, tile_spec, tile_spec),
            out_shape=out_shape,
            scratch_shapes=scratch,
            compiler_params=pltpu.CompilerParams(
                # batch axis parallel (megacore); query-tile axis must stay
                # sequential because the K/V scratch is filled at qt == 0.
                dimension_semantics=("parallel", "arbitrary"),
                vmem_limit_bytes=56 * 1024 * 1024,
            ),
        )

    try:
        outs = jax.block_until_ready(build(True)(x, *weight_args))
    except Exception:
        # pipeline_mode=pl.Buffered(1) unsupported by this Pallas build:
        # fall back to default (double-buffered) weight pipelining.
        outs = jax.block_until_ready(build(False)(x, *weight_args))

    out_x, sae_in, sae_out = outs
    return out_x, [sae_in, sae_out]


def _reference(x, params, n_head):
    """Pure-JAX reference of the PyTorch Block.forward for validation."""
    B, T, C = x.shape
    hd = C // n_head

    def ln(h, g, b):
        mu = jnp.mean(h, axis=-1, keepdims=True)
        var = jnp.mean((h - mu) ** 2, axis=-1, keepdims=True)
        return (h - mu) / jnp.sqrt(var + 1e-5) * g + b

    h1 = ln(x, params["ln1_g"], params["ln1_b"])
    qkv = h1 @ params["w_qkv"] + params["b_qkv"]
    q, k, v = jnp.split(qkv, 3, axis=-1)
    q = q.reshape(B, T, n_head, hd).transpose(0, 2, 1, 3)
    k = k.reshape(B, T, n_head, hd).transpose(0, 2, 1, 3)
    v = v.reshape(B, T, n_head, hd).transpose(0, 2, 1, 3)
    s = jnp.einsum("bhtd,bhsd->bhts", q, k) / math.sqrt(hd)
    mask = jnp.tril(jnp.ones((T, T), dtype=bool))
    s = jnp.where(mask, s, -jnp.inf)
    p = jax.nn.softmax(s, axis=-1)
    y = jnp.einsum("bhts,bhsd->bhtd", p, v).transpose(0, 2, 1, 3).reshape(B, T, C)
    y = y @ params["w_attnproj"] + params["b_attnproj"]
    x1 = x + y
    sae_in = ln(x1, params["ln2_g"], params["ln2_b"])
    hfc = sae_in @ params["w_fc"] + params["b_fc"]
    gelu = 0.5 * hfc * (1.0 + lax.erf(hfc / math.sqrt(2.0)))
    sae_out = gelu @ params["w_mlpproj"] + params["b_mlpproj"]
    return x1 + sae_out, [sae_in, sae_out]


if __name__ == "__main__":
    # small GPT-2-ish config; tq=8 -> 2 query tiles so the cross-tile causal
    # path, the unmasked KV-tile loop, and the diagonal-tile mask are exercised.
    B, T, C, n_head = 2, 16, 32, 4

    key = jax.random.PRNGKey(0)
    ks = jax.random.split(key, 16)

    def rnd(k, shape, scale=0.02):
        return (scale * jax.random.normal(k, shape)).astype(jnp.float32)

    params = {
        "ln1_g": jnp.ones((1, C), jnp.float32) + rnd(ks[1], (1, C)),
        "ln1_b": rnd(ks[2], (1, C)),
        "w_qkv": rnd(ks[3], (C, 3 * C)),
        "b_qkv": rnd(ks[4], (1, 3 * C)),
        "w_attnproj": rnd(ks[5], (C, C)),
        "b_attnproj": rnd(ks[6], (1, C)),
        "ln2_g": jnp.ones((1, C), jnp.float32) + rnd(ks[7], (1, C)),
        "ln2_b": rnd(ks[8], (1, C)),
        "w_fc": rnd(ks[9], (C, 4 * C)),
        "b_fc": rnd(ks[10], (1, 4 * C)),
        "w_mlpproj": rnd(ks[11], (4 * C, C)),
        "b_mlpproj": rnd(ks[12], (1, C)),
    }

    x = jax.random.normal(ks[0], (B, T, C), dtype=jnp.float32)

    out_x, (sae_in, sae_out) = gpt2_block(x, params, n_head, tq=8)
    jax.block_until_ready((out_x, sae_in, sae_out))

    ref_x, (ref_si, ref_so) = _reference(x, params, n_head)
    # bf16 MXU inputs with f32 accumulation -> slightly looser tolerances
    assert jnp.allclose(out_x, ref_x, atol=3e-3, rtol=3e-3)
    assert jnp.allclose(sae_in, ref_si, atol=3e-3, rtol=3e-3)
    assert jnp.allclose(sae_out, ref_so, atol=3e-3, rtol=3e-3)

    print("KERNEL_OK")
</pallas_src>

<mosaic_0001>
module attributes {stable_mosaic.version = 11 : i64} {
  func.func @block_kernel(%arg0: i32, %arg1: i32, %arg2: memref<1x16x32xf32, #tpu.memory_space<vmem>>, %arg3: memref<1x32xf32, #tpu.memory_space<vmem>>, %arg4: memref<1x32xf32, #tpu.memory_space<vmem>>, %arg5: memref<4x32x8xbf16, #tpu.memory_space<vmem>>, %arg6: memref<4x1x8xf32, #tpu.memory_space<vmem>>, %arg7: memref<4x32x8xbf16, #tpu.memory_space<vmem>>, %arg8: memref<4x1x8xf32, #tpu.memory_space<vmem>>, %arg9: memref<4x32x8xbf16, #tpu.memory_space<vmem>>, %arg10: memref<4x1x8xf32, #tpu.memory_space<vmem>>, %arg11: memref<4x8x32xbf16, #tpu.memory_space<vmem>>, %arg12: memref<1x32xf32, #tpu.memory_space<vmem>>, %arg13: memref<1x32xf32, #tpu.memory_space<vmem>>, %arg14: memref<1x32xf32, #tpu.memory_space<vmem>>, %arg15: memref<32x128xbf16, #tpu.memory_space<vmem>>, %arg16: memref<1x128xf32, #tpu.memory_space<vmem>>, %arg17: memref<128x32xbf16, #tpu.memory_space<vmem>>, %arg18: memref<1x32xf32, #tpu.memory_space<vmem>>, %arg19: memref<1x8x32xf32, #tpu.memory_space<vmem>>, %arg20: memref<1x8x32xf32, #tpu.memory_space<vmem>>, %arg21: memref<1x8x32xf32, #tpu.memory_space<vmem>>, %arg22: memref<4x16x8xbf16, #tpu.memory_space<vmem>>, %arg23: memref<4x16x8xbf16, #tpu.memory_space<vmem>>, %arg24: memref<8x1xf32, #tpu.memory_space<vmem>>, %arg25: memref<8x1xf32, #tpu.memory_space<vmem>>, %arg26: memref<8x8xf32, #tpu.memory_space<vmem>>, %arg27: memref<8x32xf32, #tpu.memory_space<vmem>>) attributes {dimension_semantics = [#tpu.dimension_semantics<parallel>, #tpu.dimension_semantics<arbitrary>], iteration_bounds = array<i64: 2, 2>, scalar_prefetch = 0 : i64, scratch_operands = 6 : i64, tpu.core_type = #tpu.core_type<tc>, window_params = [{transform_indices = @transform_0, window_bounds = array<i64: 1, 16, 32>}, {pipeline_mode = #tpu.pipeline_mode<synchronous>, transform_indices = @transform_1, window_bounds = array<i64: 1, 32>}, {pipeline_mode = #tpu.pipeline_mode<synchronous>, transform_indices = @transform_2, window_bounds = array<i64: 1, 32>}, {pipeline_mode = #tpu.pipeline_mode<synchronous>, transform_indices = @transform_3, window_bounds = array<i64: 4, 32, 8>}, {pipeline_mode = #tpu.pipeline_mode<synchronous>, transform_indices = @transform_4, window_bounds = array<i64: 4, 1, 8>}, {pipeline_mode = #tpu.pipeline_mode<synchronous>, transform_indices = @transform_5, window_bounds = array<i64: 4, 32, 8>}, {pipeline_mode = #tpu.pipeline_mode<synchronous>, transform_indices = @transform_6, window_bounds = array<i64: 4, 1, 8>}, {pipeline_mode = #tpu.pipeline_mode<synchronous>, transform_indices = @transform_7, window_bounds = array<i64: 4, 32, 8>}, {pipeline_mode = #tpu.pipeline_mode<synchronous>, transform_indices = @transform_8, window_bounds = array<i64: 4, 1, 8>}, {pipeline_mode = #tpu.pipeline_mode<synchronous>, transform_indices = @transform_9, window_bounds = array<i64: 4, 8, 32>}, {pipeline_mode = #tpu.pipeline_mode<synchronous>, transform_indices = @transform_10, window_bounds = array<i64: 1, 32>}, {pipeline_mode = #tpu.pipeline_mode<synchronous>, transform_indices = @transform_11, window_bounds = array<i64: 1, 32>}, {pipeline_mode = #tpu.pipeline_mode<synchronous>, transform_indices = @transform_12, window_bounds = array<i64: 1, 32>}, {pipeline_mode = #tpu.pipeline_mode<synchronous>, transform_indices = @transform_13, window_bounds = array<i64: 32, 128>}, {pipeline_mode = #tpu.pipeline_mode<synchronous>, transform_indices = @transform_14, window_bounds = array<i64: 1, 128>}, {pipeline_mode = #tpu.pipeline_mode<synchronous>, transform_indices = @transform_15, window_bounds = array<i64: 128, 32>}, {pipeline_mode = #tpu.pipeline_mode<synchronous>, transform_indices = @transform_16, window_bounds = array<i64: 1, 32>}, {transform_indices = @transform_17, window_bounds = array<i64: 1, 8, 32>}, {transform_indices = @transform_18, window_bounds = array<i64: 1, 8, 32>}, {transform_indices = @transform_19, window_bounds = array<i64: 1, 8, 32>}]} {
    %c0 = arith.constant 0 : index
    %c0_0 = arith.constant 0 : index
    %0 = vector.load %arg3[%c0, %c0_0] : memref<1x32xf32, #tpu.memory_space<vmem>>, vector<1x32xf32>
    %c0_1 = arith.constant 0 : index
    %c0_2 = arith.constant 0 : index
    %1 = vector.load %arg4[%c0_1, %c0_2] : memref<1x32xf32, #tpu.memory_space<vmem>>, vector<1x32xf32>
    %c0_i32 = arith.constant 0 : i32
    %2 = arith.cmpi eq, %arg1, %c0_i32 : i32
    %3 = arith.extui %2 : i1 to i32
    %c0_i32_3 = arith.constant 0 : i32
    %4 = arith.cmpi ne, %3, %c0_i32_3 : i32
    scf.if %4 {
      %c0_49 = arith.constant 0 : index
      %c0_50 = arith.constant 0 : index
      %c0_51 = arith.constant 0 : index
      %96 = vector.load %arg2[%c0_49, %c0_50, %c0_51] : memref<1x16x32xf32, #tpu.memory_space<vmem>>, vector<1x16x32xf32>
      %97 = vector.shape_cast %96 : vector<1x16x32xf32> to vector<16x32xf32>
      %cst_52 = arith.constant dense<0.000000e+00> : vector<16xf32>
      %98 = vector.multi_reduction <add>, %97, %cst_52 [1] : vector<16x32xf32> to vector<16xf32>
      %99 = vector.shape_cast %98 : vector<16xf32> to vector<16x1xf32>
      %cst_53 = arith.constant 3.200000e+01 : f32
      %100 = vector.broadcast %cst_53 : f32 to vector<16x1xf32>
      %101 = arith.divf %99, %100 : vector<16x1xf32>
      %102 = vector.broadcast %101 : vector<16x1xf32> to vector<16x32xf32>
      %103 = arith.subf %97, %102 : vector<16x32xf32>
      %104 = arith.mulf %103, %103 : vector<16x32xf32>
      %cst_54 = arith.constant dense<0.000000e+00> : vector<16xf32>
      %105 = vector.multi_reduction <add>, %104, %cst_54 [1] : vector<16x32xf32> to vector<16xf32>
      %106 = vector.shape_cast %105 : vector<16xf32> to vector<16x1xf32>
      %cst_55 = arith.constant 3.200000e+01 : f32
      %107 = vector.broadcast %cst_55 : f32 to vector<16x1xf32>
      %108 = arith.divf %106, %107 : vector<16x1xf32>
      %109 = vector.broadcast %101 : vector<16x1xf32> to vector<16x32xf32>
      %110 = arith.subf %97, %109 : vector<16x32xf32>
      %cst_56 = arith.constant 9.99999974E-6 : f32
      %111 = vector.broadcast %cst_56 : f32 to vector<16x1xf32>
      %112 = arith.addf %108, %111 : vector<16x1xf32>
      %113 = math.rsqrt %112 : vector<16x1xf32>
      %114 = vector.broadcast %113 : vector<16x1xf32> to vector<16x32xf32>
      %115 = arith.mulf %110, %114 : vector<16x32xf32>
      %116 = vector.broadcast %0 : vector<1x32xf32> to vector<16x32xf32>
      %117 = arith.mulf %115, %116 : vector<16x32xf32>
      %118 = vector.broadcast %1 : vector<1x32xf32> to vector<16x32xf32>
      %119 = arith.addf %117, %118 : vector<16x32xf32>
      %120 = arith.truncf %119 : vector<16x32xf32> to vector<16x32xbf16>
      %c0_i32_57 = arith.constant 0 : i32
      %c4_i32_58 = arith.constant 4 : i32
      %121 = arith.addi %c0_i32_57, %c4_i32_58 : i32
      %c1_i32_59 = arith.constant 1 : i32
      scf.for %arg28 = %c0_i32_57 to %121 step %c1_i32_59  : i32 {
        %c1_i32_61 = arith.constant 1 : i32
        %122 = arith.muli %arg28, %c1_i32_61 : i32
        %c0_i32_62 = arith.constant 0 : i32
        %123 = arith.addi %c0_i32_62, %122 : i32
        %124 = arith.index_cast %123 : i32 to index
        %c0_63 = arith.constant 0 : index
        %c0_64 = arith.constant 0 : index
        %125 = vector.load %arg7[%124, %c0_63, %c0_64] : memref<4x32x8xbf16, #tpu.memory_space<vmem>>, vector<1x32x8xbf16>
        %126 = vector.shape_cast %125 : vector<1x32x8xbf16> to vector<32x8xbf16>
        %cst_65 = arith.constant dense<0.000000e+00> : vector<16x8xf32>
        %127 = tpu.matmul %120, %126, %cst_65 {dimension_numbers = #tpu.dot_dimension_numbers<[1], [0], [0], [1], [0, 0, 1, 1], [], []>} : vector<16x32xbf16>, vector<32x8xbf16>, vector<16x8xf32> -> vector<16x8xf32>
        %128 = arith.index_cast %123 : i32 to index
        %c0_66 = arith.constant 0 : index
        %c0_67 = arith.constant 0 : index
        %129 = vector.load %arg8[%128, %c0_66, %c0_67] : memref<4x1x8xf32, #tpu.memory_space<vmem>>, vector<1x1x8xf32>
        %130 = vector.shape_cast %129 : vector<1x1x8xf32> to vector<1x8xf32>
        %131 = vector.broadcast %130 : vector<1x8xf32> to vector<16x8xf32>
        %132 = arith.addf %127, %131 : vector<16x8xf32>
        %133 = arith.truncf %132 : vector<16x8xf32> to vector<16x8xbf16>
        %134 = arith.index_cast %123 : i32 to index
        %c0_68 = arith.constant 0 : index
        %c0_69 = arith.constant 0 : index
        %135 = vector.load %arg22[%134, %c0_68, %c0_69] : memref<4x16x8xbf16, #tpu.memory_space<vmem>>, vector<1x16x8xbf16>
        %136 = vector.shape_cast %135 : vector<1x16x8xbf16> to vector<16x8xbf16>
        %137 = vector.shape_cast %133 : vector<16x8xbf16> to vector<1x16x8xbf16>
        tpu.vector_store %arg22[%134, %c0_68, %c0_69], %137 {strides = array<i32>} : memref<4x16x8xbf16, #tpu.memory_space<vmem>>, vector<1x16x8xbf16>,
        %138 = arith.index_cast %123 : i32 to index
        %c0_70 = arith.constant 0 : index
        %c0_71 = arith.constant 0 : index
        %139 = vector.load %arg9[%138, %c0_70, %c0_71] : memref<4x32x8xbf16, #tpu.memory_space<vmem>>, vector<1x32x8xbf16>
        %140 = vector.shape_cast %139 : vector<1x32x8xbf16> to vector<32x8xbf16>
        %cst_72 = arith.constant dense<0.000000e+00> : vector<16x8xf32>
        %141 = tpu.matmul %120, %140, %cst_72 {dimension_numbers = #tpu.dot_dimension_numbers<[1], [0], [0], [1], [0, 0, 1, 1], [], []>} : vector<16x32xbf16>, vector<32x8xbf16>, vector<16x8xf32> -> vector<16x8xf32>
        %142 = arith.index_cast %123 : i32 to index
        %c0_73 = arith.constant 0 : index
        %c0_74 = arith.constant 0 : index
        %143 = vector.load %arg10[%142, %c0_73, %c0_74] : memref<4x1x8xf32, #tpu.memory_space<vmem>>, vector<1x1x8xf32>
        %144 = vector.shape_cast %143 : vector<1x1x8xf32> to vector<1x8xf32>
        %145 = vector.broadcast %144 : vector<1x8xf32> to vector<16x8xf32>
        %146 = arith.addf %141, %145 : vector<16x8xf32>
        %147 = arith.truncf %146 : vector<16x8xf32> to vector<16x8xbf16>
        %148 = arith.index_cast %123 : i32 to index
        %c0_75 = arith.constant 0 : index
        %c0_76 = arith.constant 0 : index
        %149 = vector.load %arg23[%148, %c0_75, %c0_76] : memref<4x16x8xbf16, #tpu.memory_space<vmem>>, vector<1x16x8xbf16>
        %150 = vector.shape_cast %149 : vector<1x16x8xbf16> to vector<16x8xbf16>
        %151 = vector.shape_cast %147 : vector<16x8xbf16> to vector<1x16x8xbf16>
        tpu.vector_store %arg23[%148, %c0_75, %c0_76], %151 {strides = array<i32>} : memref<4x16x8xbf16, #tpu.memory_space<vmem>>, vector<1x16x8xbf16>,
      }
      %c4_i32_60 = arith.constant 4 : i32
    } else {
    }
    %c8_i32 = arith.constant 8 : i32
    %5 = arith.muli %arg1, %c8_i32 : i32
    %6 = tpu.assume_multiple %5, 8 : i32
    %c0_4 = arith.constant 0 : index
    %7 = arith.index_cast %6 : i32 to index
    %c0_5 = arith.constant 0 : index
    %8 = vector.load %arg2[%c0_4, %7, %c0_5] : memref<1x16x32xf32, #tpu.memory_space<vmem>>, vector<1x8x32xf32>
    %9 = vector.shape_cast %8 : vector<1x8x32xf32> to vector<8x32xf32>
    %cst = arith.constant dense<0.000000e+00> : vector<8xf32>
    %10 = vector.multi_reduction <add>, %9, %cst [1] : vector<8x32xf32> to vector<8xf32>
    %11 = vector.shape_cast %10 : vector<8xf32> to vector<8x1xf32>
    %cst_6 = arith.constant 3.200000e+01 : f32
    %12 = vector.broadcast %cst_6 : f32 to vector<8x1xf32>
    %13 = arith.divf %11, %12 : vector<8x1xf32>
    %14 = vector.broadcast %13 : vector<8x1xf32> to vector<8x32xf32>
    %15 = arith.subf %9, %14 : vector<8x32xf32>
    %16 = arith.mulf %15, %15 : vector<8x32xf32>
    %cst_7 = arith.constant dense<0.000000e+00> : vector<8xf32>
    %17 = vector.multi_reduction <add>, %16, %cst_7 [1] : vector<8x32xf32> to vector<8xf32>
    %18 = vector.shape_cast %17 : vector<8xf32> to vector<8x1xf32>
    %cst_8 = arith.constant 3.200000e+01 : f32
    %19 = vector.broadcast %cst_8 : f32 to vector<8x1xf32>
    %20 = arith.divf %18, %19 : vector<8x1xf32>
    %21 = vector.broadcast %13 : vector<8x1xf32> to vector<8x32xf32>
    %22 = arith.subf %9, %21 : vector<8x32xf32>
    %cst_9 = arith.constant 9.99999974E-6 : f32
    %23 = vector.broadcast %cst_9 : f32 to vector<8x1xf32>
    %24 = arith.addf %20, %23 : vector<8x1xf32>
    %25 = math.rsqrt %24 : vector<8x1xf32>
    %26 = vector.broadcast %25 : vector<8x1xf32> to vector<8x32xf32>
    %27 = arith.mulf %22, %26 : vector<8x32xf32>
    %28 = vector.broadcast %0 : vector<1x32xf32> to vector<8x32xf32>
    %29 = arith.mulf %27, %28 : vector<8x32xf32>
    %30 = vector.broadcast %1 : vector<1x32xf32> to vector<8x32xf32>
    %31 = arith.addf %29, %30 : vector<8x32xf32>
    %32 = arith.truncf %31 : vector<8x32xf32> to vector<8x32xbf16>
    %33 = tpu.iota {dimensions = array<i32: 0>} : vector<8x8xi32>
    %34 = tpu.iota {dimensions = array<i32: 1>} : vector<8x8xi32>
    %35 = arith.cmpi sle, %34, %33 : vector<8x8xi32>
    %c0_10 = arith.constant 0 : index
    %c0_11 = arith.constant 0 : index
    %36 = vector.load %arg12[%c0_10, %c0_11] : memref<1x32xf32, #tpu.memory_space<vmem>>, vector<1x32xf32>
    %37 = vector.broadcast %36 : vector<1x32xf32> to vector<8x32xf32>
    %38 = arith.addf %9, %37 : vector<8x32xf32>
    %c0_12 = arith.constant 0 : index
    %c0_13 = arith.constant 0 : index
    %39 = vector.load %arg27[%c0_12, %c0_13] : memref<8x32xf32, #tpu.memory_space<vmem>>, vector<8x32xf32>
    tpu.vector_store %arg27[%c0_12, %c0_13], %38 {strides = array<i32>} : memref<8x32xf32, #tpu.memory_space<vmem>>, vector<8x32xf32>,
    %c0_i32_14 = arith.constant 0 : i32
    %c4_i32 = arith.constant 4 : i32
    %40 = arith.addi %c0_i32_14, %c4_i32 : i32
    %c1_i32 = arith.constant 1 : i32
    scf.for %arg28 = %c0_i32_14 to %40 step %c1_i32  : i32 {
      %c1_i32_49 = arith.constant 1 : i32
      %96 = arith.muli %arg28, %c1_i32_49 : i32
      %c0_i32_50 = arith.constant 0 : i32
      %97 = arith.addi %c0_i32_50, %96 : i32
      %98 = arith.index_cast %97 : i32 to index
      %c0_51 = arith.constant 0 : index
      %c0_52 = arith.constant 0 : index
      %99 = vector.load %arg5[%98, %c0_51, %c0_52] : memref<4x32x8xbf16, #tpu.memory_space<vmem>>, vector<1x32x8xbf16>
      %100 = vector.shape_cast %99 : vector<1x32x8xbf16> to vector<32x8xbf16>
      %cst_53 = arith.constant dense<0.000000e+00> : vector<8x8xf32>
      %101 = tpu.matmul %32, %100, %cst_53 {dimension_numbers = #tpu.dot_dimension_numbers<[1], [0], [0], [1], [0, 0, 1, 1], [], []>} : vector<8x32xbf16>, vector<32x8xbf16>, vector<8x8xf32> -> vector<8x8xf32>
      %102 = arith.index_cast %97 : i32 to index
      %c0_54 = arith.constant 0 : index
      %c0_55 = arith.constant 0 : index
      %103 = vector.load %arg6[%102, %c0_54, %c0_55] : memref<4x1x8xf32, #tpu.memory_space<vmem>>, vector<1x1x8xf32>
      %104 = vector.shape_cast %103 : vector<1x1x8xf32> to vector<1x8xf32>
      %105 = vector.broadcast %104 : vector<1x8xf32> to vector<8x8xf32>
      %106 = arith.addf %101, %105 : vector<8x8xf32>
      %107 = arith.truncf %106 : vector<8x8xf32> to vector<8x8xbf16>
      %cst_56 = arith.constant -1.000000e+30 : f32
      %108 = vector.broadcast %cst_56 : f32 to vector<8x1xf32>
      %c0_57 = arith.constant 0 : index
      %c0_58 = arith.constant 0 : index
      %109 = vector.load %arg24[%c0_57, %c0_58] : memref<8x1xf32, #tpu.memory_space<vmem>>, vector<8x1xf32>
      tpu.vector_store %arg24[%c0_57, %c0_58], %108 {strides = array<i32>} : memref<8x1xf32, #tpu.memory_space<vmem>>, vector<8x1xf32>,
      %cst_59 = arith.constant 0.000000e+00 : f32
      %110 = vector.broadcast %cst_59 : f32 to vector<8x1xf32>
      %c0_60 = arith.constant 0 : index
      %c0_61 = arith.constant 0 : index
      %111 = vector.load %arg25[%c0_60, %c0_61] : memref<8x1xf32, #tpu.memory_space<vmem>>, vector<8x1xf32>
      tpu.vector_store %arg25[%c0_60, %c0_61], %110 {strides = array<i32>} : memref<8x1xf32, #tpu.memory_space<vmem>>, vector<8x1xf32>,
      %cst_62 = arith.constant 0.000000e+00 : f32
      %112 = vector.broadcast %cst_62 : f32 to vector<8x8xf32>
      %c0_63 = arith.constant 0 : index
      %c0_64 = arith.constant 0 : index
      %113 = vector.load %arg26[%c0_63, %c0_64] : memref<8x8xf32, #tpu.memory_space<vmem>>, vector<8x8xf32>
      tpu.vector_store %arg26[%c0_63, %c0_64], %112 {strides = array<i32>} : memref<8x8xf32, #tpu.memory_space<vmem>>, vector<8x8xf32>,
      %c0_i32_65 = arith.constant 0 : i32
      %114 = arith.subi %arg1, %c0_i32_65 : i32
      %c1_i32_66 = arith.constant 1 : i32
      %c1_i32_67 = arith.constant 1 : i32
      %115 = arith.subi %c1_i32_66, %c1_i32_67 : i32
      %116 = arith.addi %114, %115 : i32
      %c1_i32_68 = arith.constant 1 : i32
      %117 = arith.divsi %116, %c1_i32_68 : i32
      %c1_i32_69 = arith.constant 1 : i32
      %c0_i32_70 = arith.constant 0 : i32
      %c0_i32_71 = arith.constant 0 : i32
      %118 = arith.subi %117, %c0_i32_71 : i32
      %119 = arith.addi %c0_i32_71, %118 : i32
      %c1_i32_72 = arith.constant 1 : i32
      scf.for %arg29 = %c0_i32_71 to %119 step %c1_i32_72  : i32 {
        %169 = arith.muli %arg29, %c1_i32_69 : i32
        %170 = arith.addi %c0_i32_70, %169 : i32
        %c8_i32_104 = arith.constant 8 : i32
        %171 = arith.muli %170, %c8_i32_104 : i32
        %172 = tpu.assume_multiple %171, 8 : i32
        %173 = arith.index_cast %97 : i32 to index
        %174 = arith.index_cast %172 : i32 to index
        %c0_105 = arith.constant 0 : index
        %175 = vector.load %arg22[%173, %174, %c0_105] : memref<4x16x8xbf16, #tpu.memory_space<vmem>>, vector<1x8x8xbf16>
        %176 = vector.shape_cast %175 : vector<1x8x8xbf16> to vector<8x8xbf16>
        %177 = arith.index_cast %97 : i32 to index
        %178 = arith.index_cast %172 : i32 to index
        %c0_106 = arith.constant 0 : index
        %179 = vector.load %arg23[%177, %178, %c0_106] : memref<4x16x8xbf16, #tpu.memory_space<vmem>>, vector<1x8x8xbf16>
        %180 = vector.shape_cast %179 : vector<1x8x8xbf16> to vector<8x8xbf16>
        %cst_107 = arith.constant dense<0.000000e+00> : vector<8x8xf32>
        %181 = tpu.matmul %107, %176, %cst_107 {dimension_numbers = #tpu.dot_dimension_numbers<[1], [1], [0], [0], [0, 0, 1, 0], [], []>} : vector<8x8xbf16>, vector<8x8xbf16>, vector<8x8xf32> -> vector<8x8xf32>
        %cst_108 = arith.constant 0.353553385 : f32
        %182 = vector.broadcast %cst_108 : f32 to vector<8x8xf32>
        %183 = arith.mulf %181, %182 : vector<8x8xf32>
        %c0_109 = arith.constant 0 : index
        %c0_110 = arith.constant 0 : index
        %184 = vector.load %arg24[%c0_109, %c0_110] : memref<8x1xf32, #tpu.memory_space<vmem>>, vector<8x1xf32>
        %cst_111 = arith.constant dense<0xFF800000> : vector<8xf32>
        %185 = vector.multi_reduction <maximumf>, %183, %cst_111 [1] : vector<8x8xf32> to vector<8xf32>
        %186 = vector.shape_cast %185 : vector<8xf32> to vector<8x1xf32>
        %187 = arith.maximumf %184, %186 : vector<8x1xf32>
        %188 = arith.subf %184, %187 : vector<8x1xf32>
        %189 = math.exp %188 : vector<8x1xf32>
        %190 = vector.broadcast %187 : vector<8x1xf32> to vector<8x8xf32>
        %191 = arith.subf %183, %190 : vector<8x8xf32>
        %192 = math.exp %191 : vector<8x8xf32>
        %c0_112 = arith.constant 0 : index
        %c0_113 = arith.constant 0 : index
        %193 = vector.load %arg25[%c0_112, %c0_113] : memref<8x1xf32, #tpu.memory_space<vmem>>, vector<8x1xf32>
        %194 = arith.mulf %189, %193 : vector<8x1xf32>
        %cst_114 = arith.constant dense<0.000000e+00> : vector<8xf32>
        %195 = vector.multi_reduction <add>, %192, %cst_114 [1] : vector<8x8xf32> to vector<8xf32>
        %196 = vector.shape_cast %195 : vector<8xf32> to vector<8x1xf32>
        %197 = arith.addf %194, %196 : vector<8x1xf32>
        %c0_115 = arith.constant 0 : index
        %c0_116 = arith.constant 0 : index
        %198 = vector.load %arg25[%c0_115, %c0_116] : memref<8x1xf32, #tpu.memory_space<vmem>>, vector<8x1xf32>
        tpu.vector_store %arg25[%c0_115, %c0_116], %197 {strides = array<i32>} : memref<8x1xf32, #tpu.memory_space<vmem>>, vector<8x1xf32>,
        %c0_117 = arith.constant 0 : index
        %c0_118 = arith.constant 0 : index
        %199 = vector.load %arg26[%c0_117, %c0_118] : memref<8x8xf32, #tpu.memory_space<vmem>>, vector<8x8xf32>
        %200 = vector.broadcast %189 : vector<8x1xf32> to vector<8x8xf32>
        %201 = arith.mulf %200, %199 : vector<8x8xf32>
        %202 = arith.truncf %192 : vector<8x8xf32> to vector<8x8xbf16>
        %cst_119 = arith.constant dense<0.000000e+00> : vector<8x8xf32>
        %203 = tpu.matmul %202, %180, %cst_119 {dimension_numbers = #tpu.dot_dimension_numbers<[1], [0], [0], [1], [0, 0, 1, 1], [], []>} : vector<8x8xbf16>, vector<8x8xbf16>, vector<8x8xf32> -> vector<8x8xf32>
        %204 = arith.addf %201, %203 : vector<8x8xf32>
        %c0_120 = arith.constant 0 : index
        %c0_121 = arith.constant 0 : index
        %205 = vector.load %arg26[%c0_120, %c0_121] : memref<8x8xf32, #tpu.memory_space<vmem>>, vector<8x8xf32>
        tpu.vector_store %arg26[%c0_120, %c0_121], %204 {strides = array<i32>} : memref<8x8xf32, #tpu.memory_space<vmem>>, vector<8x8xf32>,
        %c0_122 = arith.constant 0 : index
        %c0_123 = arith.constant 0 : index
        %206 = vector.load %arg24[%c0_122, %c0_123] : memref<8x1xf32, #tpu.memory_space<vmem>>, vector<8x1xf32>
        tpu.vector_store %arg24[%c0_122, %c0_123], %187 {strides = array<i32>} : memref<8x1xf32, #tpu.memory_space<vmem>>, vector<8x1xf32>,
      }
      %120 = arith.index_cast %97 : i32 to index
      %121 = arith.index_cast %6 : i32 to index
      %c0_73 = arith.constant 0 : index
      %122 = vector.load %arg22[%120, %121, %c0_73] : memref<4x16x8xbf16, #tpu.memory_space<vmem>>, vector<1x8x8xbf16>
      %123 = vector.shape_cast %122 : vector<1x8x8xbf16> to vector<8x8xbf16>
      %124 = arith.index_cast %97 : i32 to index
      %125 = arith.index_cast %6 : i32 to index
      %c0_74 = arith.constant 0 : index
      %126 = vector.load %arg23[%124, %125, %c0_74] : memref<4x16x8xbf16, #tpu.memory_space<vmem>>, vector<1x8x8xbf16>
      %127 = vector.shape_cast %126 : vector<1x8x8xbf16> to vector<8x8xbf16>
      %cst_75 = arith.constant dense<0.000000e+00> : vector<8x8xf32>
      %128 = tpu.matmul %107, %123, %cst_75 {dimension_numbers = #tpu.dot_dimension_numbers<[1], [1], [0], [0], [0, 0, 1, 0], [], []>} : vector<8x8xbf16>, vector<8x8xbf16>, vector<8x8xf32> -> vector<8x8xf32>
      %cst_76 = arith.constant 0.353553385 : f32
      %129 = vector.broadcast %cst_76 : f32 to vector<8x8xf32>
      %130 = arith.mulf %128, %129 : vector<8x8xf32>
      %cst_77 = arith.constant -1.000000e+30 : f32
      %131 = vector.broadcast %cst_77 : f32 to vector<8x8xf32>
      %132 = arith.select %35, %130, %131 : vector<8x8xi1>, vector<8x8xf32>
      %c0_78 = arith.constant 0 : index
      %c0_79 = arith.constant 0 : index
      %133 = vector.load %arg24[%c0_78, %c0_79] : memref<8x1xf32, #tpu.memory_space<vmem>>, vector<8x1xf32>
      %cst_80 = arith.constant dense<0xFF800000> : vector<8xf32>
      %134 = vector.multi_reduction <maximumf>, %132, %cst_80 [1] : vector<8x8xf32> to vector<8xf32>
      %135 = vector.shape_cast %134 : vector<8xf32> to vector<8x1xf32>
      %136 = arith.maximumf %133, %135 : vector<8x1xf32>
      %137 = arith.subf %133, %136 : vector<8x1xf32>
      %138 = math.exp %137 : vector<8x1xf32>
      %139 = vector.broadcast %136 : vector<8x1xf32> to vector<8x8xf32>
      %140 = arith.subf %132, %139 : vector<8x8xf32>
      %141 = math.exp %140 : vector<8x8xf32>
      %c0_81 = arith.constant 0 : index
      %c0_82 = arith.constant 0 : index
      %142 = vector.load %arg25[%c0_81, %c0_82] : memref<8x1xf32, #tpu.memory_space<vmem>>, vector<8x1xf32>
      %143 = arith.mulf %138, %142 : vector<8x1xf32>
      %cst_83 = arith.constant dense<0.000000e+00> : vector<8xf32>
      %144 = vector.multi_reduction <add>, %141, %cst_83 [1] : vector<8x8xf32> to vector<8xf32>
      %145 = vector.shape_cast %144 : vector<8xf32> to vector<8x1xf32>
      %146 = arith.addf %143, %145 : vector<8x1xf32>
      %c0_84 = arith.constant 0 : index
      %c0_85 = arith.constant 0 : index
      %147 = vector.load %arg25[%c0_84, %c0_85] : memref<8x1xf32, #tpu.memory_space<vmem>>, vector<8x1xf32>
      tpu.vector_store %arg25[%c0_84, %c0_85], %146 {strides = array<i32>} : memref<8x1xf32, #tpu.memory_space<vmem>>, vector<8x1xf32>,
      %c0_86 = arith.constant 0 : index
      %c0_87 = arith.constant 0 : index
      %148 = vector.load %arg26[%c0_86, %c0_87] : memref<8x8xf32, #tpu.memory_space<vmem>>, vector<8x8xf32>
      %149 = vector.broadcast %138 : vector<8x1xf32> to vector<8x8xf32>
      %150 = arith.mulf %149, %148 : vector<8x8xf32>
      %151 = arith.truncf %141 : vector<8x8xf32> to vector<8x8xbf16>
      %cst_88 = arith.constant dense<0.000000e+00> : vector<8x8xf32>
      %152 = tpu.matmul %151, %127, %cst_88 {dimension_numbers = #tpu.dot_dimension_numbers<[1], [0], [0], [1], [0, 0, 1, 1], [], []>} : vector<8x8xbf16>, vector<8x8xbf16>, vector<8x8xf32> -> vector<8x8xf32>
      %153 = arith.addf %150, %152 : vector<8x8xf32>
      %c0_89 = arith.constant 0 : index
      %c0_90 = arith.constant 0 : index
      %154 = vector.load %arg26[%c0_89, %c0_90] : memref<8x8xf32, #tpu.memory_space<vmem>>, vector<8x8xf32>
      tpu.vector_store %arg26[%c0_89, %c0_90], %153 {strides = array<i32>} : memref<8x8xf32, #tpu.memory_space<vmem>>, vector<8x8xf32>,
      %c0_91 = arith.constant 0 : index
      %c0_92 = arith.constant 0 : index
      %155 = vector.load %arg24[%c0_91, %c0_92] : memref<8x1xf32, #tpu.memory_space<vmem>>, vector<8x1xf32>
      tpu.vector_store %arg24[%c0_91, %c0_92], %136 {strides = array<i32>} : memref<8x1xf32, #tpu.memory_space<vmem>>, vector<8x1xf32>,
      %c0_93 = arith.constant 0 : index
      %c0_94 = arith.constant 0 : index
      %156 = vector.load %arg26[%c0_93, %c0_94] : memref<8x8xf32, #tpu.memory_space<vmem>>, vector<8x8xf32>
      %c0_95 = arith.constant 0 : index
      %c0_96 = arith.constant 0 : index
      %157 = vector.load %arg25[%c0_95, %c0_96] : memref<8x1xf32, #tpu.memory_space<vmem>>, vector<8x1xf32>
      %158 = tpu.reciprocal %157 {approx = true} : vector<8x1xf32> -> vector<8x1xf32>
      %159 = vector.broadcast %158 : vector<8x1xf32> to vector<8x8xf32>
      %160 = arith.mulf %156, %159 : vector<8x8xf32>
      %161 = arith.truncf %160 : vector<8x8xf32> to vector<8x8xbf16>
      %c0_97 = arith.constant 0 : index
      %c0_98 = arith.constant 0 : index
      %162 = vector.load %arg27[%c0_97, %c0_98] : memref<8x32xf32, #tpu.memory_space<vmem>>, vector<8x32xf32>
      %163 = arith.index_cast %97 : i32 to index
      %c0_99 = arith.constant 0 : index
      %c0_100 = arith.constant 0 : index
      %164 = vector.load %arg11[%163, %c0_99, %c0_100] : memref<4x8x32xbf16, #tpu.memory_space<vmem>>, vector<1x8x32xbf16>
      %165 = vector.shape_cast %164 : vector<1x8x32xbf16> to vector<8x32xbf16>
      %cst_101 = arith.constant dense<0.000000e+00> : vector<8x32xf32>
      %166 = tpu.matmul %161, %165, %cst_101 {dimension_numbers = #tpu.dot_dimension_numbers<[1], [0], [0], [1], [0, 0, 1, 1], [], []>} : vector<8x8xbf16>, vector<8x32xbf16>, vector<8x32xf32> -> vector<8x32xf32>
      %167 = arith.addf %162, %166 : vector<8x32xf32>
      %c0_102 = arith.constant 0 : index
      %c0_103 = arith.constant 0 : index
      %168 = vector.load %arg27[%c0_102, %c0_103] : memref<8x32xf32, #tpu.memory_space<vmem>>, vector<8x32xf32>
      tpu.vector_store %arg27[%c0_102, %c0_103], %167 {strides = array<i32>} : memref<8x32xf32, #tpu.memory_space<vmem>>, vector<8x32xf32>,
    }
    %c4_i32_15 = arith.constant 4 : i32
    %c0_16 = arith.constant 0 : index
    %c0_17 = arith.constant 0 : index
    %41 = vector.load %arg27[%c0_16, %c0_17] : memref<8x32xf32, #tpu.memory_space<vmem>>, vector<8x32xf32>
    %c0_18 = arith.constant 0 : index
    %c0_19 = arith.constant 0 : index
    %42 = vector.load %arg13[%c0_18, %c0_19] : memref<1x32xf32, #tpu.memory_space<vmem>>, vector<1x32xf32>
    %c0_20 = arith.constant 0 : index
    %c0_21 = arith.constant 0 : index
    %43 = vector.load %arg14[%c0_20, %c0_21] : memref<1x32xf32, #tpu.memory_space<vmem>>, vector<1x32xf32>
    %cst_22 = arith.constant dense<0.000000e+00> : vector<8xf32>
    %44 = vector.multi_reduction <add>, %41, %cst_22 [1] : vector<8x32xf32> to vector<8xf32>
    %45 = vector.shape_cast %44 : vector<8xf32> to vector<8x1xf32>
    %cst_23 = arith.constant 3.200000e+01 : f32
    %46 = vector.broadcast %cst_23 : f32 to vector<8x1xf32>
    %47 = arith.divf %45, %46 : vector<8x1xf32>
    %48 = vector.broadcast %47 : vector<8x1xf32> to vector<8x32xf32>
    %49 = arith.subf %41, %48 : vector<8x32xf32>
    %50 = arith.mulf %49, %49 : vector<8x32xf32>
    %cst_24 = arith.constant dense<0.000000e+00> : vector<8xf32>
    %51 = vector.multi_reduction <add>, %50, %cst_24 [1] : vector<8x32xf32> to vector<8xf32>
    %52 = vector.shape_cast %51 : vector<8xf32> to vector<8x1xf32>
    %cst_25 = arith.constant 3.200000e+01 : f32
    %53 = vector.broadcast %cst_25 : f32 to vector<8x1xf32>
    %54 = arith.divf %52, %53 : vector<8x1xf32>
    %55 = vector.broadcast %47 : vector<8x1xf32> to vector<8x32xf32>
    %56 = arith.subf %41, %55 : vector<8x32xf32>
    %cst_26 = arith.constant 9.99999974E-6 : f32
    %57 = vector.broadcast %cst_26 : f32 to vector<8x1xf32>
    %58 = arith.addf %54, %57 : vector<8x1xf32>
    %59 = math.rsqrt %58 : vector<8x1xf32>
    %60 = vector.broadcast %59 : vector<8x1xf32> to vector<8x32xf32>
    %61 = arith.mulf %56, %60 : vector<8x32xf32>
    %62 = vector.broadcast %42 : vector<1x32xf32> to vector<8x32xf32>
    %63 = arith.mulf %61, %62 : vector<8x32xf32>
    %64 = vector.broadcast %43 : vector<1x32xf32> to vector<8x32xf32>
    %65 = arith.addf %63, %64 : vector<8x32xf32>
    %66 = arith.truncf %65 : vector<8x32xf32> to vector<8x32xbf16>
    %c0_27 = arith.constant 0 : index
    %c0_28 = arith.constant 0 : index
    %67 = vector.load %arg15[%c0_27, %c0_28] : memref<32x128xbf16, #tpu.memory_space<vmem>>, vector<32x128xbf16>
    %cst_29 = arith.constant dense<0.000000e+00> : vector<8x128xf32>
    %68 = tpu.matmul %66, %67, %cst_29 {dimension_numbers = #tpu.dot_dimension_numbers<[1], [0], [0], [1], [0, 0, 1, 1], [], []>} : vector<8x32xbf16>, vector<32x128xbf16>, vector<8x128xf32> -> vector<8x128xf32>
    %c0_30 = arith.constant 0 : index
    %c0_31 = arith.constant 0 : index
    %69 = vector.load %arg16[%c0_30, %c0_31] : memref<1x128xf32, #tpu.memory_space<vmem>>, vector<1x128xf32>
    %70 = vector.broadcast %69 : vector<1x128xf32> to vector<8x128xf32>
    %71 = arith.addf %68, %70 : vector<8x128xf32>
    %cst_32 = arith.constant 5.000000e-01 : f32
    %72 = vector.broadcast %cst_32 : f32 to vector<8x128xf32>
    %73 = arith.mulf %72, %71 : vector<8x128xf32>
    %cst_33 = arith.constant 0.707106769 : f32
    %74 = vector.broadcast %cst_33 : f32 to vector<8x128xf32>
    %75 = arith.mulf %71, %74 : vector<8x128xf32>
    %76 = math.erf %75 : vector<8x128xf32>
    %cst_34 = arith.constant 1.000000e+00 : f32
    %77 = vector.broadcast %cst_34 : f32 to vector<8x128xf32>
    %78 = arith.addf %77, %76 : vector<8x128xf32>
    %79 = arith.mulf %73, %78 : vector<8x128xf32>
    %80 = arith.truncf %79 : vector<8x128xf32> to vector<8x128xbf16>
    %c0_35 = arith.constant 0 : index
    %c0_36 = arith.constant 0 : index
    %81 = vector.load %arg17[%c0_35, %c0_36] : memref<128x32xbf16, #tpu.memory_space<vmem>>, vector<128x32xbf16>
    %cst_37 = arith.constant dense<0.000000e+00> : vector<8x32xf32>
    %82 = tpu.matmul %80, %81, %cst_37 {dimension_numbers = #tpu.dot_dimension_numbers<[1], [0], [0], [1], [0, 0, 1, 1], [], []>} : vector<8x128xbf16>, vector<128x32xbf16>, vector<8x32xf32> -> vector<8x32xf32>
    %c0_38 = arith.constant 0 : index
    %c0_39 = arith.constant 0 : index
    %83 = vector.load %arg18[%c0_38, %c0_39] : memref<1x32xf32, #tpu.memory_space<vmem>>, vector<1x32xf32>
    %84 = vector.broadcast %83 : vector<1x32xf32> to vector<8x32xf32>
    %85 = arith.addf %82, %84 : vector<8x32xf32>
    %86 = arith.addf %41, %85 : vector<8x32xf32>
    %c0_40 = arith.constant 0 : index
    %c0_41 = arith.constant 0 : index
    %c0_42 = arith.constant 0 : index
    %87 = vector.load %arg19[%c0_40, %c0_41, %c0_42] : memref<1x8x32xf32, #tpu.memory_space<vmem>>, vector<1x8x32xf32>
    %88 = vector.shape_cast %87 : vector<1x8x32xf32> to vector<8x32xf32>
    %89 = vector.shape_cast %86 : vector<8x32xf32> to vector<1x8x32xf32>
    tpu.vector_store %arg19[%c0_40, %c0_41, %c0_42], %89 {strides = array<i32>} : memref<1x8x32xf32, #tpu.memory_space<vmem>>, vector<1x8x32xf32>,
    %c0_43 = arith.constant 0 : index
    %c0_44 = arith.constant 0 : index
    %c0_45 = arith.constant 0 : index
    %90 = vector.load %arg20[%c0_43, %c0_44, %c0_45] : memref<1x8x32xf32, #tpu.memory_space<vmem>>, vector<1x8x32xf32>
    %91 = vector.shape_cast %90 : vector<1x8x32xf32> to vector<8x32xf32>
    %92 = vector.shape_cast %65 : vector<8x32xf32> to vector<1x8x32xf32>
    tpu.vector_store %arg20[%c0_43, %c0_44, %c0_45], %92 {strides = array<i32>} : memref<1x8x32xf32, #tpu.memory_space<vmem>>, vector<1x8x32xf32>,
    %c0_46 = arith.constant 0 : index
    %c0_47 = arith.constant 0 : index
    %c0_48 = arith.constant 0 : index
    %93 = vector.load %arg21[%c0_46, %c0_47, %c0_48] : memref<1x8x32xf32, #tpu.memory_space<vmem>>, vector<1x8x32xf32>
    %94 = vector.shape_cast %93 : vector<1x8x32xf32> to vector<8x32xf32>
    %95 = vector.shape_cast %85 : vector<8x32xf32> to vector<1x8x32xf32>
    tpu.vector_store %arg21[%c0_46, %c0_47, %c0_48], %95 {strides = array<i32>} : memref<1x8x32xf32, #tpu.memory_space<vmem>>, vector<1x8x32xf32>,
    return
  }
  func.func @transform_0(%arg0: i32, %arg1: i32) -> (i32, i32, i32) {
    %c0_i32 = arith.constant 0 : i32
    %c0_i32_0 = arith.constant 0 : i32
    %c0_i32_1 = arith.constant 0 : i32
    return %arg0, %c0_i32, %c0_i32_0 : i32, i32, i32
  }
  func.func @transform_1(%arg0: i32, %arg1: i32) -> (i32, i32) {
    %c0_i32 = arith.constant 0 : i32
    %c0_i32_0 = arith.constant 0 : i32
    %c0_i32_1 = arith.constant 0 : i32
    return %c0_i32, %c0_i32_0 : i32, i32
  }
  func.func @transform_2(%arg0: i32, %arg1: i32) -> (i32, i32) {
    %c0_i32 = arith.constant 0 : i32
    %c0_i32_0 = arith.constant 0 : i32
    %c0_i32_1 = arith.constant 0 : i32
    return %c0_i32, %c0_i32_0 : i32, i32
  }
  func.func @transform_3(%arg0: i32, %arg1: i32) -> (i32, i32, i32) {
    %c0_i32 = arith.constant 0 : i32
    %c0_i32_0 = arith.constant 0 : i32
    %c0_i32_1 = arith.constant 0 : i32
    %c0_i32_2 = arith.constant 0 : i32
    return %c0_i32, %c0_i32_0, %c0_i32_1 : i32, i32, i32
  }
  func.func @transform_4(%arg0: i32, %arg1: i32) -> (i32, i32, i32) {
    %c0_i32 = arith.constant 0 : i32
    %c0_i32_0 = arith.constant 0 : i32
    %c0_i32_1 = arith.constant 0 : i32
    %c0_i32_2 = arith.constant 0 : i32
    return %c0_i32, %c0_i32_0, %c0_i32_1 : i32, i32, i32
  }
  func.func @transform_5(%arg0: i32, %arg1: i32) -> (i32, i32, i32) {
    %c0_i32 = arith.constant 0 : i32
    %c0_i32_0 = arith.constant 0 : i32
    %c0_i32_1 = arith.constant 0 : i32
    %c0_i32_2 = arith.constant 0 : i32
    return %c0_i32, %c0_i32_0, %c0_i32_1 : i32, i32, i32
  }
  func.func @transform_6(%arg0: i32, %arg1: i32) -> (i32, i32, i32) {
    %c0_i32 = arith.constant 0 : i32
    %c0_i32_0 = arith.constant 0 : i32
    %c0_i32_1 = arith.constant 0 : i32
    %c0_i32_2 = arith.constant 0 : i32
    return %c0_i32, %c0_i32_0, %c0_i32_1 : i32, i32, i32
  }
  func.func @transform_7(%arg0: i32, %arg1: i32) -> (i32, i32, i32) {
    %c0_i32 = arith.constant 0 : i32
    %c0_i32_0 = arith.constant 0 : i32
    %c0_i32_1 = arith.constant 0 : i32
    %c0_i32_2 = arith.constant 0 : i32
    return %c0_i32, %c0_i32_0, %c0_i32_1 : i32, i32, i32
  }
  func.func @transform_8(%arg0: i32, %arg1: i32) -> (i32, i32, i32) {
    %c0_i32 = arith.constant 0 : i32
    %c0_i32_0 = arith.constant 0 : i32
    %c0_i32_1 = arith.constant 0 : i32
    %c0_i32_2 = arith.constant 0 : i32
    return %c0_i32, %c0_i32_0, %c0_i32_1 : i32, i32, i32
  }
  func.func @transform_9(%arg0: i32, %arg1: i32) -> (i32, i32, i32) {
    %c0_i32 = arith.constant 0 : i32
    %c0_i32_0 = arith.constant 0 : i32
    %c0_i32_1 = arith.constant 0 : i32
    %c0_i32_2 = arith.constant 0 : i32
    return %c0_i32, %c0_i32_0, %c0_i32_1 : i32, i32, i32
  }
  func.func @transform_10(%arg0: i32, %arg1: i32) -> (i32, i32) {
    %c0_i32 = arith.constant 0 : i32
    %c0_i32_0 = arith.constant 0 : i32
    %c0_i32_1 = arith.constant 0 : i32
    return %c0_i32, %c0_i32_0 : i32, i32
  }
  func.func @transform_11(%arg0: i32, %arg1: i32) -> (i32, i32) {
    %c0_i32 = arith.constant 0 : i32
    %c0_i32_0 = arith.constant 0 : i32
    %c0_i32_1 = arith.constant 0 : i32
    return %c0_i32, %c0_i32_0 : i32, i32
  }
  func.func @transform_12(%arg0: i32, %arg1: i32) -> (i32, i32) {
    %c0_i32 = arith.constant 0 : i32
    %c0_i32_0 = arith.constant 0 : i32
    %c0_i32_1 = arith.constant 0 : i32
    return %c0_i32, %c0_i32_0 : i32, i32
  }
  func.func @transform_13(%arg0: i32, %arg1: i32) -> (i32, i32) {
    %c0_i32 = arith.constant 0 : i32
    %c0_i32_0 = arith.constant 0 : i32
    %c0_i32_1 = arith.constant 0 : i32
    return %c0_i32, %c0_i32_0 : i32, i32
  }
  func.func @transform_14(%arg0: i32, %arg1: i32) -> (i32, i32) {
    %c0_i32 = arith.constant 0 : i32
    %c0_i32_0 = arith.constant 0 : i32
    %c0_i32_1 = arith.constant 0 : i32
    return %c0_i32, %c0_i32_0 : i32, i32
  }
  func.func @transform_15(%arg0: i32, %arg1: i32) -> (i32, i32) {
    %c0_i32 = arith.constant 0 : i32
    %c0_i32_0 = arith.constant 0 : i32
    %c0_i32_1 = arith.constant 0 : i32
    return %c0_i32, %c0_i32_0 : i32, i32
  }
  func.func @transform_16(%arg0: i32, %arg1: i32) -> (i32, i32) {
    %c0_i32 = arith.constant 0 : i32
    %c0_i32_0 = arith.constant 0 : i32
    %c0_i32_1 = arith.constant 0 : i32
    return %c0_i32, %c0_i32_0 : i32, i32
  }
  func.func @transform_17(%arg0: i32, %arg1: i32) -> (i32, i32, i32) {
    %c0_i32 = arith.constant 0 : i32
    %c0_i32_0 = arith.constant 0 : i32
    return %arg0, %arg1, %c0_i32 : i32, i32, i32
  }
  func.func @transform_18(%arg0: i32, %arg1: i32) -> (i32, i32, i32) {
    %c0_i32 = arith.constant 0 : i32
    %c0_i32_0 = arith.constant 0 : i32
    return %arg0, %arg1, %c0_i32 : i32, i32, i32
  }
  func.func @transform_19(%arg0: i32, %arg1: i32) -> (i32, i32, i32) {
    %c0_i32 = arith.constant 0 : i32
    %c0_i32_0 = arith.constant 0 : i32
    return %arg0, %arg1, %c0_i32 : i32, i32, i32
  }
}

module attributes {stable_mosaic.version = 11 : i64} {
  func.func @block_kernel(%arg0: i32, %arg1: i32, %arg2: memref<1x16x32xf32, #tpu.memory_space<vmem>>, %arg3: memref<1x32xf32, #tpu.memory_space<vmem>>, %arg4: memref<1x32xf32, #tpu.memory_space<vmem>>, %arg5: memref<4x32x8xbf16, #tpu.memory_space<vmem>>, %arg6: memref<4x1x8xf32, #tpu.memory_space<vmem>>, %arg7: memref<4x32x8xbf16, #tpu.memory_space<vmem>>, %arg8: memref<4x1x8xf32, #tpu.memory_space<vmem>>, %arg9: memref<4x32x8xbf16, #tpu.memory_space<vmem>>, %arg10: memref<4x1x8xf32, #tpu.memory_space<vmem>>, %arg11: memref<4x8x32xbf16, #tpu.memory_space<vmem>>, %arg12: memref<1x32xf32, #tpu.memory_space<vmem>>, %arg13: memref<1x32xf32, #tpu.memory_space<vmem>>, %arg14: memref<1x32xf32, #tpu.memory_space<vmem>>, %arg15: memref<32x128xbf16, #tpu.memory_space<vmem>>, %arg16: memref<1x128xf32, #tpu.memory_space<vmem>>, %arg17: memref<128x32xbf16, #tpu.memory_space<vmem>>, %arg18: memref<1x32xf32, #tpu.memory_space<vmem>>, %arg19: memref<1x8x32xf32, #tpu.memory_space<vmem>>, %arg20: memref<1x8x32xf32, #tpu.memory_space<vmem>>, %arg21: memref<1x8x32xf32, #tpu.memory_space<vmem>>, %arg22: memref<4x16x8xbf16, #tpu.memory_space<vmem>>, %arg23: memref<4x16x8xbf16, #tpu.memory_space<vmem>>, %arg24: memref<8x1xf32, #tpu.memory_space<vmem>>, %arg25: memref<8x1xf32, #tpu.memory_space<vmem>>, %arg26: memref<8x8xf32, #tpu.memory_space<vmem>>, %arg27: memref<8x32xf32, #tpu.memory_space<vmem>>) attributes {dimension_semantics = [#tpu.dimension_semantics<parallel>, #tpu.dimension_semantics<arbitrary>], iteration_bounds = array<i64: 2, 2>, scalar_prefetch = 0 : i64, scratch_operands = 6 : i64, tpu.core_type = #tpu.core_type<tc>, window_params = [{transform_indices = @transform_0, window_bounds = array<i64: 1, 16, 32>}, {pipeline_mode = #tpu.pipeline_mode<synchronous>, transform_indices = @transform_1, window_bounds = array<i64: 1, 32>}, {pipeline_mode = #tpu.pipeline_mode<synchronous>, transform_indices = @transform_2, window_bounds = array<i64: 1, 32>}, {pipeline_mode = #tpu.pipeline_mode<synchronous>, transform_indices = @transform_3, window_bounds = array<i64: 4, 32, 8>}, {pipeline_mode = #tpu.pipeline_mode<synchronous>, transform_indices = @transform_4, window_bounds = array<i64: 4, 1, 8>}, {pipeline_mode = #tpu.pipeline_mode<synchronous>, transform_indices = @transform_5, window_bounds = array<i64: 4, 32, 8>}, {pipeline_mode = #tpu.pipeline_mode<synchronous>, transform_indices = @transform_6, window_bounds = array<i64: 4, 1, 8>}, {pipeline_mode = #tpu.pipeline_mode<synchronous>, transform_indices = @transform_7, window_bounds = array<i64: 4, 32, 8>}, {pipeline_mode = #tpu.pipeline_mode<synchronous>, transform_indices = @transform_8, window_bounds = array<i64: 4, 1, 8>}, {pipeline_mode = #tpu.pipeline_mode<synchronous>, transform_indices = @transform_9, window_bounds = array<i64: 4, 8, 32>}, {pipeline_mode = #tpu.pipeline_mode<synchronous>, transform_indices = @transform_10, window_bounds = array<i64: 1, 32>}, {pipeline_mode = #tpu.pipeline_mode<synchronous>, transform_indices = @transform_11, window_bounds = array<i64: 1, 32>}, {pipeline_mode = #tpu.pipeline_mode<synchronous>, transform_indices = @transform_12, window_bounds = array<i64: 1, 32>}, {pipeline_mode = #tpu.pipeline_mode<synchronous>, transform_indices = @transform_13, window_bounds = array<i64: 32, 128>}, {pipeline_mode = #tpu.pipeline_mode<synchronous>, transform_indices = @transform_14, window_bounds = array<i64: 1, 128>}, {pipeline_mode = #tpu.pipeline_mode<synchronous>, transform_indices = @transform_15, window_bounds = array<i64: 128, 32>}, {pipeline_mode = #tpu.pipeline_mode<synchronous>, transform_indices = @transform_16, window_bounds = array<i64: 1, 32>}, {transform_indices = @transform_17, window_bounds = array<i64: 1, 8, 32>}, {transform_indices = @transform_18, window_bounds = array<i64: 1, 8, 32>}, {transform_indices = @transform_19, window_bounds = array<i64: 1, 8, 32>}]} {
    %c0 = arith.constant 0 : index
    %c0_0 = arith.constant 0 : index
    %0 = vector.load %arg3[%c0, %c0_0] : memref<1x32xf32, #tpu.memory_space<vmem>>, vector<1x32xf32>
    %c0_1 = arith.constant 0 : index
    %c0_2 = arith.constant 0 : index
    %1 = vector.load %arg4[%c0_1, %c0_2] : memref<1x32xf32, #tpu.memory_space<vmem>>, vector<1x32xf32>
    %c0_i32 = arith.constant 0 : i32
    %2 = arith.cmpi eq, %arg1, %c0_i32 : i32
    %3 = arith.extui %2 : i1 to i32
    %c0_i32_3 = arith.constant 0 : i32
    %4 = arith.cmpi ne, %3, %c0_i32_3 : i32
    scf.if %4 {
      %c0_49 = arith.constant 0 : index
      %c0_50 = arith.constant 0 : index
      %c0_51 = arith.constant 0 : index
      %96 = vector.load %arg2[%c0_49, %c0_50, %c0_51] : memref<1x16x32xf32, #tpu.memory_space<vmem>>, vector<1x16x32xf32>
      %97 = vector.shape_cast %96 : vector<1x16x32xf32> to vector<16x32xf32>
      %cst_52 = arith.constant dense<0.000000e+00> : vector<16xf32>
      %98 = vector.multi_reduction <add>, %97, %cst_52 [1] : vector<16x32xf32> to vector<16xf32>
      %99 = vector.shape_cast %98 : vector<16xf32> to vector<16x1xf32>
      %cst_53 = arith.constant 3.200000e+01 : f32
      %100 = vector.broadcast %cst_53 : f32 to vector<16x1xf32>
      %101 = arith.divf %99, %100 : vector<16x1xf32>
      %102 = vector.broadcast %101 : vector<16x1xf32> to vector<16x32xf32>
      %103 = arith.subf %97, %102 : vector<16x32xf32>
      %104 = arith.mulf %103, %103 : vector<16x32xf32>
      %cst_54 = arith.constant dense<0.000000e+00> : vector<16xf32>
      %105 = vector.multi_reduction <add>, %104, %cst_54 [1] : vector<16x32xf32> to vector<16xf32>
      %106 = vector.shape_cast %105 : vector<16xf32> to vector<16x1xf32>
      %cst_55 = arith.constant 3.200000e+01 : f32
      %107 = vector.broadcast %cst_55 : f32 to vector<16x1xf32>
      %108 = arith.divf %106, %107 : vector<16x1xf32>
      %109 = vector.broadcast %101 : vector<16x1xf32> to vector<16x32xf32>
      %110 = arith.subf %97, %109 : vector<16x32xf32>
      %cst_56 = arith.constant 9.99999974E-6 : f32
      %111 = vector.broadcast %cst_56 : f32 to vector<16x1xf32>
      %112 = arith.addf %108, %111 : vector<16x1xf32>
      %113 = math.rsqrt %112 : vector<16x1xf32>
      %114 = vector.broadcast %113 : vector<16x1xf32> to vector<16x32xf32>
      %115 = arith.mulf %110, %114 : vector<16x32xf32>
      %116 = vector.broadcast %0 : vector<1x32xf32> to vector<16x32xf32>
      %117 = arith.mulf %115, %116 : vector<16x32xf32>
      %118 = vector.broadcast %1 : vector<1x32xf32> to vector<16x32xf32>
      %119 = arith.addf %117, %118 : vector<16x32xf32>
      %120 = arith.truncf %119 : vector<16x32xf32> to vector<16x32xbf16>
      %c0_i32_57 = arith.constant 0 : i32
      %c4_i32_58 = arith.constant 4 : i32
      %121 = arith.addi %c0_i32_57, %c4_i32_58 : i32
      %c1_i32_59 = arith.constant 1 : i32
      scf.for %arg28 = %c0_i32_57 to %121 step %c1_i32_59  : i32 {
        %c1_i32_61 = arith.constant 1 : i32
        %122 = arith.muli %arg28, %c1_i32_61 : i32
        %c0_i32_62 = arith.constant 0 : i32
        %123 = arith.addi %c0_i32_62, %122 : i32
        %124 = arith.index_cast %123 : i32 to index
        %c0_63 = arith.constant 0 : index
        %c0_64 = arith.constant 0 : index
        %125 = vector.load %arg7[%124, %c0_63, %c0_64] : memref<4x32x8xbf16, #tpu.memory_space<vmem>>, vector<1x32x8xbf16>
        %126 = vector.shape_cast %125 : vector<1x32x8xbf16> to vector<32x8xbf16>
        %cst_65 = arith.constant dense<0.000000e+00> : vector<16x8xf32>
        %127 = tpu.matmul %120, %126, %cst_65 {dimension_numbers = #tpu.dot_dimension_numbers<[1], [0], [0], [1], [0, 0, 1, 1], [], []>} : vector<16x32xbf16>, vector<32x8xbf16>, vector<16x8xf32> -> vector<16x8xf32>
        %128 = arith.index_cast %123 : i32 to index
        %c0_66 = arith.constant 0 : index
        %c0_67 = arith.constant 0 : index
        %129 = vector.load %arg8[%128, %c0_66, %c0_67] : memref<4x1x8xf32, #tpu.memory_space<vmem>>, vector<1x1x8xf32>
        %130 = vector.shape_cast %129 : vector<1x1x8xf32> to vector<1x8xf32>
        %131 = vector.broadcast %130 : vector<1x8xf32> to vector<16x8xf32>
        %132 = arith.addf %127, %131 : vector<16x8xf32>
        %133 = arith.truncf %132 : vector<16x8xf32> to vector<16x8xbf16>
        %134 = arith.index_cast %123 : i32 to index
        %c0_68 = arith.constant 0 : index
        %c0_69 = arith.constant 0 : index
        %135 = vector.load %arg22[%134, %c0_68, %c0_69] : memref<4x16x8xbf16, #tpu.memory_space<vmem>>, vector<1x16x8xbf16>
        %136 = vector.shape_cast %135 : vector<1x16x8xbf16> to vector<16x8xbf16>
        %137 = vector.shape_cast %133 : vector<16x8xbf16> to vector<1x16x8xbf16>
        tpu.vector_store %arg22[%134, %c0_68, %c0_69], %137 {strides = array<i32>} : memref<4x16x8xbf16, #tpu.memory_space<vmem>>, vector<1x16x8xbf16>,
        %138 = arith.index_cast %123 : i32 to index
        %c0_70 = arith.constant 0 : index
        %c0_71 = arith.constant 0 : index
        %139 = vector.load %arg9[%138, %c0_70, %c0_71] : memref<4x32x8xbf16, #tpu.memory_space<vmem>>, vector<1x32x8xbf16>
        %140 = vector.shape_cast %139 : vector<1x32x8xbf16> to vector<32x8xbf16>
        %cst_72 = arith.constant dense<0.000000e+00> : vector<16x8xf32>
        %141 = tpu.matmul %120, %140, %cst_72 {dimension_numbers = #tpu.dot_dimension_numbers<[1], [0], [0], [1], [0, 0, 1, 1], [], []>} : vector<16x32xbf16>, vector<32x8xbf16>, vector<16x8xf32> -> vector<16x8xf32>
        %142 = arith.index_cast %123 : i32 to index
        %c0_73 = arith.constant 0 : index
        %c0_74 = arith.constant 0 : index
        %143 = vector.load %arg10[%142, %c0_73, %c0_74] : memref<4x1x8xf32, #tpu.memory_space<vmem>>, vector<1x1x8xf32>
        %144 = vector.shape_cast %143 : vector<1x1x8xf32> to vector<1x8xf32>
        %145 = vector.broadcast %144 : vector<1x8xf32> to vector<16x8xf32>
        %146 = arith.addf %141, %145 : vector<16x8xf32>
        %147 = arith.truncf %146 : vector<16x8xf32> to vector<16x8xbf16>
        %148 = arith.index_cast %123 : i32 to index
        %c0_75 = arith.constant 0 : index
        %c0_76 = arith.constant 0 : index
        %149 = vector.load %arg23[%148, %c0_75, %c0_76] : memref<4x16x8xbf16, #tpu.memory_space<vmem>>, vector<1x16x8xbf16>
        %150 = vector.shape_cast %149 : vector<1x16x8xbf16> to vector<16x8xbf16>
        %151 = vector.shape_cast %147 : vector<16x8xbf16> to vector<1x16x8xbf16>
        tpu.vector_store %arg23[%148, %c0_75, %c0_76], %151 {strides = array<i32>} : memref<4x16x8xbf16, #tpu.memory_space<vmem>>, vector<1x16x8xbf16>,
      }
      %c4_i32_60 = arith.constant 4 : i32
    } else {
    }
    %c8_i32 = arith.constant 8 : i32
    %5 = arith.muli %arg1, %c8_i32 : i32
    %6 = tpu.assume_multiple %5, 8 : i32
    %c0_4 = arith.constant 0 : index
    %7 = arith.index_cast %6 : i32 to index
    %c0_5 = arith.constant 0 : index
    %8 = vector.load %arg2[%c0_4, %7, %c0_5] : memref<1x16x32xf32, #tpu.memory_space<vmem>>, vector<1x8x32xf32>
    %9 = vector.shape_cast %8 : vector<1x8x32xf32> to vector<8x32xf32>
    %cst = arith.constant dense<0.000000e+00> : vector<8xf32>
    %10 = vector.multi_reduction <add>, %9, %cst [1] : vector<8x32xf32> to vector<8xf32>
    %11 = vector.shape_cast %10 : vector<8xf32> to vector<8x1xf32>
    %cst_6 = arith.constant 3.200000e+01 : f32
    %12 = vector.broadcast %cst_6 : f32 to vector<8x1xf32>
    %13 = arith.divf %11, %12 : vector<8x1xf32>
    %14 = vector.broadcast %13 : vector<8x1xf32> to vector<8x32xf32>
    %15 = arith.subf %9, %14 : vector<8x32xf32>
    %16 = arith.mulf %15, %15 : vector<8x32xf32>
    %cst_7 = arith.constant dense<0.000000e+00> : vector<8xf32>
    %17 = vector.multi_reduction <add>, %16, %cst_7 [1] : vector<8x32xf32> to vector<8xf32>
    %18 = vector.shape_cast %17 : vector<8xf32> to vector<8x1xf32>
    %cst_8 = arith.constant 3.200000e+01 : f32
    %19 = vector.broadcast %cst_8 : f32 to vector<8x1xf32>
    %20 = arith.divf %18, %19 : vector<8x1xf32>
    %21 = vector.broadcast %13 : vector<8x1xf32> to vector<8x32xf32>
    %22 = arith.subf %9, %21 : vector<8x32xf32>
    %cst_9 = arith.constant 9.99999974E-6 : f32
    %23 = vector.broadcast %cst_9 : f32 to vector<8x1xf32>
    %24 = arith.addf %20, %23 : vector<8x1xf32>
    %25 = math.rsqrt %24 : vector<8x1xf32>
    %26 = vector.broadcast %25 : vector<8x1xf32> to vector<8x32xf32>
    %27 = arith.mulf %22, %26 : vector<8x32xf32>
    %28 = vector.broadcast %0 : vector<1x32xf32> to vector<8x32xf32>
    %29 = arith.mulf %27, %28 : vector<8x32xf32>
    %30 = vector.broadcast %1 : vector<1x32xf32> to vector<8x32xf32>
    %31 = arith.addf %29, %30 : vector<8x32xf32>
    %32 = arith.truncf %31 : vector<8x32xf32> to vector<8x32xbf16>
    %33 = tpu.iota {dimensions = array<i32: 0>} : vector<8x8xi32>
    %34 = tpu.iota {dimensions = array<i32: 1>} : vector<8x8xi32>
    %35 = arith.cmpi sle, %34, %33 : vector<8x8xi32>
    %c0_10 = arith.constant 0 : index
    %c0_11 = arith.constant 0 : index
    %36 = vector.load %arg12[%c0_10, %c0_11] : memref<1x32xf32, #tpu.memory_space<vmem>>, vector<1x32xf32>
    %37 = vector.broadcast %36 : vector<1x32xf32> to vector<8x32xf32>
    %38 = arith.addf %9, %37 : vector<8x32xf32>
    %c0_12 = arith.constant 0 : index
    %c0_13 = arith.constant 0 : index
    %39 = vector.load %arg27[%c0_12, %c0_13] : memref<8x32xf32, #tpu.memory_space<vmem>>, vector<8x32xf32>
    tpu.vector_store %arg27[%c0_12, %c0_13], %38 {strides = array<i32>} : memref<8x32xf32, #tpu.memory_space<vmem>>, vector<8x32xf32>,
    %c0_i32_14 = arith.constant 0 : i32
    %c4_i32 = arith.constant 4 : i32
    %40 = arith.addi %c0_i32_14, %c4_i32 : i32
    %c1_i32 = arith.constant 1 : i32
    scf.for %arg28 = %c0_i32_14 to %40 step %c1_i32  : i32 {
      %c1_i32_49 = arith.constant 1 : i32
      %96 = arith.muli %arg28, %c1_i32_49 : i32
      %c0_i32_50 = arith.constant 0 : i32
      %97 = arith.addi %c0_i32_50, %96 : i32
      %98 = arith.index_cast %97 : i32 to index
      %c0_51 = arith.constant 0 : index
      %c0_52 = arith.constant 0 : index
      %99 = vector.load %arg5[%98, %c0_51, %c0_52] : memref<4x32x8xbf16, #tpu.memory_space<vmem>>, vector<1x32x8xbf16>
      %100 = vector.shape_cast %99 : vector<1x32x8xbf16> to vector<32x8xbf16>
      %cst_53 = arith.constant dense<0.000000e+00> : vector<8x8xf32>
      %101 = tpu.matmul %32, %100, %cst_53 {dimension_numbers = #tpu.dot_dimension_numbers<[1], [0], [0], [1], [0, 0, 1, 1], [], []>} : vector<8x32xbf16>, vector<32x8xbf16>, vector<8x8xf32> -> vector<8x8xf32>
      %102 = arith.index_cast %97 : i32 to index
      %c0_54 = arith.constant 0 : index
      %c0_55 = arith.constant 0 : index
      %103 = vector.load %arg6[%102, %c0_54, %c0_55] : memref<4x1x8xf32, #tpu.memory_space<vmem>>, vector<1x1x8xf32>
      %104 = vector.shape_cast %103 : vector<1x1x8xf32> to vector<1x8xf32>
      %105 = vector.broadcast %104 : vector<1x8xf32> to vector<8x8xf32>
      %106 = arith.addf %101, %105 : vector<8x8xf32>
      %107 = arith.truncf %106 : vector<8x8xf32> to vector<8x8xbf16>
      %cst_56 = arith.constant -1.000000e+30 : f32
      %108 = vector.broadcast %cst_56 : f32 to vector<8x1xf32>
      %c0_57 = arith.constant 0 : index
      %c0_58 = arith.constant 0 : index
      %109 = vector.load %arg24[%c0_57, %c0_58] : memref<8x1xf32, #tpu.memory_space<vmem>>, vector<8x1xf32>
      tpu.vector_store %arg24[%c0_57, %c0_58], %108 {strides = array<i32>} : memref<8x1xf32, #tpu.memory_space<vmem>>, vector<8x1xf32>,
      %cst_59 = arith.constant 0.000000e+00 : f32
      %110 = vector.broadcast %cst_59 : f32 to vector<8x1xf32>
      %c0_60 = arith.constant 0 : index
      %c0_61 = arith.constant 0 : index
      %111 = vector.load %arg25[%c0_60, %c0_61] : memref<8x1xf32, #tpu.memory_space<vmem>>, vector<8x1xf32>
      tpu.vector_store %arg25[%c0_60, %c0_61], %110 {strides = array<i32>} : memref<8x1xf32, #tpu.memory_space<vmem>>, vector<8x1xf32>,
      %cst_62 = arith.constant 0.000000e+00 : f32
      %112 = vector.broadcast %cst_62 : f32 to vector<8x8xf32>
      %c0_63 = arith.constant 0 : index
      %c0_64 = arith.constant 0 : index
      %113 = vector.load %arg26[%c0_63, %c0_64] : memref<8x8xf32, #tpu.memory_space<vmem>>, vector<8x8xf32>
      tpu.vector_store %arg26[%c0_63, %c0_64], %112 {strides = array<i32>} : memref<8x8xf32, #tpu.memory_space<vmem>>, vector<8x8xf32>,
      %c0_i32_65 = arith.constant 0 : i32
      %114 = arith.subi %arg1, %c0_i32_65 : i32
      %c1_i32_66 = arith.constant 1 : i32
      %c1_i32_67 = arith.constant 1 : i32
      %115 = arith.subi %c1_i32_66, %c1_i32_67 : i32
      %116 = arith.addi %114, %115 : i32
      %c1_i32_68 = arith.constant 1 : i32
      %117 = arith.divsi %116, %c1_i32_68 : i32
      %c1_i32_69 = arith.constant 1 : i32
      %c0_i32_70 = arith.constant 0 : i32
      %c0_i32_71 = arith.constant 0 : i32
      %118 = arith.subi %117, %c0_i32_71 : i32
      %119 = arith.addi %c0_i32_71, %118 : i32
      %c1_i32_72 = arith.constant 1 : i32
      scf.for %arg29 = %c0_i32_71 to %119 step %c1_i32_72  : i32 {
        %169 = arith.muli %arg29, %c1_i32_69 : i32
        %170 = arith.addi %c0_i32_70, %169 : i32
        %c8_i32_104 = arith.constant 8 : i32
        %171 = arith.muli %170, %c8_i32_104 : i32
        %172 = tpu.assume_multiple %171, 8 : i32
        %173 = arith.index_cast %97 : i32 to index
        %174 = arith.index_cast %172 : i32 to index
        %c0_105 = arith.constant 0 : index
        %175 = vector.load %arg22[%173, %174, %c0_105] : memref<4x16x8xbf16, #tpu.memory_space<vmem>>, vector<1x8x8xbf16>
        %176 = vector.shape_cast %175 : vector<1x8x8xbf16> to vector<8x8xbf16>
        %177 = arith.index_cast %97 : i32 to index
        %178 = arith.index_cast %172 : i32 to index
        %c0_106 = arith.constant 0 : index
        %179 = vector.load %arg23[%177, %178, %c0_106] : memref<4x16x8xbf16, #tpu.memory_space<vmem>>, vector<1x8x8xbf16>
        %180 = vector.shape_cast %179 : vector<1x8x8xbf16> to vector<8x8xbf16>
        %cst_107 = arith.constant dense<0.000000e+00> : vector<8x8xf32>
        %181 = tpu.matmul %107, %176, %cst_107 {dimension_numbers = #tpu.dot_dimension_numbers<[1], [1], [0], [0], [0, 0, 1, 0], [], []>} : vector<8x8xbf16>, vector<8x8xbf16>, vector<8x8xf32> -> vector<8x8xf32>
        %cst_108 = arith.constant 0.353553385 : f32
        %182 = vector.broadcast %cst_108 : f32 to vector<8x8xf32>
        %183 = arith.mulf %181, %182 : vector<8x8xf32>
        %c0_109 = arith.constant 0 : index
        %c0_110 = arith.constant 0 : index
        %184 = vector.load %arg24[%c0_109, %c0_110] : memref<8x1xf32, #tpu.memory_space<vmem>>, vector<8x1xf32>
        %cst_111 = arith.constant dense<0xFF800000> : vector<8xf32>
        %185 = vector.multi_reduction <maximumf>, %183, %cst_111 [1] : vector<8x8xf32> to vector<8xf32>
        %186 = vector.shape_cast %185 : vector<8xf32> to vector<8x1xf32>
        %187 = arith.maximumf %184, %186 : vector<8x1xf32>
        %188 = arith.subf %184, %187 : vector<8x1xf32>
        %189 = math.exp %188 : vector<8x1xf32>
        %190 = vector.broadcast %187 : vector<8x1xf32> to vector<8x8xf32>
        %191 = arith.subf %183, %190 : vector<8x8xf32>
        %192 = math.exp %191 : vector<8x8xf32>
        %c0_112 = arith.constant 0 : index
        %c0_113 = arith.constant 0 : index
        %193 = vector.load %arg25[%c0_112, %c0_113] : memref<8x1xf32, #tpu.memory_space<vmem>>, vector<8x1xf32>
        %194 = arith.mulf %189, %193 : vector<8x1xf32>
        %cst_114 = arith.constant dense<0.000000e+00> : vector<8xf32>
        %195 = vector.multi_reduction <add>, %192, %cst_114 [1] : vector<8x8xf32> to vector<8xf32>
        %196 = vector.shape_cast %195 : vector<8xf32> to vector<8x1xf32>
        %197 = arith.addf %194, %196 : vector<8x1xf32>
        %c0_115 = arith.constant 0 : index
        %c0_116 = arith.constant 0 : index
        %198 = vector.load %arg25[%c0_115, %c0_116] : memref<8x1xf32, #tpu.memory_space<vmem>>, vector<8x1xf32>
        tpu.vector_store %arg25[%c0_115, %c0_116], %197 {strides = array<i32>} : memref<8x1xf32, #tpu.memory_space<vmem>>, vector<8x1xf32>,
        %c0_117 = arith.constant 0 : index
        %c0_118 = arith.constant 0 : index
        %199 = vector.load %arg26[%c0_117, %c0_118] : memref<8x8xf32, #tpu.memory_space<vmem>>, vector<8x8xf32>
        %200 = vector.broadcast %189 : vector<8x1xf32> to vector<8x8xf32>
        %201 = arith.mulf %200, %199 : vector<8x8xf32>
        %202 = arith.truncf %192 : vector<8x8xf32> to vector<8x8xbf16>
        %cst_119 = arith.constant dense<0.000000e+00> : vector<8x8xf32>
        %203 = tpu.matmul %202, %180, %cst_119 {dimension_numbers = #tpu.dot_dimension_numbers<[1], [0], [0], [1], [0, 0, 1, 1], [], []>} : vector<8x8xbf16>, vector<8x8xbf16>, vector<8x8xf32> -> vector<8x8xf32>
        %204 = arith.addf %201, %203 : vector<8x8xf32>
        %c0_120 = arith.constant 0 : index
        %c0_121 = arith.constant 0 : index
        %205 = vector.load %arg26[%c0_120, %c0_121] : memref<8x8xf32, #tpu.memory_space<vmem>>, vector<8x8xf32>
        tpu.vector_store %arg26[%c0_120, %c0_121], %204 {strides = array<i32>} : memref<8x8xf32, #tpu.memory_space<vmem>>, vector<8x8xf32>,
        %c0_122 = arith.constant 0 : index
        %c0_123 = arith.constant 0 : index
        %206 = vector.load %arg24[%c0_122, %c0_123] : memref<8x1xf32, #tpu.memory_space<vmem>>, vector<8x1xf32>
        tpu.vector_store %arg24[%c0_122, %c0_123], %187 {strides = array<i32>} : memref<8x1xf32, #tpu.memory_space<vmem>>, vector<8x1xf32>,
      }
      %120 = arith.index_cast %97 : i32 to index
      %121 = arith.index_cast %6 : i32 to index
      %c0_73 = arith.constant 0 : index
      %122 = vector.load %arg22[%120, %121, %c0_73] : memref<4x16x8xbf16, #tpu.memory_space<vmem>>, vector<1x8x8xbf16>
      %123 = vector.shape_cast %122 : vector<1x8x8xbf16> to vector<8x8xbf16>
      %124 = arith.index_cast %97 : i32 to index
      %125 = arith.index_cast %6 : i32 to index
      %c0_74 = arith.constant 0 : index
      %126 = vector.load %arg23[%124, %125, %c0_74] : memref<4x16x8xbf16, #tpu.memory_space<vmem>>, vector<1x8x8xbf16>
      %127 = vector.shape_cast %126 : vector<1x8x8xbf16> to vector<8x8xbf16>
      %cst_75 = arith.constant dense<0.000000e+00> : vector<8x8xf32>
      %128 = tpu.matmul %107, %123, %cst_75 {dimension_numbers = #tpu.dot_dimension_numbers<[1], [1], [0], [0], [0, 0, 1, 0], [], []>} : vector<8x8xbf16>, vector<8x8xbf16>, vector<8x8xf32> -> vector<8x8xf32>
      %cst_76 = arith.constant 0.353553385 : f32
      %129 = vector.broadcast %cst_76 : f32 to vector<8x8xf32>
      %130 = arith.mulf %128, %129 : vector<8x8xf32>
      %cst_77 = arith.constant -1.000000e+30 : f32
      %131 = vector.broadcast %cst_77 : f32 to vector<8x8xf32>
      %132 = arith.select %35, %130, %131 : vector<8x8xi1>, vector<8x8xf32>
      %c0_78 = arith.constant 0 : index
      %c0_79 = arith.constant 0 : index
      %133 = vector.load %arg24[%c0_78, %c0_79] : memref<8x1xf32, #tpu.memory_space<vmem>>, vector<8x1xf32>
      %cst_80 = arith.constant dense<0xFF800000> : vector<8xf32>
      %134 = vector.multi_reduction <maximumf>, %132, %cst_80 [1] : vector<8x8xf32> to vector<8xf32>
      %135 = vector.shape_cast %134 : vector<8xf32> to vector<8x1xf32>
      %136 = arith.maximumf %133, %135 : vector<8x1xf32>
      %137 = arith.subf %133, %136 : vector<8x1xf32>
      %138 = math.exp %137 : vector<8x1xf32>
      %139 = vector.broadcast %136 : vector<8x1xf32> to vector<8x8xf32>
      %140 = arith.subf %132, %139 : vector<8x8xf32>
      %141 = math.exp %140 : vector<8x8xf32>
      %c0_81 = arith.constant 0 : index
      %c0_82 = arith.constant 0 : index
      %142 = vector.load %arg25[%c0_81, %c0_82] : memref<8x1xf32, #tpu.memory_space<vmem>>, vector<8x1xf32>
      %143 = arith.mulf %138, %142 : vector<8x1xf32>
      %cst_83 = arith.constant dense<0.000000e+00> : vector<8xf32>
      %144 = vector.multi_reduction <add>, %141, %cst_83 [1] : vector<8x8xf32> to vector<8xf32>
      %145 = vector.shape_cast %144 : vector<8xf32> to vector<8x1xf32>
      %146 = arith.addf %143, %145 : vector<8x1xf32>
      %c0_84 = arith.constant 0 : index
      %c0_85 = arith.constant 0 : index
      %147 = vector.load %arg25[%c0_84, %c0_85] : memref<8x1xf32, #tpu.memory_space<vmem>>, vector<8x1xf32>
      tpu.vector_store %arg25[%c0_84, %c0_85], %146 {strides = array<i32>} : memref<8x1xf32, #tpu.memory_space<vmem>>, vector<8x1xf32>,
      %c0_86 = arith.constant 0 : index
      %c0_87 = arith.constant 0 : index
      %148 = vector.load %arg26[%c0_86, %c0_87] : memref<8x8xf32, #tpu.memory_space<vmem>>, vector<8x8xf32>
      %149 = vector.broadcast %138 : vector<8x1xf32> to vector<8x8xf32>
      %150 = arith.mulf %149, %148 : vector<8x8xf32>
      %151 = arith.truncf %141 : vector<8x8xf32> to vector<8x8xbf16>
      %cst_88 = arith.constant dense<0.000000e+00> : vector<8x8xf32>
      %152 = tpu.matmul %151, %127, %cst_88 {dimension_numbers = #tpu.dot_dimension_numbers<[1], [0], [0], [1], [0, 0, 1, 1], [], []>} : vector<8x8xbf16>, vector<8x8xbf16>, vector<8x8xf32> -> vector<8x8xf32>
      %153 = arith.addf %150, %152 : vector<8x8xf32>
      %c0_89 = arith.constant 0 : index
      %c0_90 = arith.constant 0 : index
      %154 = vector.load %arg26[%c0_89, %c0_90] : memref<8x8xf32, #tpu.memory_space<vmem>>, vector<8x8xf32>
      tpu.vector_store %arg26[%c0_89, %c0_90], %153 {strides = array<i32>} : memref<8x8xf32, #tpu.memory_space<vmem>>, vector<8x8xf32>,
      %c0_91 = arith.constant 0 : index
      %c0_92 = arith.constant 0 : index
      %155 = vector.load %arg24[%c0_91, %c0_92] : memref<8x1xf32, #tpu.memory_space<vmem>>, vector<8x1xf32>
      tpu.vector_store %arg24[%c0_91, %c0_92], %136 {strides = array<i32>} : memref<8x1xf32, #tpu.memory_space<vmem>>, vector<8x1xf32>,
      %c0_93 = arith.constant 0 : index
      %c0_94 = arith.constant 0 : index
      %156 = vector.load %arg26[%c0_93, %c0_94] : memref<8x8xf32, #tpu.memory_space<vmem>>, vector<8x8xf32>
      %c0_95 = arith.constant 0 : index
      %c0_96 = arith.constant 0 : index
      %157 = vector.load %arg25[%c0_95, %c0_96] : memref<8x1xf32, #tpu.memory_space<vmem>>, vector<8x1xf32>
      %158 = tpu.reciprocal %157 {approx = true} : vector<8x1xf32> -> vector<8x1xf32>
      %159 = vector.broadcast %158 : vector<8x1xf32> to vector<8x8xf32>
      %160 = arith.mulf %156, %159 : vector<8x8xf32>
      %161 = arith.truncf %160 : vector<8x8xf32> to vector<8x8xbf16>
      %c0_97 = arith.constant 0 : index
      %c0_98 = arith.constant 0 : index
      %162 = vector.load %arg27[%c0_97, %c0_98] : memref<8x32xf32, #tpu.memory_space<vmem>>, vector<8x32xf32>
      %163 = arith.index_cast %97 : i32 to index
      %c0_99 = arith.constant 0 : index
      %c0_100 = arith.constant 0 : index
      %164 = vector.load %arg11[%163, %c0_99, %c0_100] : memref<4x8x32xbf16, #tpu.memory_space<vmem>>, vector<1x8x32xbf16>
      %165 = vector.shape_cast %164 : vector<1x8x32xbf16> to vector<8x32xbf16>
      %cst_101 = arith.constant dense<0.000000e+00> : vector<8x32xf32>
      %166 = tpu.matmul %161, %165, %cst_101 {dimension_numbers = #tpu.dot_dimension_numbers<[1], [0], [0], [1], [0, 0, 1, 1], [], []>} : vector<8x8xbf16>, vector<8x32xbf16>, vector<8x32xf32> -> vector<8x32xf32>
      %167 = arith.addf %162, %166 : vector<8x32xf32>
      %c0_102 = arith.constant 0 : index
      %c0_103 = arith.constant 0 : index
      %168 = vector.load %arg27[%c0_102, %c0_103] : memref<8x32xf32, #tpu.memory_space<vmem>>, vector<8x32xf32>
      tpu.vector_store %arg27[%c0_102, %c0_103], %167 {strides = array<i32>} : memref<8x32xf32, #tpu.memory_space<vmem>>, vector<8x32xf32>,
    }
    %c4_i32_15 = arith.constant 4 : i32
    %c0_16 = arith.constant 0 : index
    %c0_17 = arith.constant 0 : index
    %41 = vector.load %arg27[%c0_16, %c0_17] : memref<8x32xf32, #tpu.memory_space<vmem>>, vector<8x32xf32>
    %c0_18 = arith.constant 0 : index
    %c0_19 = arith.constant 0 : index
    %42 = vector.load %arg13[%c0_18, %c0_19] : memref<1x32xf32, #tpu.memory_space<vmem>>, vector<1x32xf32>
    %c0_20 = arith.constant 0 : index
    %c0_21 = arith.constant 0 : index
    %43 = vector.load %arg14[%c0_20, %c0_21] : memref<1x32xf32, #tpu.memory_space<vmem>>, vector<1x32xf32>
    %cst_22 = arith.constant dense<0.000000e+00> : vector<8xf32>
    %44 = vector.multi_reduction <add>, %41, %cst_22 [1] : vector<8x32xf32> to vector<8xf32>
    %45 = vector.shape_cast %44 : vector<8xf32> to vector<8x1xf32>
    %cst_23 = arith.constant 3.200000e+01 : f32
    %46 = vector.broadcast %cst_23 : f32 to vector<8x1xf32>
    %47 = arith.divf %45, %46 : vector<8x1xf32>
    %48 = vector.broadcast %47 : vector<8x1xf32> to vector<8x32xf32>
    %49 = arith.subf %41, %48 : vector<8x32xf32>
    %50 = arith.mulf %49, %49 : vector<8x32xf32>
    %cst_24 = arith.constant dense<0.000000e+00> : vector<8xf32>
    %51 = vector.multi_reduction <add>, %50, %cst_24 [1] : vector<8x32xf32> to vector<8xf32>
    %52 = vector.shape_cast %51 : vector<8xf32> to vector<8x1xf32>
    %cst_25 = arith.constant 3.200000e+01 : f32
    %53 = vector.broadcast %cst_25 : f32 to vector<8x1xf32>
    %54 = arith.divf %52, %53 : vector<8x1xf32>
    %55 = vector.broadcast %47 : vector<8x1xf32> to vector<8x32xf32>
    %56 = arith.subf %41, %55 : vector<8x32xf32>
    %cst_26 = arith.constant 9.99999974E-6 : f32
    %57 = vector.broadcast %cst_26 : f32 to vector<8x1xf32>
    %58 = arith.addf %54, %57 : vector<8x1xf32>
    %59 = math.rsqrt %58 : vector<8x1xf32>
    %60 = vector.broadcast %59 : vector<8x1xf32> to vector<8x32xf32>
    %61 = arith.mulf %56, %60 : vector<8x32xf32>
    %62 = vector.broadcast %42 : vector<1x32xf32> to vector<8x32xf32>
    %63 = arith.mulf %61, %62 : vector<8x32xf32>
    %64 = vector.broadcast %43 : vector<1x32xf32> to vector<8x32xf32>
    %65 = arith.addf %63, %64 : vector<8x32xf32>
    %66 = arith.truncf %65 : vector<8x32xf32> to vector<8x32xbf16>
    %c0_27 = arith.constant 0 : index
    %c0_28 = arith.constant 0 : index
    %67 = vector.load %arg15[%c0_27, %c0_28] : memref<32x128xbf16, #tpu.memory_space<vmem>>, vector<32x128xbf16>
    %cst_29 = arith.constant dense<0.000000e+00> : vector<8x128xf32>
    %68 = tpu.matmul %66, %67, %cst_29 {dimension_numbers = #tpu.dot_dimension_numbers<[1], [0], [0], [1], [0, 0, 1, 1], [], []>} : vector<8x32xbf16>, vector<32x128xbf16>, vector<8x128xf32> -> vector<8x128xf32>
    %c0_30 = arith.constant 0 : index
    %c0_31 = arith.constant 0 : index
    %69 = vector.load %arg16[%c0_30, %c0_31] : memref<1x128xf32, #tpu.memory_space<vmem>>, vector<1x128xf32>
    %70 = vector.broadcast %69 : vector<1x128xf32> to vector<8x128xf32>
    %71 = arith.addf %68, %70 : vector<8x128xf32>
    %cst_32 = arith.constant 5.000000e-01 : f32
    %72 = vector.broadcast %cst_32 : f32 to vector<8x128xf32>
    %73 = arith.mulf %72, %71 : vector<8x128xf32>
    %cst_33 = arith.constant 0.707106769 : f32
    %74 = vector.broadcast %cst_33 : f32 to vector<8x128xf32>
    %75 = arith.mulf %71, %74 : vector<8x128xf32>
    %76 = math.erf %75 : vector<8x128xf32>
    %cst_34 = arith.constant 1.000000e+00 : f32
    %77 = vector.broadcast %cst_34 : f32 to vector<8x128xf32>
    %78 = arith.addf %77, %76 : vector<8x128xf32>
    %79 = arith.mulf %73, %78 : vector<8x128xf32>
    %80 = arith.truncf %79 : vector<8x128xf32> to vector<8x128xbf16>
    %c0_35 = arith.constant 0 : index
    %c0_36 = arith.constant 0 : index
    %81 = vector.load %arg17[%c0_35, %c0_36] : memref<128x32xbf16, #tpu.memory_space<vmem>>, vector<128x32xbf16>
    %cst_37 = arith.constant dense<0.000000e+00> : vector<8x32xf32>
    %82 = tpu.matmul %80, %81, %cst_37 {dimension_numbers = #tpu.dot_dimension_numbers<[1], [0], [0], [1], [0, 0, 1, 1], [], []>} : vector<8x128xbf16>, vector<128x32xbf16>, vector<8x32xf32> -> vector<8x32xf32>
    %c0_38 = arith.constant 0 : index
    %c0_39 = arith.constant 0 : index
    %83 = vector.load %arg18[%c0_38, %c0_39] : memref<1x32xf32, #tpu.memory_space<vmem>>, vector<1x32xf32>
    %84 = vector.broadcast %83 : vector<1x32xf32> to vector<8x32xf32>
    %85 = arith.addf %82, %84 : vector<8x32xf32>
    %86 = arith.addf %41, %85 : vector<8x32xf32>
    %c0_40 = arith.constant 0 : index
    %c0_41 = arith.constant 0 : index
    %c0_42 = arith.constant 0 : index
    %87 = vector.load %arg19[%c0_40, %c0_41, %c0_42] : memref<1x8x32xf32, #tpu.memory_space<vmem>>, vector<1x8x32xf32>
    %88 = vector.shape_cast %87 : vector<1x8x32xf32> to vector<8x32xf32>
    %89 = vector.shape_cast %86 : vector<8x32xf32> to vector<1x8x32xf32>
    tpu.vector_store %arg19[%c0_40, %c0_41, %c0_42], %89 {strides = array<i32>} : memref<1x8x32xf32, #tpu.memory_space<vmem>>, vector<1x8x32xf32>,
    %c0_43 = arith.constant 0 : index
    %c0_44 = arith.constant 0 : index
    %c0_45 = arith.constant 0 : index
    %90 = vector.load %arg20[%c0_43, %c0_44, %c0_45] : memref<1x8x32xf32, #tpu.memory_space<vmem>>, vector<1x8x32xf32>
    %91 = vector.shape_cast %90 : vector<1x8x32xf32> to vector<8x32xf32>
    %92 = vector.shape_cast %65 : vector<8x32xf32> to vector<1x8x32xf32>
    tpu.vector_store %arg20[%c0_43, %c0_44, %c0_45], %92 {strides = array<i32>} : memref<1x8x32xf32, #tpu.memory_space<vmem>>, vector<1x8x32xf32>,
    %c0_46 = arith.constant 0 : index
    %c0_47 = arith.constant 0 : index
    %c0_48 = arith.constant 0 : index
    %93 = vector.load %arg21[%c0_46, %c0_47, %c0_48] : memref<1x8x32xf32, #tpu.memory_space<vmem>>, vector<1x8x32xf32>
    %94 = vector.shape_cast %93 : vector<1x8x32xf32> to vector<8x32xf32>
    %95 = vector.shape_cast %85 : vector<8x32xf32> to vector<1x8x32xf32>
    tpu.vector_store %arg21[%c0_46, %c0_47, %c0_48], %95 {strides = array<i32>} : memref<1x8x32xf32, #tpu.memory_space<vmem>>, vector<1x8x32xf32>,
    return
  }
  func.func @transform_0(%arg0: i32, %arg1: i32) -> (i32, i32, i32) {
    %c0_i32 = arith.constant 0 : i32
    %c0_i32_0 = arith.constant 0 : i32
    %c0_i32_1 = arith.constant 0 : i32
    return %arg0, %c0_i32, %c0_i32_0 : i32, i32, i32
  }
  func.func @transform_1(%arg0: i32, %arg1: i32) -> (i32, i32) {
    %c0_i32 = arith.constant 0 : i32
    %c0_i32_0 = arith.constant 0 : i32
    %c0_i32_1 = arith.constant 0 : i32
    return %c0_i32, %c0_i32_0 : i32, i32
  }
  func.func @transform_2(%arg0: i32, %arg1: i32) -> (i32, i32) {
    %c0_i32 = arith.constant 0 : i32
    %c0_i32_0 = arith.constant 0 : i32
    %c0_i32_1 = arith.constant 0 : i32
    return %c0_i32, %c0_i32_0 : i32, i32
  }
  func.func @transform_3(%arg0: i32, %arg1: i32) -> (i32, i32, i32) {
    %c0_i32 = arith.constant 0 : i32
    %c0_i32_0 = arith.constant 0 : i32
    %c0_i32_1 = arith.constant 0 : i32
    %c0_i32_2 = arith.constant 0 : i32
    return %c0_i32, %c0_i32_0, %c0_i32_1 : i32, i32, i32
  }
  func.func @transform_4(%arg0: i32, %arg1: i32) -> (i32, i32, i32) {
    %c0_i32 = arith.constant 0 : i32
    %c0_i32_0 = arith.constant 0 : i32
    %c0_i32_1 = arith.constant 0 : i32
    %c0_i32_2 = arith.constant 0 : i32
    return %c0_i32, %c0_i32_0, %c0_i32_1 : i32, i32, i32
  }
  func.func @transform_5(%arg0: i32, %arg1: i32) -> (i32, i32, i32) {
    %c0_i32 = arith.constant 0 : i32
    %c0_i32_0 = arith.constant 0 : i32
    %c0_i32_1 = arith.constant 0 : i32
    %c0_i32_2 = arith.constant 0 : i32
    return %c0_i32, %c0_i32_0, %c0_i32_1 : i32, i32, i32
  }
  func.func @transform_6(%arg0: i32, %arg1: i32) -> (i32, i32, i32) {
    %c0_i32 = arith.constant 0 : i32
    %c0_i32_0 = arith.constant 0 : i32
    %c0_i32_1 = arith.constant 0 : i32
    %c0_i32_2 = arith.constant 0 : i32
    return %c0_i32, %c0_i32_0, %c0_i32_1 : i32, i32, i32
  }
  func.func @transform_7(%arg0: i32, %arg1: i32) -> (i32, i32, i32) {
    %c0_i32 = arith.constant 0 : i32
    %c0_i32_0 = arith.constant 0 : i32
    %c0_i32_1 = arith.constant 0 : i32
    %c0_i32_2 = arith.constant 0 : i32
    return %c0_i32, %c0_i32_0, %c0_i32_1 : i32, i32, i32
  }
  func.func @transform_8(%arg0: i32, %arg1: i32) -> (i32, i32, i32) {
    %c0_i32 = arith.constant 0 : i32
    %c0_i32_0 = arith.constant 0 : i32
    %c0_i32_1 = arith.constant 0 : i32
    %c0_i32_2 = arith.constant 0 : i32
    return %c0_i32, %c0_i32_0, %c0_i32_1 : i32, i32, i32
  }
  func.func @transform_9(%arg0: i32, %arg1: i32) -> (i32, i32, i32) {
    %c0_i32 = arith.constant 0 : i32
    %c0_i32_0 = arith.constant 0 : i32
    %c0_i32_1 = arith.constant 0 : i32
    %c0_i32_2 = arith.constant 0 : i32
    return %c0_i32, %c0_i32_0, %c0_i32_1 : i32, i32, i32
  }
  func.func @transform_10(%arg0: i32, %arg1: i32) -> (i32, i32) {
    %c0_i32 = arith.constant 0 : i32
    %c0_i32_0 = arith.constant 0 : i32
    %c0_i32_1 = arith.constant 0 : i32
    return %c0_i32, %c0_i32_0 : i32, i32
  }
  func.func @transform_11(%arg0: i32, %arg1: i32) -> (i32, i32) {
    %c0_i32 = arith.constant 0 : i32
    %c0_i32_0 = arith.constant 0 : i32
    %c0_i32_1 = arith.constant 0 : i32
    return %c0_i32, %c0_i32_0 : i32, i32
  }
  func.func @transform_12(%arg0: i32, %arg1: i32) -> (i32, i32) {
    %c0_i32 = arith.constant 0 : i32
    %c0_i32_0 = arith.constant 0 : i32
    %c0_i32_1 = arith.constant 0 : i32
    return %c0_i32, %c0_i32_0 : i32, i32
  }
  func.func @transform_13(%arg0: i32, %arg1: i32) -> (i32, i32) {
    %c0_i32 = arith.constant 0 : i32
    %c0_i32_0 = arith.constant 0 : i32
    %c0_i32_1 = arith.constant 0 : i32
    return %c0_i32, %c0_i32_0 : i32, i32
  }
  func.func @transform_14(%arg0: i32, %arg1: i32) -> (i32, i32) {
    %c0_i32 = arith.constant 0 : i32
    %c0_i32_0 = arith.constant 0 : i32
    %c0_i32_1 = arith.constant 0 : i32
    return %c0_i32, %c0_i32_0 : i32, i32
  }
  func.func @transform_15(%arg0: i32, %arg1: i32) -> (i32, i32) {
    %c0_i32 = arith.constant 0 : i32
    %c0_i32_0 = arith.constant 0 : i32
    %c0_i32_1 = arith.constant 0 : i32
    return %c0_i32, %c0_i32_0 : i32, i32
  }
  func.func @transform_16(%arg0: i32, %arg1: i32) -> (i32, i32) {
    %c0_i32 = arith.constant 0 : i32
    %c0_i32_0 = arith.constant 0 : i32
    %c0_i32_1 = arith.constant 0 : i32
    return %c0_i32, %c0_i32_0 : i32, i32
  }
  func.func @transform_17(%arg0: i32, %arg1: i32) -> (i32, i32, i32) {
    %c0_i32 = arith.constant 0 : i32
    %c0_i32_0 = arith.constant 0 : i32
    return %arg0, %arg1, %c0_i32 : i32, i32, i32
  }
  func.func @transform_18(%arg0: i32, %arg1: i32) -> (i32, i32, i32) {
    %c0_i32 = arith.constant 0 : i32
    %c0_i32_0 = arith.constant 0 : i32
    return %arg0, %arg1, %c0_i32 : i32, i32, i32
  }
  func.func @transform_19(%arg0: i32, %arg1: i32) -> (i32, i32, i32) {
    %c0_i32 = arith.constant 0 : i32
    %c0_i32_0 = arith.constant 0 : i32
    return %arg0, %arg1, %c0_i32 : i32, i32, i32
  }
}

</mosaic_0001>

<bundles_post_ra>
// kernel: tpu_custom_call.1
= control target key start
LH: loop header
LB: loop body
LE: loop exit
PB: predicated region body
PF: predicated region fallthrough
CT: control target
= control target key end

     0   :  { %s2865_s0 = inlined_call_operand.vmem [shape: f32[2,16,32], index: 0, kind: input, shape index: {}]   ;;  %s2866_s1 = inlined_call_operand.vmem [shape: f32[1,32], index: 1, kind: input, shape index: {}]   ;;  %s2867_s2 = inlined_call_operand.vmem [shape: f32[1,32], index: 2, kind: input, shape index: {}]   ;;  %s2868_s3 = inlined_call_operand.vmem [shape: bf16[4,32,8], index: 3, kind: input, shape index: {}]   ;;  %s2869_s4 = inlined_call_operand.vmem [shape: f32[4,1,8], index: 4, kind: input, shape index: {}]   ;;  %s2870_s5 = inlined_call_operand.vmem [shape: bf16[4,32,8], index: 5, kind: input, shape index: {}]   ;;  %s2871_s6 = inlined_call_operand.vmem [shape: f32[4,1,8], index: 6, kind: input, shape index: {}]   ;;  %s2872_s7 = inlined_call_operand.vmem [shape: bf16[4,32,8], index: 7, kind: input, shape index: {}]   ;;  %s2873_s8 = inlined_call_operand.vmem [shape: f32[4,1,8], index: 8, kind: input, shape index: {}]   ;;  %s2874_s9 = inlined_call_operand.vmem [shape: bf16[4,8,32], index: 9, kind: input, shape index: {}]   ;;  %s2875_s10 = inlined_call_operand.vmem [shape: f32[1,32], index: 10, kind: input, shape index: {}]   ;;  %s2876_s11 = inlined_call_operand.vmem [shape: f32[1,32], index: 11, kind: input, shape index: {}]   ;;  %s2877_s12 = inlined_call_operand.vmem [shape: f32[1,32], index: 12, kind: input, shape index: {}]   ;;  %s2878_s13 = inlined_call_operand.vmem [shape: bf16[32,128], index: 13, kind: input, shape index: {}]   ;;  %s2879_s14 = inlined_call_operand.vmem [shape: f32[1,128], index: 14, kind: input, shape index: {}]   ;;  %s2880_s15 = inlined_call_operand.vmem [shape: bf16[128,32], index: 15, kind: input, shape index: {}]   ;;  %s2881_s16 = inlined_call_operand.vmem [shape: f32[1,32], index: 16, kind: input, shape index: {}]   ;;  %s2882_s17 = inlined_call_operand.hbm [shape: f32[2,16,32], index: 17, kind: output, shape index: {0}]   ;;  %s2883_s18 = inlined_call_operand.hbm [shape: f32[2,16,32], index: 18, kind: output, shape index: {1}]   ;;  %s2884_s19 = inlined_call_operand.hbm [shape: f32[2,16,32], index: 19, kind: output, shape index: {2}]  }
   0x1   :  { %2898 = sst [smem:[#allocation23_spill]] %s2865_s0 }
   0x2   :  { %2899 = sst [smem:[#allocation24_spill]] %s2866_s1 }
   0x3   :  { %2900 = sst [smem:[#allocation25_spill]] %s2867_s2 }
   0x4   :  { %2901 = sst [smem:[#allocation26_spill]] %s2868_s3 }
   0x5   :  { %2902 = sst [smem:[#allocation27_spill]] %s2869_s4 }
   0x6   :  { %2903 = sst [smem:[#allocation28_spill]] %s2870_s5 }
   0x7   :  { %2904 = sst [smem:[#allocation29_spill]] %s2881_s16 }
   0x8   :  { %2905 = sst [smem:[#allocation30_spill]] %s2882_s17 }
   0x9   :  { %2906 = sst [smem:[#allocation31_spill]] %s2883_s18 }
   0xa   :  { %2907 = sst [smem:[#allocation32_spill]] %s2884_s19 }
   0xb   :  { %25 = vsyncpa [#allocation9], 0 }
   0xc   :  { %27 = vsyncpa [#allocation9 + $0x1], 0 }
   0xd   :  { %28 = vsyncpa [#allocation11], 0 }
   0xe   :  { %30 = vsyncpa [#allocation11 + $0x1], 0  ;;  %s2439_s0 = smov 0   ;;  %s2441_s30 = smov 0  }
   0xf   :  { %s2443_s20 = smov 0   ;;  %s2445_s21 = smov 0  }
  0x10   :  { %s2447_s1 = smov 0   ;;  %s2449_s22 = smov 0  }
  0x11   :  { %s2451_s2 = smov 0   ;;  %s2453_s23 = smov 0  }
  0x12 LB: > { %2908 = sst [smem:[#allocation15_spill]] %s2283_s0  ;;  %s2885_s24 = sadd.s32 4294967295, %s2311_s23   ;;  %s2311_s23 = sphi %s2453_s23, %s36_s23   ;;  %s2307_s2 = sphi %s2451_s2, %s2945_s2   ;;  %s2303_s22 = sphi %s2449_s22, %s2944_s22   ;;  %s2299_s1 = sphi %s2447_s1, %s2943_s1   ;;  %s2295_s21 = sphi %s2445_s21, %s2942_s21   ;;  %s2291_s20 = sphi %s2443_s20, %s2941_s20   ;;  %s2287_s30 = sphi %s2441_s30, %s2947_s30   ;;  %s2283_s0 = sphi %s2439_s0, %s2946_s0  }
  0x13   : > { %2909 = sst [smem:[#allocation16_spill]] %s2291_s20  ;;  %s2889_s25 = sadd.s32 4294967294, %s2311_s23  }
  0x14   : > { %2910 = sst [smem:[#allocation17_spill]] %s2303_s22  ;;  %s45_s3 = sadd.s32 1, %s2303_s22 }
  0x15   : > { %2911 = sst [smem:[#allocation18_spill]] %s2307_s2  ;;  %p46_p0 = scmp.ge.s32.totalorder %s45_s3, 2 }
  0x16   : > { %s48_s26 = sadd.s32 1, %s2307_s2  ;;  %p429_p1 = scmp.ne.s32.totalorder %s2291_s20, %s2287_s30 }
  0x17   : > { %p430_p2 = scmp.eq.s32.totalorder %s2885_s24, 3  ;;  %s2949_s3 = smov (%p46_p0, %s45_s3), 0 }
  0x18   : > { %2912 = sst [smem:[#allocation19_spill]] %s2949_s3  ;;  %s2951_s26 = smov (!%p46_p0, %s48_s26), %s2307_s2 }
  0x19   : > { %s415_s27 = ssub.s32 %s2303_s22, %s2949_s3  ;;  %p2492_p3 = por %p430_p2, %p429_p1 }
  0x1a   : > { %p50_p4 = scmp.ge.s32.totalorder %s2951_s26, 2  ;;  %p435_p5 = scmp.ne.s32.totalorder %s2287_s30, %s2283_s0 }
  0x1b   : > { %p436_p6 = scmp.eq.s32.totalorder %s2889_s25, 3  ;;  %p1799_p7 = scmp.ge.s32.totalorder %s2311_s23, 1 }
  0x1c   : > { %s2953_s26 = smov (%p50_p4, %s2951_s26), 0  ;;  %p566_p9 = scmp.lt.s32.totalorder %s2311_s23, 5 }
  0x1d   : > { %2914 = sst [smem:[#allocation20_spill]] %s2953_s26  ;;  %p2503_p8 = por %p436_p6, %p435_p5 }
  0x1e   : > { %s414_s24 = ssub.s32 %s2307_s2, %s2953_s26  ;;  %s419_s17 = sadd.s32 1, %s2291_s20 }
  0x1f   : > { %s2915_s29 = scalar_select %p2503_p8, 1, 0 }
  0x20   : > { %s416_s3 = sor.u32 %s415_s27, %s414_s24  ;;  %p567_p10 = pnand %p1799_p7, %p566_p9 }
  0x21   : > { %2916 = sst [smem:[#allocation21_spill]] %s2915_s29  ;;  %p417_p11 = scmp.eq.s32.totalorder %s416_s3, 0 }
  0x22   : > { %570 = sbr.rel (%p567_p10) target bundleno = 3549 (0xddd), region = 88  ;;  %s2897_s25 = sand.u32 (!%p567_p10), 1, %s2287_s30  }
  0x23   : > { %s2512_s22 = scalar_select %p417_p11, %s2291_s20, %s419_s17  }
  0x24   : > { %p632_p12 = scmp.lt.s32.totalorder (!%p567_p10), %s2299_s1, 1  ;;  %s2918_s16 = sld [smem:[#allocation24_spill]] (!%p567_p10) }
  0x25   : > { %2917 = sst [smem:[#allocation22_spill]] %s2512_s22  ;;  %s2528_s17 = sshll.u32 (!%p567_p10), %s2897_s25, 3 }
  0x26   : > { %s2919_s2 = sld [smem:[#allocation25_spill]] (!%p567_p10)  ;;  %s624_s19 = scalar_lea.vmem (!%p567_p10), [#allocation10], %s2528_s17 }
  0x27   : > { %s633_s24 = scalar_select %p632_p12, %s2299_s1, 1 }
  0x28   : > { %s2920_s20 = sld [smem:[#allocation23_spill]]  ;;  %p1805_p13 = scmp.ne.s32.totalorder %s2295_s21, 0 }
  0x29   : > { %s1872_s3 = sshll.u32 %s633_s24, 4 }
  0x2a   : > { %v2519_v0 = vld [vmem:[%s2918_s16] sm:$0x1]  ;;  %643 = sbr.rel (%p1805_p13) target bundleno = 578 (0x242), region = 92 }
  0x2c   : > { %v2524_v1 = vld [vmem:[%s2919_s2] sm:$0x1] }
  0x2e   : > { %s2534_s18 = scalar_lea.vmem %s2920_s20, %s1872_s3  ;;  %s2548_s20 = smov (!%p1805_p13), 0  }
  0x2f   : > { %v644_v2 = vld [vmem:[%s2534_s18] sm:$0xff]  ;;  %vm646_vm0 = vcmask 261120   ;;  %v645_v3 = vld [vmem:[%s2534_s18 + $0x8] sm:$0xff]  ;;  %v675_v21 = vlaneseq }
  0x30   : > { %v647_v4 = vsel %vm646_vm0, %v644_v2, 0.0  ;;  %v650_v5 = vsel %vm646_vm0, %v645_v3, 0.0 }
  0x31   : > { %648 = vadd.xlane.f32.xlu0 %v647_v4  ;;  %v676_v23 = vshrl.u32 %v675_v21, 7 }
  0x33   : > { %v677_v24 = vsub.s32 0, %v676_v23 }
  0x35   : > { %651 = vadd.xlane.f32.xlu0 %v650_v5  ;;  %v678_v26 = vrot.slane %v2519_v0, %v677_v24  ;;  %v686_v29 = vrot.slane %v2524_v1, %v677_v24 }
  0xba   : > { %v649_v6 = vpop.xlane.xlu0 %648 }
  0xbb   : > { %v654_v7 = vmul.f32 0.03125, %v649_v6 }
  0xbd   : > { %v656_v8 = vsub.f32 %v644_v2, %v654_v7 }
  0xbe   : > { %v652_v9 = vpop.xlane.xlu0 %651 }
  0xbf   : > { %v655_v10 = vmul.f32 0.03125, %v652_v9  ;;  %v658_v11 = vmul.f32 %v656_v8, %v656_v8 }
  0xc1   : > { %v657_v12 = vsub.f32 %v645_v3, %v655_v10  ;;  %v660_v13 = vsel %vm646_vm0, %v658_v11, 0.0 }
  0xc2   : > { %661 = vadd.xlane.f32.xlu1 %v660_v13 }
  0xc3   : > { %v659_v14 = vmul.f32 %v657_v12, %v657_v12 }
  0xc5   : > { %v663_v15 = vsel %vm646_vm0, %v659_v14, 0.0 }
  0xc6   : > { %664 = vadd.xlane.f32.xlu1 %v663_v15 }
 0x14b   : > { %v662_v16 = vpop.xlane.xlu1 %661 }
 0x14c   : > { %v666_v17 = vmul.f32 0.03125, %v662_v16 }
 0x14e   : > { %v668_v18 = vadd.f32 1e-05, %v666_v17 }
 0x14f   : > { %v665_v19 = vpop.xlane.xlu1 %664 }
 0x150   : > { %2111 = vrsqrt.f32 %v668_v18  ;;  %v667_v20 = vmul.f32 0.03125, %v665_v19 }
 0x152   : > { %v669_v22 = vadd.f32 1e-05, %v667_v20 }
 0x154   : > { %2113 = vrsqrt.f32 %v669_v22 }
 0x15d   : > { %v2112_v25 = vpop.eup %2111 }
 0x15e   : > { %v672_v27 = vmul.f32 %v2112_v25, %v656_v8 }
 0x160   : > { %v680_v30 = vmul.f32 %v678_v26, %v672_v27 }
 0x161   : > { %v2114_v28 = vpop.eup %2113 }
 0x162   : > { %v673_v31 = vmul.f32 %v2114_v28, %v657_v12  ;;  %v688_v33 = vadd.f32 %v686_v29, %v680_v30 }
 0x164   : > { %v681_v32 = vmul.f32 %v678_v26, %v673_v31 }
 0x166   : > { %v689_v34 = vadd.f32 %v686_v29, %v681_v32 }
 0x168   : > { %v690_v35 = vpack.c.bf16 %v689_v34, %v688_v33 }
 0x169 LB: >> { %v2325_v36 = vmov 0.0   ;;  %s1873_s22 = sshll.u32 %s2315_s20, 4  ;;  %vm2326_vm1 = vmmov 0   ;;  %s2921_s5 = sld [smem:[#allocation28_spill]]  ;;  %vm779_vm2 = vcmask 60416   ;;  %s2315_s20 = sphi %s2548_s20, %s696_s20  }
 0x16a   : >> { %1913 = vmatprep.subr.bf16.mxu0 %v2325_v36  ;;  %1921 = vmatprep.subr.bf16.mxu1 %v2325_v36  ;;  %s783_s27 = scalar_lea.vmem %s2872_s7, %s1873_s22  ;;  %s704_s24 = scalar_lea.vmem %s2871_s6, %s2315_s20 }
 0x16b   : >> { %1917 = vmatprep.mubr.msk.bf16.mxu0 %vm2326_vm1, %v2325_v36  ;;  %1925 = vmatprep.mubr.msk.bf16.mxu1 %vm2326_vm1, %v2325_v36  ;;  %v2116_v38 = vld [vmem:[%s783_s27 + $0x8] sm:$0xff]   ;;  %v2118_v40 = vld [vmem:[%s783_s27] sm:$0xff]   ;;  %s788_s25 = scalar_lea.vmem %s2873_s8, %s2315_s20 }
 0x16c   : >> { %1922 = vmatpush3.bf16.msra.mxu1 %v2116_v38  ;;  %v1808_v41 = vld [vmem:[%s704_s24] ss:$0 sm:$0xff] }
 0x16d   : >> { %1923 = vmatprep.subr.bf16.mxu1 %v2325_v36  ;;  %v1817_v42 = vld [vmem:[%s788_s25] ss:$0 sm:$0xff] }
 0x16f   : >> { %s699_s29 = scalar_lea.vmem %s2921_s5, %s1873_s22 }
 0x170   : >> { %v2115_v37 = vld [vmem:[%s699_s29 + $0x8] sm:$0xff]   ;;  %v2117_v39 = vld [vmem:[%s699_s29] sm:$0xff]   ;;  %1924 = vmatpush3.bf16.msra.mxu1 %v2118_v40  ;;  %s1876_s29 = sshll.u32 %s2315_s20, 3  ;;  %s696_s20 = sadd.s32 1, %s2315_s20  }
 0x171   : >> { %1914 = vmatpush3.bf16.msra.mxu0 %v2115_v37  ;;  %s778_s27 = scalar_lea.vmem [#allocation2], %s1876_s29  ;;  %s858_s2 = scalar_lea.vmem [#allocation3], %s1876_s29 }
 0x172   : >> { %1915 = vmatprep.subr.bf16.mxu0 %v2325_v36  ;;  %p693_p0 = scmp.ge.s32.totalorder %s696_s20, 4  }
 0x173   : >> { %1926 = vmatmul.mubr.msk.bf16.vlgmr.msra.gmra.mxu1 %vm646_vm0, %v690_v35 }
 0x175   : >> { %1916 = vmatpush3.bf16.msra.mxu0 %v2117_v39 }
 0x178   : >> { %1918 = vmatmul.mubr.msk.bf16.vlgmr.msra.gmra.mxu0 %vm646_vm0, %v690_v35 }
 0x233   : >> { %v842_v45 = vpop.f32.mrf.mxu1 }
 0x234   : >> { %v843_v46 = vadd.f32 %v1817_v42, %v842_v45 }
 0x235   : >> { %v1927_v49 = vpop.f32.mrf.mxu1 }
 0x236   : >> { %v1878_v50 = vpack.c.bf16 %v843_v46, %v843_v46 }
 0x237   : >> { %v845_v53 = vpop.f32.mrf.mxu1 }
 0x238   : >> { %v761_v43 = vpop.f32.mrf.mxu0  ;;  %859 = vst.msk [vmem:[%s858_s2] sm:$0xf] %vm779_vm2, %v1878_v50  ;;  %v846_v54 = vadd.f32 %v1817_v42, %v845_v53 }
 0x239   : >> { %v762_v44 = vadd.f32 %v1808_v41, %v761_v43  ;;  %v1928_v57 = vpop.f32.mrf.mxu1 }
 0x23a   : >> { %v1919_v47 = vpop.f32.mrf.mxu0  ;;  %v1879_v58 = vpack.c.bf16 %v846_v54, %v846_v54 }
 0x23b   : >> { %v1874_v48 = vpack.c.bf16 %v762_v44, %v762_v44 }
 0x23c   : >> { %v764_v51 = vpop.f32.mrf.mxu0  ;;  %860 = vst.msk [vmem:[%s858_s2 + $0x4] sm:$0xf] %vm779_vm2, %v1879_v58 }
 0x23d   : >> { %780 = vst.msk [vmem:[%s778_s27] sm:$0xf] %vm779_vm2, %v1874_v48  ;;  %v765_v52 = vadd.f32 %v1808_v41, %v764_v51  ;;  %695 = sbr.rel (!%p693_p0) target bundleno = 361 (0x169), region = 194 }
 0x23e   : >> { %v1920_v55 = vpop.f32.mrf.mxu0 }
 0x23f   : >> { %v1875_v56 = vpack.c.bf16 %v765_v52, %v765_v52 }
 0x241   : >> { %781 = vst.msk [vmem:[%s778_s27 + $0x4] sm:$0xf] %vm779_vm2, %v1875_v56 }
 0x242 PF: > { %s1824_s25 = sshll.u32 %s2295_s21, 3  ;;  %vm864_vm3 = vcmask 261120   ;;  %v1825_v59 = vld [vmem:[%s2875_s10] ss:$0 sm:$0xff]  ;;  %v880_v63 = vlaneseq }
 0x243   : > { %s862_s22 = scalar_lea.vmem %s2534_s18, %s1824_s25  ;;  %s2601_s18 = smov 0  }
 0x244   : > { %v863_v60 = vld [vmem:[%s862_s22] sm:$0xff]  ;;  %v2587_v2 = vshrl.u32 %v880_v63, 7  ;;  %v2589_v3 = vand.u32 127, %v880_v63 }
 0x245   : > { %v865_v61 = vsel %vm864_vm3, %v863_v60, 0.0  ;;  %v906_v62 = vadd.f32 %v1825_v59, %v863_v60 }
 0x246   : > { %866 = vadd.xlane.f32.xlu0 %v865_v61  ;;  %vm898_vm4 = vcmp.le.s32.totalorder %v2589_v3, %v2587_v2  ;;  %v882_v12 = vsub.s32 0, %v2587_v2 }
 0x247   : > { %907 = vst.msk [vmem:[#allocation7] sm:$0xff] %vm864_vm3, %v906_v62 }
 0x248   : > { %v883_v13 = vrot.slane %v2519_v0, %v882_v12  ;;  %v890_v15 = vrot.slane %v2524_v1, %v882_v12 }
 0x2cf   : > { %v867_v4 = vpop.xlane.xlu0 %866 }
 0x2d0   : > { %v869_v5 = vmul.f32 0.03125, %v867_v4 }
 0x2d2   : > { %v870_v6 = vsub.f32 %v863_v60, %v869_v5 }
 0x2d4   : > { %v871_v7 = vmul.f32 %v870_v6, %v870_v6 }
 0x2d6   : > { %v872_v8 = vsel %vm864_vm3, %v871_v7, 0.0 }
 0x2d7   : > { %873 = vadd.xlane.f32.xlu0 %v872_v8 }
 0x360   : > { %v874_v9 = vpop.xlane.xlu0 %873 }
 0x361   : > { %v875_v10 = vmul.f32 0.03125, %v874_v9 }
 0x363   : > { %v876_v11 = vadd.f32 1e-05, %v875_v10 }
 0x365   : > { %2119 = vrsqrt.f32 %v876_v11 }
 0x372   : > { %v2120_v14 = vpop.eup %2119 }
 0x373   : > { %v878_v16 = vmul.f32 %v2120_v14, %v870_v6 }
 0x375   : > { %v885_v17 = vmul.f32 %v883_v13, %v878_v16 }
 0x377   : > { %v2597_v18 = vadd.f32 %v890_v15, %v885_v17 }
 0x379   : > { %v893_v19 = vpack.c.bf16 %v2597_v18, %v2597_v18 }
 0x37a LB: >> { %vm985_vm5 = vcmask 7168   ;;  %vm988_vm6 = vcmask 64512   ;;  %v2327_v0 = vmov 0.0   ;;  %v2328_v1 = vmov -1e+30   ;;  %s1881_s20 = sshll.u32 %s2319_s18, 4  ;;  %s2319_s18 = sphi %s2601_s18, %s913_s18  }
 0x37b   : >> { %1929 = vmatprep.subr.bf16.mxu0 %v2327_v0  ;;  %986 = vst.msk [vmem:[#allocation4] sm:$0xff] %vm985_vm5, %v2328_v1  ;;  %987 = vst.msk [vmem:[#allocation5] sm:$0xff] %vm985_vm5, %v2327_v0  ;;  %vm2329_vm7 = vmmov 0   ;;  %s2922_s27 = sld [smem:[#allocation26_spill]]  ;;  %p1832_p1 = scmp.le.s32.totalorder %s2295_s21, 0 }
 0x37c   : >> { %989 = vst.msk [vmem:[#allocation6] sm:$0xff] %vm988_vm6, %v2327_v0  ;;  %1933 = vmatprep.mubr.msk.bf16.mxu0 %vm2329_vm7, %v2327_v0  ;;  %s2923_s4 = sld [smem:[#allocation27_spill]] }
 0x381   : >> { %s916_s2 = scalar_lea.vmem %s2922_s27, %s1881_s20  ;;  %s2630_s20 = smov (!%p1832_p1), 0  }
 0x382   : >> { %v2121_v20 = vld [vmem:[%s916_s2 + $0x8] sm:$0xff]   ;;  %v2122_v21 = vld [vmem:[%s916_s2] sm:$0xff]   ;;  %s921_s22 = scalar_lea.vmem %s2923_s4, %s2319_s18 }
 0x383   : >> { %1930 = vmatpush3.bf16.msra.mxu0 %v2121_v20  ;;  %v1828_v22 = vld [vmem:[%s921_s22] ss:$0 sm:$0xff] }
 0x384   : >> { %1931 = vmatprep.subr.bf16.mxu0 %v2327_v0 }
 0x387   : >> { %1932 = vmatpush3.bf16.msra.mxu0 %v2122_v21 }
 0x38a   : >> { %1934 = vmatmul.mubr.msk.bf16.vlgmr.msra.gmra.mxu0 %vm864_vm3, %v893_v19 }
 0x44a   : >> { %v978_v23 = vpop.f32.mrf.mxu0 }
 0x44b   : >> { %v979_v24 = vadd.f32 %v1828_v22, %v978_v23 }
 0x44c   : >> { %v1935_v25 = vpop.f32.mrf.mxu0  ;;  %1737 = sbr.rel (%p1832_p1) target bundleno = 1803 (0x70b), region = 199 }
 0x44d   : >> { %v2627_v26 = vpack.c.bf16 %v979_v24, %v979_v24 }
 0x44e   : >> { %v981_v27 = vpop.f32.mrf.mxu0 }
 0x450   : >> { %v1936_v28 = vpop.f32.mrf.mxu0 }
 0x451 LB: >>> { %v2330_v29 = vmov 0.0   ;;  %s1834_s3 = sshll.u32 %s2319_s18, 1  ;;  %vm2331_vm8 = vmmov 0   ;;  %s1833_s29 = sshll.u32 %s2323_s20, 3  ;;  %v2332_v38 = vmov 0   ;;  %v1054_v39 = vld [vmem:[#allocation4] sm:$0xff]  ;;  %s2323_s20 = sphi %s2630_s20, %s993_s20  }
 0x452   : >>> { %1937 = vmatprep.subr.bf16.mxu0 %v2330_v29  ;;  %1939 = vmatprep.mubr.msk.bf16.mxu0 %vm2331_vm8, %v2330_v29  ;;  %s997_s27 = sshra.s32 %s1833_s29, 3  ;;  %vm1088_vm9 = vcmask 1043456   ;;  %v1070_v53 = vld [vmem:[#allocation5] sm:$0xff]  ;;  %v1077_v57 = vld [vmem:[#allocation6] sm:$0xff]  ;;  %s993_s20 = sadd.s32 1, %s2323_s20  }
 0x453   : >>> { %1943 = vmatprep.subr.bf16.mxu1 %v2330_v29  ;;  %1945 = vmatprep.mubr.msk.bf16.mxu1 %vm2331_vm8, %v2330_v29  ;;  %s1000_s2 = sadd.s32 %s1834_s3, %s997_s27  ;;  %p992_p2 = scmp.ge.s32.totalorder %s993_s20, %s2295_s21 }
 0x454   : >>> { %s1835_s26 = sshll.u32 %s1000_s2, 2  ;;  %2123 = vset.pattern.permute.xlu0 %v2332_v38  ;;  %2124 = vset.pattern.permute.xlu1 %v2332_v38 }
 0x455   : >>> { %s1002_s24 = scalar_lea.vmem [#allocation2], %s1835_s26  ;;  %s1005_s22 = scalar_lea.vmem [#allocation3], %s1835_s26 }
 0x456   : >>> { %v1003_v30 = vld [vmem:[%s1002_s24] sm:$0xf] }
 0x457   : >>> { %v1011_v31 = vsel %vm988_vm6, %v1003_v30, 0  ;;  %v1006_v43 = vld [vmem:[%s1005_s22] sm:$0xf] }
 0x458   : >>> { %1938 = vmatpush3.bf16.xpose.msra.mxu0 %v1011_v31  ;;  %v1090_v44 = vsel %vm1088_vm9, %v1006_v43, 0 }
 0x459   : >>> { %1944 = vmatpush3.bf16.msra.mxu1 %v1090_v44 }
 0x45f   : >>> { %1940 = vmatmul.mubr.msk.bf16.vlgmr.msra.gmra.mxu0 %vm988_vm6, %v2627_v26 }
 0x51f   : >>> { %v1047_v32 = vpop.f32.mrf.mxu0 }
 0x520   : >>> { %v1053_v33 = vmul.f32 0.35355338, %v1047_v32 }
 0x521   : >>> { %v1941_v34 = vpop.f32.mrf.mxu0 }
 0x522   : >>> { %v1055_v35 = vsel %vm988_vm6, %v1053_v33, -inf }
 0x523   : >>> { %1056 = vmax.xlane.f32.xlu0 %v1055_v35  ;;  %v1050_v36 = vpop.f32.mrf.mxu0 }
 0x525   : >>> { %v1942_v37 = vpop.f32.mrf.mxu0 }
 0x5ac   : >>> { %v1057_v40 = vpop.xlane.xlu0 %1056 }
 0x5ad   : >>> { %v1058_v41 = vmax.f32 %v1054_v39, %v1057_v40 }
 0x5af   : >>> { %v1059_v42 = vsub.f32 %v1054_v39, %v1058_v41  ;;  %1134 = vst.msk [vmem:[#allocation4] sm:$0xff] %vm985_vm5, %v1058_v41  ;;  %1064 = vperm.xlu0 %2123, %v1058_v41  }
 0x5b1   : >>> { %v1060_v49 = vmul.f32 1.442695, %v1059_v42 }
 0x62a   : >>> { %v1065_v45 = vpop.permute.xlu0 %1064 }
 0x62b   : >>> { %v1067_v46 = vsub.f32 %v1053_v33, %v1065_v45 }
 0x62d   : >>> { %v1068_v47 = vmul.f32 1.442695, %v1067_v46 }
 0x62f   : >>> { %2125 = vpow2.f32 %v1068_v47 }
 0x630   : >>> { %2127 = vpow2.f32 %v1060_v49 }
 0x63c   : >>> { %v2126_v48 = vpop.eup %2125 }
 0x63d   : >>> { %v1072_v50 = vsel %vm988_vm6, %v2126_v48, 0.0  ;;  %v1084_v51 = vpack.c.bf16 %v2126_v48, %v2126_v48  ;;  %v2128_v52 = vpop.eup %2127 }
 0x63e   : >>> { %1073 = vadd.xlane.f32.xlu1 %v1072_v50  ;;  %v1071_v54 = vmul.f32 %v2128_v52, %v1070_v53 }
 0x63f   : >>> { %1946 = vmatmul.mubr.msk.bf16.vlgmr.msra.gmra.mxu1 %vm988_vm6, %v1084_v51 }
 0x64f   : >>> { %1080 = vperm.xlu1 %2124, %v2128_v52  }
 0x6c7   : >>> { %v1074_v55 = vpop.xlane.xlu1 %1073 }
 0x6c8   : >>> { %v1075_v56 = vadd.f32 %v1074_v55, %v1071_v54 }
 0x6ca   : >>> { %1076 = vst.msk [vmem:[#allocation5] sm:$0xff] %vm985_vm5, %v1075_v56 }
 0x6cb   : >>> { %v1081_v58 = vpop.permute.xlu1 %1080 }
 0x6cc   : >>> { %v1083_v59 = vmul.f32 %v1081_v58, %v1077_v57 }
 0x6ff   : >>> { %v1126_v60 = vpop.f32.mrf.mxu1 }
 0x700   : >>> { %v1132_v61 = vadd.f32 %v1126_v60, %v1083_v59 }
 0x701   : >>> { %v1947_v62 = vpop.f32.mrf.mxu1 }
 0x702   : >>> { %1133 = vst.msk [vmem:[#allocation6] sm:$0xff] %vm988_vm6, %v1132_v61 }
 0x703   : >>> { %v1129_v63 = vpop.f32.mrf.mxu1 }
 0x705   : >>> { %v1948_v4 = vpop.f32.mrf.mxu1 }
 0x706   : >> { %995 = sbr.rel (!%p992_p2) target bundleno = 1105 (0x451), region = 205 }
 0x70b PF: >> { %1949 = vmatprep.subr.bf16.mxu0 %v2327_v0  ;;  %s1135_s3 = sshra.s32 %s1824_s25, 3  ;;  %s1839_s29 = sshll.u32 %s2319_s18, 1  ;;  %1951 = vmatprep.mubr.msk.bf16.mxu0 %vm2329_vm7, %v2327_v0  ;;  %v2333_v14 = vmov 0   ;;  %v1193_v15 = vld [vmem:[#allocation4] sm:$0xff]  ;;  %vm1227_vm10 = vcmask 1043456   ;;  %v1209_v32 = vld [vmem:[#allocation5] sm:$0xff] }
 0x70c   : >> { %s1138_s27 = sadd.s32 %s1839_s29, %s1135_s3  ;;  %1955 = vmatprep.subr.bf16.mxu1 %v2327_v0  ;;  %1957 = vmatprep.mubr.msk.bf16.mxu1 %vm2329_vm7, %v2327_v0  ;;  %s1844_s24 = sshll.u32 %s2319_s18, 2  ;;  %v1216_v38 = vld [vmem:[#allocation6] sm:$0xff]  ;;  %v1284_v49 = vld [vmem:[#allocation7] sm:$0xff] }
 0x70d   : >> { %s1840_s2 = sshll.u32 %s1138_s27, 2  ;;  %2129 = vset.pattern.permute.xlu0 %v2333_v14  ;;  %2130 = vset.pattern.permute.xlu1 %v2333_v14  ;;  %s1286_s29 = scalar_lea.vmem %s2874_s9, %s1844_s24 }
 0x70e   : >> { %s1140_s20 = scalar_lea.vmem [#allocation2], %s1840_s2  ;;  %s1143_s26 = scalar_lea.vmem [#allocation3], %s1840_s2  ;;  %v1287_v25 = vld [vmem:[%s1286_s29] sm:$0xf] }
 0x70f   : >> { %v1141_v5 = vld [vmem:[%s1140_s20] sm:$0xf]  ;;  %v1292_v28 = vsel %vm1227_vm10, %v1287_v25, 0  ;;  %s913_s18 = sadd.s32 1, %s2319_s18  }
 0x710   : >> { %v1149_v6 = vsel %vm988_vm6, %v1141_v5, 0  ;;  %v1144_v20 = vld [vmem:[%s1143_s26] sm:$0xf]  ;;  %p910_p4 = scmp.ge.s32.totalorder %s913_s18, 4  }
 0x711   : >> { %1950 = vmatpush3.bf16.xpose.msra.mxu0 %v1149_v6  ;;  %v1229_v21 = vsel %vm1227_vm10, %v1144_v20, 0  ;;  %v2137_v62 = vld [vmem:[%s2878_s13 + $0x8] sm:$0xff] (%p910_p4)   ;;  %v2334_v63 = vmov (%p910_p4), 0.0   ;;  %vm2335_vm11 = vmmov (%p910_p4), 0   ;;  %v2138_v2 = vld [vmem:[%s2878_s13] sm:$0xff] (%p910_p4)   ;;  %v2139_v3 = vld [vmem:[%s2880_s15 + $0x38] sm:$0xff] (%p910_p4)  }
 0x712   : >> { %1956 = vmatpush3.bf16.msra.mxu1 %v1229_v21  ;;  %1967 = vmatprep.subr.bf16.mxu0 (%p910_p4), %v2334_v63  ;;  %v2140_v18 = vld [vmem:[%s2880_s15 + $0x30] sm:$0xff] (%p910_p4)   ;;  %v2142_v14 = vld [vmem:[%s2880_s15 + $0x20] sm:$0xff] (%p910_p4)   ;;  %s1864_s24 = sshll.u32 (%p910_p4), %s2299_s1, 1  ;;  %s2924_s3 = sadd.s32 (%p910_p4), 4294967295, %s2311_s23  }
 0x713   : >> { %1961 = vmatprep.subr.bf16.mxu1 %v2327_v0  ;;  %v1848_v20 = vld [vmem:[%s2879_s14] ss:$0 sm:$0xff] (%p910_p4)  ;;  %s1576_s22 = sadd.s32 (%p910_p4), %s2295_s21, %s1864_s24  ;;  %s2736_s29 = sand.u32 (%p910_p4), 1, %s2924_s3  }
 0x714   : > { %s2738_s27 = sshll.u32 (%p910_p4), %s1576_s22, 7  ;;  %s2925_s18 = sld [smem:[#allocation31_spill]] (%p910_p4) }
 0x715   : > { %s1595_s26 = sshll.u32 (%p910_p4), %s624_s19, 4  ;;  %s2336_s21 = smov (%p910_p4), [#allocation10]   ;;  %s1596_s26 = int_to_ptr.vmem [resolvable:$true] %s1595_s26 }
 0x716   : > { %s2151_s0 = scalar_lea.vmem (%p910_p4), %s1596_s26, 128  ;;  %s2155_s1 = sshll.u32 (%p910_p4), %s2336_s21, 4  ;;  %s2156_s1 = int_to_ptr.vmem [resolvable:$false] %s2155_s1 }
 0x717   : > { %p2152_p5 = scmp.ne.s32.totalorder (%p910_p4), %s1596_s26, %s2151_s0  ;;  %s2157_s24 = scalar_lea.vmem (%p910_p4), %s2156_s1, 256 }
 0x718   : >> { %1952 = vmatmul.mubr.msk.bf16.vlgmr.msra.gmra.mxu0 %vm988_vm6, %v2627_v26  ;;  %p2158_p9 = scmp.lt.s32.totalorder (%p910_p4), %s1596_s26, %s2156_s1  ;;  %p2159_p10 = scmp.lt.s32.totalorder (%p910_p4), %s2157_s24, %s2151_s0 }
 0x719   : > { %1971 = vmatprep.mubr.msk.bf16.mxu0 (%p910_p4), %vm2335_vm11, %v2334_v63  ;;  %1968 = vmatpush3.bf16.msra.mxu0 (%p910_p4), %v2137_v62  ;;  %p2153_p6 = pnand (%p910_p4), %p2152_p5, %p2492_p3 }
 0x71a   : > { %1969 = vmatprep.subr.bf16.mxu0 (%p910_p4), %v2334_v63  ;;  %s1593_s20 = scalar_lea.hbm (%p910_p4), %s2925_s18, %s2738_s27  ;;  %p2160_p11 = por (%p910_p4), %p2159_p10, %p2158_p9 }
 0x71b   : > { %p2154_p7 = pneg (%p910_p4), %p2153_p6 }
 0x71d   : > { %1970 = vmatpush3.bf16.msra.mxu0 (%p910_p4), %v2138_v2  ;;  %p2161_p12 = pnand (%p910_p4), %p2160_p11, %p2154_p7 }
 0x7d8   : >> { %v1185_v7 = vpop.f32.mrf.mxu0 }
 0x7d9   : >> { %v1191_v8 = vmul.f32 0.35355338, %v1185_v7  ;;  %v1846_v7 = vld [vmem:[%s2876_s11] ss:$0 sm:$0xff] (%p910_p4) }
 0x7da   : >> { %v1953_v9 = vpop.f32.mrf.mxu0 }
 0x7db   : >> { %v1192_v10 = vsel %vm898_vm4, %v1191_v8, -1e+30  ;;  %v1847_v9 = vld [vmem:[%s2877_s12] ss:$0 sm:$0xff] (%p910_p4) }
 0x7dc   : >> { %v1188_v11 = vpop.f32.mrf.mxu0  ;;  %v1194_v12 = vsel %vm988_vm6, %v1192_v10, -inf }
 0x7dd   : >> { %1195 = vmax.xlane.f32.xlu0 %v1194_v12 }
 0x7de   : >> { %v1954_v13 = vpop.f32.mrf.mxu0 }
 0x7df   : > { %v2141_v13 = vld [vmem:[%s2880_s15 + $0x28] sm:$0xff] (%p910_p4)  }
 0x866   : >> { %v1196_v16 = vpop.xlane.xlu0 %1195 }
 0x867   : >> { %v1197_v17 = vmax.f32 %v1193_v15, %v1196_v16  ;;  %v2144_v16 = vld [vmem:[%s2880_s15 + $0x10] sm:$0xff] (%p910_p4)  }
 0x869   : >> { %v1198_v1 = vsub.f32 %v1193_v15, %v1197_v17  ;;  %1273 = vst.msk [vmem:[#allocation4] sm:$0xff] %vm985_vm5, %v1197_v17  ;;  %1203 = vperm.xlu0 %2129, %v1197_v17   ;;  %v2143_v15 = vld [vmem:[%s2880_s15 + $0x18] sm:$0xff] (%p910_p4)   ;;  %v2145_v17 = vld [vmem:[%s2880_s15 + $0x8] sm:$0xff] (%p910_p4)  }
 0x86b   : >> { %v1199_v27 = vmul.f32 1.442695, %v1198_v1  ;;  %v2146_v1 = vld [vmem:[%s2880_s15] sm:$0xff] (%p910_p4)  }
 0x8e4   : >> { %v1204_v22 = vpop.permute.xlu0 %1203 }
 0x8e5   : >> { %v1206_v23 = vsub.f32 %v1192_v10, %v1204_v22 }
 0x8e7   : >> { %v1207_v24 = vmul.f32 1.442695, %v1206_v23 }
 0x8e9   : >> { %2131 = vpow2.f32 %v1207_v24 }
 0x8ea   : >> { %2133 = vpow2.f32 %v1199_v27 }
 0x8f6   : >> { %v2132_v26 = vpop.eup %2131 }
 0x8f7   : >> { %v1211_v29 = vsel %vm988_vm6, %v2132_v26, 0.0  ;;  %v1223_v30 = vpack.c.bf16 %v2132_v26, %v2132_v26  ;;  %v2134_v31 = vpop.eup %2133 }
 0x8f8   : >> { %1212 = vadd.xlane.f32.xlu1 %v1211_v29  ;;  %v1210_v33 = vmul.f32 %v2134_v31, %v1209_v32 }
 0x8f9   : >> { %1958 = vmatmul.mubr.msk.bf16.vlgmr.msra.gmra.mxu1 %vm988_vm6, %v1223_v30 }
 0x8fa   : >> { %1962 = vmatpush3.bf16.msra.mxu1 %v1292_v28  ;;  %1963 = vmatprep.mubr.msk.bf16.mxu1 %vm2329_vm7, %v2327_v0 }
 0x8fb   : > { %1975 = vmatprep.subr.bf16.mxu1 (%p910_p4), %v2334_v63 }
 0x909   : >> { %1219 = vperm.xlu1 %2130, %v2134_v31  }
 0x981   : >> { %v1213_v34 = vpop.xlane.xlu1 %1212 }
 0x982   : >> { %v1214_v35 = vadd.f32 %v1213_v34, %v1210_v33 }
 0x984   : >> { %1215 = vst.msk [vmem:[#allocation5] sm:$0xff] %vm985_vm5, %v1214_v35 }
 0x985   : >> { %v1220_v39 = vpop.permute.xlu1 %1219 }
 0x986   : >> { %v1222_v40 = vmul.f32 %v1220_v39, %v1216_v38 }
 0x98b   : >> { %v1275_v36 = vld [vmem:[#allocation5] sm:$0xff] }
 0x98c   : >> { %2135 = vrcp.f32 %v1275_v36 }
 0x999   : >> { %v2136_v37 = vpop.eup %2135 }
 0x99a   : >> { %1279 = vperm.xlu1 %2130, %v2136_v37  }
 0x9b9   : >> { %v1265_v41 = vpop.f32.mrf.mxu1 }
 0x9ba   : >> { %v1271_v42 = vadd.f32 %v1265_v41, %v1222_v40 }
 0x9bb   : >> { %v1959_v43 = vpop.f32.mrf.mxu1 }
 0x9bc   : >> { %1272 = vst.msk [vmem:[#allocation6] sm:$0xff] %vm988_vm6, %v1271_v42 }
 0x9bd   : >> { %v1268_v0 = vpop.f32.mrf.mxu1 }
 0x9bf   : >> { %v1960_v44 = vpop.f32.mrf.mxu1 }
 0x9c3   : >> { %v1274_v45 = vld [vmem:[#allocation6] sm:$0xff] }
 0xa15   : >> { %v1280_v46 = vpop.permute.xlu1 %1279 }
 0xa16   : >> { %v1282_v47 = vmul.f32 %v1280_v46, %v1274_v45 }
 0xa18   : >> { %v1283_v48 = vpack.c.bf16 %v1282_v47, %v1282_v47 }
 0xa1a   : >> { %1964 = vmatmul.mubr.msk.bf16.vlgmr.msra.gmra.mxu1 %vm988_vm6, %v1283_v48 }
 0xa1b   : > { %1991 = vmatprep.mubr.msk.bf16.mxu1 (%p910_p4), %vm2335_vm11, %v2334_v63  ;;  %1976 = vmatpush3.bf16.msra.mxu1 (%p910_p4), %v2139_v3 }
 0xa1c   : > { %1977 = vmatprep.subr.bf16.mxu1 (%p910_p4), %v2334_v63 }
 0xa1f   : > { %1978 = vmatpush3.bf16.msra.mxu1 (%p910_p4), %v2140_v18 }
 0xa20   : > { %1979 = vmatprep.subr.bf16.mxu1 (%p910_p4), %v2334_v63 }
 0xa23   : > { %1980 = vmatpush3.bf16.msra.mxu1 (%p910_p4), %v2141_v13 }
 0xa24   : > { %1981 = vmatprep.subr.bf16.mxu1 (%p910_p4), %v2334_v63 }
 0xa27   : > { %1982 = vmatpush3.bf16.msra.mxu1 (%p910_p4), %v2142_v14 }
 0xa28   : > { %1983 = vmatprep.subr.bf16.mxu1 (%p910_p4), %v2334_v63 }
 0xa2b   : > { %1984 = vmatpush3.bf16.msra.mxu1 (%p910_p4), %v2143_v15 }
 0xa2c   : > { %1985 = vmatprep.subr.bf16.mxu1 (%p910_p4), %v2334_v63 }
 0xa2f   : > { %1986 = vmatpush3.bf16.msra.mxu1 (%p910_p4), %v2144_v16 }
 0xa30   : > { %1987 = vmatprep.subr.bf16.mxu1 (%p910_p4), %v2334_v63 }
 0xa33   : > { %1988 = vmatpush3.bf16.msra.mxu1 (%p910_p4), %v2145_v17 }
 0xa34   : > { %1989 = vmatprep.subr.bf16.mxu1 (%p910_p4), %v2334_v63 }
 0xa37   : > { %1990 = vmatpush3.bf16.msra.mxu1 (%p910_p4), %v2146_v1 }
 0xada   : >> { %v1328_v50 = vpop.f32.mrf.mxu1 }
 0xadb   : >> { %v1334_v51 = vadd.f32 %v1328_v50, %v1284_v49 }
 0xadc   : >> { %v1965_v52 = vpop.f32.mrf.mxu1  ;;  %912 = sbr.rel (!%p910_p4) target bundleno = 890 (0x37a), region = 216 }
 0xadd   : >> { %1335 = vst.msk [vmem:[#allocation7] sm:$0xff] %vm864_vm3, %v1334_v51 }
 0xade   : >> { %v1331_v53 = vpop.f32.mrf.mxu1 }
 0xae0   : >> { %v1966_v54 = vpop.f32.mrf.mxu1 }
 0xae4   : > { %v2683_v55 = vld [vmem:[#allocation7] sm:$0xff] }
 0xae5   : > { %v1339_v56 = vsel %vm864_vm3, %v2683_v55, 0.0 }
 0xae6   : > { %1340 = vadd.xlane.f32.xlu0 %v1339_v56 }
 0xb6f   : > { %v1341_v57 = vpop.xlane.xlu0 %1340 }
 0xb70   : > { %v1342_v58 = vmul.f32 0.03125, %v1341_v57 }
 0xb72   : > { %v1343_v59 = vsub.f32 %v2683_v55, %v1342_v58 }
 0xb74   : > { %v1344_v60 = vmul.f32 %v1343_v59, %v1343_v59 }
 0xb76   : > { %v1345_v61 = vsel %vm864_vm3, %v1344_v60, 0.0 }
 0xb77   : > { %1346 = vadd.xlane.f32.xlu0 %v1345_v61 }
 0xc00   : > { %v1347_v19 = vpop.xlane.xlu0 %1346 }
 0xc01   : > { %v1348_v4 = vmul.f32 0.03125, %v1347_v19 }
 0xc03   : > { %v1349_v5 = vadd.f32 1e-05, %v1348_v4 }
 0xc05   : > { %2147 = vrsqrt.f32 %v1349_v5 }
 0xc12   : > { %v2148_v6 = vpop.eup %2147 }
 0xc13   : > { %v1351_v8 = vmul.f32 %v2148_v6, %v1343_v59 }
 0xc15   : > { %v1358_v10 = vmul.f32 %v1846_v7, %v1351_v8 }
 0xc17   : > { %v1365_v11 = vadd.f32 %v1847_v9, %v1358_v10 }
 0xc19   : > { %v1366_v12 = vpack.c.bf16 %v1365_v11, %v1365_v11  ;;  %1552 = vst.msk [vmem:[%s624_s19] sm:$0xff] %vm864_vm3, %v1365_v11 }
 0xc1b   : > { %1972 = vmatmul.mubr.msk.bf16.vlgmr.msra.gmra.mxu0 %vm864_vm3, %v1366_v12 }
 0xcdb   : > { %v1427_v21 = vpop.f32.mrf.mxu0 }
 0xcdc   : > { %v1428_v22 = vadd.f32 %v1848_v20, %v1427_v21 }
 0xcdd   : > { %v1973_v23 = vpop.f32.mrf.mxu0 }
 0xcde   : > { %v1434_v24 = vmul.f32 0.70710677, %v1428_v22  ;;  %v1433_v28 = vmul.f32 0.5, %v1428_v22 }
 0xcdf   : > { %v1430_v25 = vpop.f32.mrf.mxu0 }
 0xce0   : > { %2149 = verf.f32 %v1434_v24 }
 0xce1   : > { %v1974_v26 = vpop.f32.mrf.mxu0 }
 0xced   : > { %v2150_v27 = vpop.eup %2149 }
 0xcee   : > { %v1436_v29 = vadd.f32 1.0, %v2150_v27 }
 0xcf0   : > { %v1437_v30 = vmul.f32 %v1436_v29, %v1433_v28 }
 0xcf2   : > { %v1438_v31 = vpack.c.bf16 %v1437_v30, %v1437_v30 }
 0xcf4   : > { %1992 = vmatmul.mubr.bf16.vlgmr.msra.gmra.mxu1 %v1438_v31 }
 0xcf5   : > { %2164 = shalt.err (!%p2161_p12)
}
 0xcf6   : > { %s2165_s22 = scalar_lea.hbm %s1593_s20, 128  ;;  %s2169_s2 = scalar_lea.hbm %s2925_s18, 512 }
 0xcf7   : > { %p2166_p13 = scmp.ne.s32.totalorder %s1593_s20, %s2165_s22  ;;  %p2170_p2 = scmp.lt.s32.totalorder %s1593_s20, %s2925_s18 }
 0xcf8   : > { %p2171_p4 = scmp.lt.s32.totalorder %s2169_s2, %s2165_s22 }
 0xcf9   : > { %p2167_p0 = pnand %p2166_p13, %p2492_p3 }
 0xcfa   : > { %p2172_p5 = por %p2171_p4, %p2170_p2 }
 0xcfb   : > { %p2168_p1 = pneg %p2167_p0 }
 0xcfd   : > { %p2173_p6 = pnand %p2172_p5, %p2168_p1 }
 0xcff   : > { %2176 = shalt.err (!%p2173_p6)
}
 0xd00   : > { %s2926_s0 = scalar_lea.sflag [#allocation11], %s2736_s29  ;;  %s2927_s24 = sld [smem:[#allocation29_spill]] }
 0xd01   : > { %1996 = dma.vmem_to_hbm [thread:$0]  (%p2492_p3), %s1596_s26, 128, %s1593_s20, %s2926_s0  }
 0xd02   : > { %s2928_s16 = scalar_lea.vmem [#allocation12], %s2528_s17  ;;  %s2929_s19 = scalar_lea.vmem [#allocation8], %s2528_s17 }
 0xd03   : > { %s1610_s22 = sshll.u32 %s2928_s16, 4  ;;  %s1580_s3 = sshll.u32 %s2929_s19, 4  ;;  %s2774_s22 = int_to_ptr.vmem [resolvable:$true] %s1610_s22  ;;  %s2786_s3 = int_to_ptr.vmem [resolvable:$true] %s1580_s3 }
 0xd04   : > { %s2930_s4 = sld [smem:[#allocation32_spill]]  ;;  %s2931_s20 = smov %s2928_s16 }
 0xd05   : > { %s2932_s21 = sld [smem:[#allocation30_spill]]  ;;  %s2177_s16 = scalar_lea.vmem %s2774_s22, 128 }
 0xd06   : > { %v1852_v32 = vld [vmem:[%s2927_s24] ss:$0 sm:$0xff]  ;;  %p2178_p7 = scmp.ne.s32.totalorder %s2774_s22, %s2177_s16  ;;  %s2337_s19 = smov [#allocation12]  }
 0xd07   : > { %s2181_s2 = sshll.u32 %s2337_s19, 4  ;;  %s2182_s2 = int_to_ptr.vmem [resolvable:$false] %s2181_s2 }
 0xd08   : > { %p2179_p9 = pnand %p2178_p7, %p2492_p3  ;;  %s2183_s25 = scalar_lea.vmem %s2182_s2, 256 }
 0xd09   : > { %p2184_p11 = scmp.lt.s32.totalorder %s2774_s22, %s2182_s2  ;;  %p2185_p12 = scmp.lt.s32.totalorder %s2183_s25, %s2177_s16 }
 0xd0a   : > { %s2772_s5 = scalar_lea.hbm %s2930_s4, %s2738_s27  ;;  %p2180_p10 = pneg %p2179_p9 }
 0xd0b   : > { %s2933_s24 = smov %s2932_s21  ;;  %s2784_s1 = scalar_lea.hbm %s2932_s21, %s2738_s27 }
 0xd0c   : > { %p2186_p13 = por %p2185_p12, %p2184_p11 }
 0xd0e   : > { %p2187_p0 = pnand %p2186_p13, %p2180_p10 }
 0xdb4   : > { %v1544_v33 = vpop.f32.mrf.mxu1 }
 0xdb5   : > { %v1545_v34 = vadd.f32 %v1852_v32, %v1544_v33 }
 0xdb6   : > { %v1993_v35 = vpop.f32.mrf.mxu1 }
 0xdb7   : > { %v1550_v36 = vadd.f32 %v1545_v34, %v2683_v55  ;;  %1553 = vst.msk [vmem:[%s2931_s20] sm:$0xff] %vm864_vm3, %v1545_v34 }
 0xdb8   : > { %v1547_v37 = vpop.f32.mrf.mxu1 }
 0xdb9   : > { %2190 = shalt.err (!%p2187_p0)
}
 0xdba   : > { %s2191_s27 = scalar_lea.hbm %s2772_s5, 128  ;;  %s2195_s0 = scalar_lea.hbm %s2930_s4, 512 }
 0xdbb   : > { %p2192_p1 = scmp.ne.s32.totalorder %s2772_s5, %s2191_s27  ;;  %p2196_p5 = scmp.lt.s32.totalorder %s2772_s5, %s2930_s4 }
 0xdbc   : > { %p2197_p6 = scmp.lt.s32.totalorder %s2195_s0, %s2191_s27 }
 0xdbd   : > { %p2193_p2 = pnand %p2192_p1, %p2492_p3 }
 0xdbe   : > { %p2198_p7 = por %p2197_p6, %p2196_p5 }
 0xdbf   : > { %p2194_p4 = pneg %p2193_p2 }
 0xdc1   : > { %p2199_p9 = pnand %p2198_p7, %p2194_p4 }
 0xdc3   : > { %2202 = shalt.err (!%p2199_p9)
}
 0xdc4   : > { %s2934_s16 = scalar_lea.sflag [#allocation11], %s2736_s29  ;;  %s2935_s2 = scalar_lea.vmem [#allocation8], %s2528_s17  ;;  %v1994_v38 = vpop.f32.mrf.mxu1 }
 0xdc5   : > { %1997 = dma.vmem_to_hbm [thread:$0]  (%p2492_p3), %s2774_s22, 128, %s2772_s5, %s2934_s16   ;;  %1551 = vst.msk [vmem:[%s2935_s2] sm:$0xff] %vm864_vm3, %v1550_v36 }
 0xdc6   : > { %s2936_s25 = sand.u32 1, %s2287_s30   ;;  %s2203_s20 = scalar_lea.vmem %s2786_s3, 128 }
 0xdc7   : > { %s1555_s27 = scalar_lea.sflag [#allocation9], %s2936_s25  ;;  %p2204_p10 = scmp.ne.s32.totalorder %s2786_s3, %s2203_s20 }
 0xdc8   : > { %s2338_s29 = smov [#allocation8]  }
 0xdc9   : > { %p2205_p11 = pnand %p2204_p10, %p2492_p3  ;;  %s2207_s26 = sshll.u32 %s2338_s29, 4  ;;  %s2208_s26 = int_to_ptr.vmem [resolvable:$false] %s2207_s26 }
 0xdca   : > { %s2209_s0 = scalar_lea.vmem %s2208_s26, 256  ;;  %p2210_p13 = scmp.lt.s32.totalorder %s2786_s3, %s2208_s26 }
 0xdcb   : > { %p2206_p12 = pneg %p2205_p11  ;;  %p2211_p0 = scmp.lt.s32.totalorder %s2209_s0, %s2203_s20 }
 0xdcd   : > { %p2212_p1 = por %p2211_p0, %p2210_p13 }
 0xdcf   : > { %p2213_p2 = pnand %p2212_p1, %p2206_p12 }
 0xdd1   : > { %2216 = shalt.err (!%p2213_p2)
}
 0xdd2   : > { %s2217_s5 = scalar_lea.hbm %s2784_s1, 128  ;;  %s2221_s21 = scalar_lea.hbm %s2933_s24, 512 }
 0xdd3   : > { %p2218_p4 = scmp.ne.s32.totalorder %s2784_s1, %s2217_s5  ;;  %p2222_p7 = scmp.lt.s32.totalorder %s2784_s1, %s2933_s24 }
 0xdd4   : > { %p2223_p9 = scmp.lt.s32.totalorder %s2221_s21, %s2217_s5 }
 0xdd5   : > { %p2219_p5 = pnand %p2218_p4, %p2492_p3 }
 0xdd6   : > { %p2224_p10 = por %p2223_p9, %p2222_p7 }
 0xdd7   : > { %p2220_p6 = pneg %p2219_p5 }
 0xdd9   : > { %p2225_p11 = pnand %p2224_p10, %p2220_p6 }
 0xddb   : > { %2228 = shalt.err (!%p2225_p11)
}
 0xddc   : > { %1995 = dma.vmem_to_hbm [thread:$0]  (%p2492_p3), %s2786_s3, 128, %s2784_s1, %s1555_s27  }
 0xddd PF: > { %s2937_s2 = sld [smem:[#allocation15_spill]]  ;;  %p2011_p12 = scmp.ge.s32.totalorder %s2311_s23, 2 }
 0xddf   : > { %p2002_p13 = pnand %p2011_p12, %p2503_p8 }
 0xde1   : > { %p2003_p0 = pneg %p2002_p13 }
 0xde3   : > { %s1622_s20 = sand.u32 1, %s2937_s2  }
 0xde4   : > { %s1623_s29 = scalar_lea.sflag [#allocation9], %s1622_s20 }
 0xde5   : > { %2274 = dma.done.wait (%p2003_p0), %s1623_s29, 128  }
 0xde6   : > { %2276 = vsyncadd (%p2003_p0), %s1623_s29, 4294967168  ;;  %s2939_s26 = sadd.s32 4294967294, %s2311_s23  }
 0xde7   : > { %s1631_s0 = sand.u32 1, %s2939_s26  }
 0xde8   : > { %s1632_s5 = scalar_lea.sflag [#allocation11], %s1631_s0 }
 0xde9   : > { %2278 = dma.done.wait (%p2003_p0), %s1632_s5, 256  }
 0xdea   : > { %2280 = vsyncadd (%p2003_p0), %s1632_s5, 4294967040  ;;  %s36_s23 = sadd.s32 1, %s2311_s23   ;;  %s2940_s28 = sld [smem:[#allocation16_spill]] }
 0xdeb   : > { %p33_p3 = scmp.ge.s32.totalorder %s36_s23, 6   ;;  %s2941_s20 = sld [smem:[#allocation22_spill]] }
 0xdec   : > { %s2942_s21 = sld [smem:[#allocation17_spill]]  ;;  %s2946_s0 = smov %s2287_s30 }
 0xded   : > { %s2943_s1 = sld [smem:[#allocation18_spill]]  ;;  %35 = sbr.rel (!%p33_p3) target bundleno = 18 (0x12), region = 227 }
 0xdee   : > { %s2944_s22 = sld [smem:[#allocation19_spill]] }
 0xdef   : > { %s2945_s2 = sld [smem:[#allocation20_spill]] }
 0xdf0   : > { %s2947_s30 = smov %s2940_s28 }
 0xdf2   :  { %1646 = vsyncpa [#allocation9], 1 }
 0xdf3   :  { %1648 = vsyncpa [#allocation9 + $0x1], 1 }
 0xdf4   :  { %1649 = vsyncpa [#allocation11], 1 }
 0xdf5   :  { %1651 = vsyncpa [#allocation11 + $0x1], 1 }

// kernel: tpu_custom_call.1
= control target key start
LH: loop header
LB: loop body
LE: loop exit
PB: predicated region body
PF: predicated region fallthrough
CT: control target
= control target key end

     0   :  { %s2865_s0 = inlined_call_operand.vmem [shape: f32[2,16,32], index: 0, kind: input, shape index: {}]   ;;  %s2866_s1 = inlined_call_operand.vmem [shape: f32[1,32], index: 1, kind: input, shape index: {}]   ;;  %s2867_s2 = inlined_call_operand.vmem [shape: f32[1,32], index: 2, kind: input, shape index: {}]   ;;  %s2868_s3 = inlined_call_operand.vmem [shape: bf16[4,32,8], index: 3, kind: input, shape index: {}]   ;;  %s2869_s4 = inlined_call_operand.vmem [shape: f32[4,1,8], index: 4, kind: input, shape index: {}]   ;;  %s2870_s5 = inlined_call_operand.vmem [shape: bf16[4,32,8], index: 5, kind: input, shape index: {}]   ;;  %s2871_s6 = inlined_call_operand.vmem [shape: f32[4,1,8], index: 6, kind: input, shape index: {}]   ;;  %s2872_s7 = inlined_call_operand.vmem [shape: bf16[4,32,8], index: 7, kind: input, shape index: {}]   ;;  %s2873_s8 = inlined_call_operand.vmem [shape: f32[4,1,8], index: 8, kind: input, shape index: {}]   ;;  %s2874_s9 = inlined_call_operand.vmem [shape: bf16[4,8,32], index: 9, kind: input, shape index: {}]   ;;  %s2875_s10 = inlined_call_operand.vmem [shape: f32[1,32], index: 10, kind: input, shape index: {}]   ;;  %s2876_s11 = inlined_call_operand.vmem [shape: f32[1,32], index: 11, kind: input, shape index: {}]   ;;  %s2877_s12 = inlined_call_operand.vmem [shape: f32[1,32], index: 12, kind: input, shape index: {}]   ;;  %s2878_s13 = inlined_call_operand.vmem [shape: bf16[32,128], index: 13, kind: input, shape index: {}]   ;;  %s2879_s14 = inlined_call_operand.vmem [shape: f32[1,128], index: 14, kind: input, shape index: {}]   ;;  %s2880_s15 = inlined_call_operand.vmem [shape: bf16[128,32], index: 15, kind: input, shape index: {}]   ;;  %s2881_s16 = inlined_call_operand.vmem [shape: f32[1,32], index: 16, kind: input, shape index: {}]   ;;  %s2882_s17 = inlined_call_operand.hbm [shape: f32[2,16,32], index: 17, kind: output, shape index: {0}]   ;;  %s2883_s18 = inlined_call_operand.hbm [shape: f32[2,16,32], index: 18, kind: output, shape index: {1}]   ;;  %s2884_s19 = inlined_call_operand.hbm [shape: f32[2,16,32], index: 19, kind: output, shape index: {2}]  }
   0x1   :  { %2898 = sst [smem:[#allocation23_spill]] %s2865_s0 }
   0x2   :  { %2899 = sst [smem:[#allocation24_spill]] %s2866_s1 }
   0x3   :  { %2900 = sst [smem:[#allocation25_spill]] %s2867_s2 }
   0x4   :  { %2901 = sst [smem:[#allocation26_spill]] %s2868_s3 }
   0x5   :  { %2902 = sst [smem:[#allocation27_spill]] %s2869_s4 }
   0x6   :  { %2903 = sst [smem:[#allocation28_spill]] %s2870_s5 }
   0x7   :  { %2904 = sst [smem:[#allocation29_spill]] %s2881_s16 }
   0x8   :  { %2905 = sst [smem:[#allocation30_spill]] %s2882_s17 }
   0x9   :  { %2906 = sst [smem:[#allocation31_spill]] %s2883_s18 }
   0xa   :  { %2907 = sst [smem:[#allocation32_spill]] %s2884_s19 }
   0xb   :  { %25 = vsyncpa [#allocation9], 0 }
   0xc   :  { %27 = vsyncpa [#allocation9 + $0x1], 0 }
   0xd   :  { %28 = vsyncpa [#allocation11], 0 }
   0xe   :  { %30 = vsyncpa [#allocation11 + $0x1], 0  ;;  %s2439_s0 = smov 0   ;;  %s2441_s30 = smov 0  }
   0xf   :  { %s2443_s20 = smov 0   ;;  %s2445_s21 = smov 0  }
  0x10   :  { %s2447_s1 = smov 0   ;;  %s2449_s22 = smov 0  }
  0x11   :  { %s2451_s2 = smov 0   ;;  %s2453_s23 = smov 0  }
  0x12 LB: > { %2908 = sst [smem:[#allocation15_spill]] %s2283_s0  ;;  %s2885_s24 = sadd.s32 4294967295, %s2311_s23   ;;  %s2311_s23 = sphi %s2453_s23, %s36_s23   ;;  %s2307_s2 = sphi %s2451_s2, %s2945_s2   ;;  %s2303_s22 = sphi %s2449_s22, %s2944_s22   ;;  %s2299_s1 = sphi %s2447_s1, %s2943_s1   ;;  %s2295_s21 = sphi %s2445_s21, %s2942_s21   ;;  %s2291_s20 = sphi %s2443_s20, %s2941_s20   ;;  %s2287_s30 = sphi %s2441_s30, %s2947_s30   ;;  %s2283_s0 = sphi %s2439_s0, %s2946_s0  }
  0x13   : > { %2909 = sst [smem:[#allocation16_spill]] %s2291_s20  ;;  %s2889_s25 = sadd.s32 4294967294, %s2311_s23  }
  0x14   : > { %2910 = sst [smem:[#allocation17_spill]] %s2303_s22  ;;  %s45_s3 = sadd.s32 1, %s2303_s22 }
  0x15   : > { %2911 = sst [smem:[#allocation18_spill]] %s2307_s2  ;;  %p46_p0 = scmp.ge.s32.totalorder %s45_s3, 2 }
  0x16   : > { %s48_s26 = sadd.s32 1, %s2307_s2  ;;  %p429_p1 = scmp.ne.s32.totalorder %s2291_s20, %s2287_s30 }
  0x17   : > { %p430_p2 = scmp.eq.s32.totalorder %s2885_s24, 3  ;;  %s2949_s3 = smov (%p46_p0, %s45_s3), 0 }
  0x18   : > { %2912 = sst [smem:[#allocation19_spill]] %s2949_s3  ;;  %s2951_s26 = smov (!%p46_p0, %s48_s26), %s2307_s2 }
  0x19   : > { %s415_s27 = ssub.s32 %s2303_s22, %s2949_s3  ;;  %p2492_p3 = por %p430_p2, %p429_p1 }
  0x1a   : > { %p50_p4 = scmp.ge.s32.totalorder %s2951_s26, 2  ;;  %p435_p5 = scmp.ne.s32.totalorder %s2287_s30, %s2283_s0 }
  0x1b   : > { %p436_p6 = scmp.eq.s32.totalorder %s2889_s25, 3  ;;  %p1799_p7 = scmp.ge.s32.totalorder %s2311_s23, 1 }
  0x1c   : > { %s2953_s26 = smov (%p50_p4, %s2951_s26), 0  ;;  %p566_p9 = scmp.lt.s32.totalorder %s2311_s23, 5 }
  0x1d   : > { %2914 = sst [smem:[#allocation20_spill]] %s2953_s26  ;;  %p2503_p8 = por %p436_p6, %p435_p5 }
  0x1e   : > { %s414_s24 = ssub.s32 %s2307_s2, %s2953_s26  ;;  %s419_s17 = sadd.s32 1, %s2291_s20 }
  0x1f   : > { %s2915_s29 = scalar_select %p2503_p8, 1, 0 }
  0x20   : > { %s416_s3 = sor.u32 %s415_s27, %s414_s24  ;;  %p567_p10 = pnand %p1799_p7, %p566_p9 }
  0x21   : > { %2916 = sst [smem:[#allocation21_spill]] %s2915_s29  ;;  %p417_p11 = scmp.eq.s32.totalorder %s416_s3, 0 }
  0x22   : > { %570 = sbr.rel (%p567_p10) target bundleno = 3549 (0xddd), region = 88  ;;  %s2897_s25 = sand.u32 (!%p567_p10), 1, %s2287_s30  }
  0x23   : > { %s2512_s22 = scalar_select %p417_p11, %s2291_s20, %s419_s17  }
  0x24   : > { %p632_p12 = scmp.lt.s32.totalorder (!%p567_p10), %s2299_s1, 1  ;;  %s2918_s16 = sld [smem:[#allocation24_spill]] (!%p567_p10) }
  0x25   : > { %2917 = sst [smem:[#allocation22_spill]] %s2512_s22  ;;  %s2528_s17 = sshll.u32 (!%p567_p10), %s2897_s25, 3 }
  0x26   : > { %s2919_s2 = sld [smem:[#allocation25_spill]] (!%p567_p10)  ;;  %s624_s19 = scalar_lea.vmem (!%p567_p10), [#allocation10], %s2528_s17 }
  0x27   : > { %s633_s24 = scalar_select %p632_p12, %s2299_s1, 1 }
  0x28   : > { %s2920_s20 = sld [smem:[#allocation23_spill]]  ;;  %p1805_p13 = scmp.ne.s32.totalorder %s2295_s21, 0 }
  0x29   : > { %s1872_s3 = sshll.u32 %s633_s24, 4 }
  0x2a   : > { %v2519_v0 = vld [vmem:[%s2918_s16] sm:$0x1]  ;;  %643 = sbr.rel (%p1805_p13) target bundleno = 578 (0x242), region = 92 }
  0x2c   : > { %v2524_v1 = vld [vmem:[%s2919_s2] sm:$0x1] }
  0x2e   : > { %s2534_s18 = scalar_lea.vmem %s2920_s20, %s1872_s3  ;;  %s2548_s20 = smov (!%p1805_p13), 0  }
  0x2f   : > { %v644_v2 = vld [vmem:[%s2534_s18] sm:$0xff]  ;;  %vm646_vm0 = vcmask 261120   ;;  %v645_v3 = vld [vmem:[%s2534_s18 + $0x8] sm:$0xff]  ;;  %v675_v21 = vlaneseq }
  0x30   : > { %v647_v4 = vsel %vm646_vm0, %v644_v2, 0.0  ;;  %v650_v5 = vsel %vm646_vm0, %v645_v3, 0.0 }
  0x31   : > { %648 = vadd.xlane.f32.xlu0 %v647_v4  ;;  %v676_v23 = vshrl.u32 %v675_v21, 7 }
  0x33   : > { %v677_v24 = vsub.s32 0, %v676_v23 }
  0x35   : > { %651 = vadd.xlane.f32.xlu0 %v650_v5  ;;  %v678_v26 = vrot.slane %v2519_v0, %v677_v24  ;;  %v686_v29 = vrot.slane %v2524_v1, %v677_v24 }
  0xba   : > { %v649_v6 = vpop.xlane.xlu0 %648 }
  0xbb   : > { %v654_v7 = vmul.f32 0.03125, %v649_v6 }
  0xbd   : > { %v656_v8 = vsub.f32 %v644_v2, %v654_v7 }
  0xbe   : > { %v652_v9 = vpop.xlane.xlu0 %651 }
  0xbf   : > { %v655_v10 = vmul.f32 0.03125, %v652_v9  ;;  %v658_v11 = vmul.f32 %v656_v8, %v656_v8 }
  0xc1   : > { %v657_v12 = vsub.f32 %v645_v3, %v655_v10  ;;  %v660_v13 = vsel %vm646_vm0, %v658_v11, 0.0 }
  0xc2   : > { %661 = vadd.xlane.f32.xlu1 %v660_v13 }
  0xc3   : > { %v659_v14 = vmul.f32 %v657_v12, %v657_v12 }
  0xc5   : > { %v663_v15 = vsel %vm646_vm0, %v659_v14, 0.0 }
  0xc6   : > { %664 = vadd.xlane.f32.xlu1 %v663_v15 }
 0x14b   : > { %v662_v16 = vpop.xlane.xlu1 %661 }
 0x14c   : > { %v666_v17 = vmul.f32 0.03125, %v662_v16 }
 0x14e   : > { %v668_v18 = vadd.f32 1e-05, %v666_v17 }
 0x14f   : > { %v665_v19 = vpop.xlane.xlu1 %664 }
 0x150   : > { %2111 = vrsqrt.f32 %v668_v18  ;;  %v667_v20 = vmul.f32 0.03125, %v665_v19 }
 0x152   : > { %v669_v22 = vadd.f32 1e-05, %v667_v20 }
 0x154   : > { %2113 = vrsqrt.f32 %v669_v22 }
 0x15d   : > { %v2112_v25 = vpop.eup %2111 }
 0x15e   : > { %v672_v27 = vmul.f32 %v2112_v25, %v656_v8 }
 0x160   : > { %v680_v30 = vmul.f32 %v678_v26, %v672_v27 }
 0x161   : > { %v2114_v28 = vpop.eup %2113 }
 0x162   : > { %v673_v31 = vmul.f32 %v2114_v28, %v657_v12  ;;  %v688_v33 = vadd.f32 %v686_v29, %v680_v30 }
 0x164   : > { %v681_v32 = vmul.f32 %v678_v26, %v673_v31 }
 0x166   : > { %v689_v34 = vadd.f32 %v686_v29, %v681_v32 }
 0x168   : > { %v690_v35 = vpack.c.bf16 %v689_v34, %v688_v33 }
 0x169 LB: >> { %v2325_v36 = vmov 0.0   ;;  %s1873_s22 = sshll.u32 %s2315_s20, 4  ;;  %vm2326_vm1 = vmmov 0   ;;  %s2921_s5 = sld [smem:[#allocation28_spill]]  ;;  %vm779_vm2 = vcmask 60416   ;;  %s2315_s20 = sphi %s2548_s20, %s696_s20  }
 0x16a   : >> { %1913 = vmatprep.subr.bf16.mxu0 %v2325_v36  ;;  %1921 = vmatprep.subr.bf16.mxu1 %v2325_v36  ;;  %s783_s27 = scalar_lea.vmem %s2872_s7, %s1873_s22  ;;  %s704_s24 = scalar_lea.vmem %s2871_s6, %s2315_s20 }
 0x16b   : >> { %1917 = vmatprep.mubr.msk.bf16.mxu0 %vm2326_vm1, %v2325_v36  ;;  %1925 = vmatprep.mubr.msk.bf16.mxu1 %vm2326_vm1, %v2325_v36  ;;  %v2116_v38 = vld [vmem:[%s783_s27 + $0x8] sm:$0xff]   ;;  %v2118_v40 = vld [vmem:[%s783_s27] sm:$0xff]   ;;  %s788_s25 = scalar_lea.vmem %s2873_s8, %s2315_s20 }
 0x16c   : >> { %1922 = vmatpush3.bf16.msra.mxu1 %v2116_v38  ;;  %v1808_v41 = vld [vmem:[%s704_s24] ss:$0 sm:$0xff] }
 0x16d   : >> { %1923 = vmatprep.subr.bf16.mxu1 %v2325_v36  ;;  %v1817_v42 = vld [vmem:[%s788_s25] ss:$0 sm:$0xff] }
 0x16f   : >> { %s699_s29 = scalar_lea.vmem %s2921_s5, %s1873_s22 }
 0x170   : >> { %v2115_v37 = vld [vmem:[%s699_s29 + $0x8] sm:$0xff]   ;;  %v2117_v39 = vld [vmem:[%s699_s29] sm:$0xff]   ;;  %1924 = vmatpush3.bf16.msra.mxu1 %v2118_v40  ;;  %s1876_s29 = sshll.u32 %s2315_s20, 3  ;;  %s696_s20 = sadd.s32 1, %s2315_s20  }
 0x171   : >> { %1914 = vmatpush3.bf16.msra.mxu0 %v2115_v37  ;;  %s778_s27 = scalar_lea.vmem [#allocation2], %s1876_s29  ;;  %s858_s2 = scalar_lea.vmem [#allocation3], %s1876_s29 }
 0x172   : >> { %1915 = vmatprep.subr.bf16.mxu0 %v2325_v36  ;;  %p693_p0 = scmp.ge.s32.totalorder %s696_s20, 4  }
 0x173   : >> { %1926 = vmatmul.mubr.msk.bf16.vlgmr.msra.gmra.mxu1 %vm646_vm0, %v690_v35 }
 0x175   : >> { %1916 = vmatpush3.bf16.msra.mxu0 %v2117_v39 }
 0x178   : >> { %1918 = vmatmul.mubr.msk.bf16.vlgmr.msra.gmra.mxu0 %vm646_vm0, %v690_v35 }
 0x233   : >> { %v842_v45 = vpop.f32.mrf.mxu1 }
 0x234   : >> { %v843_v46 = vadd.f32 %v1817_v42, %v842_v45 }
 0x235   : >> { %v1927_v49 = vpop.f32.mrf.mxu1 }
 0x236   : >> { %v1878_v50 = vpack.c.bf16 %v843_v46, %v843_v46 }
 0x237   : >> { %v845_v53 = vpop.f32.mrf.mxu1 }
 0x238   : >> { %v761_v43 = vpop.f32.mrf.mxu0  ;;  %859 = vst.msk [vmem:[%s858_s2] sm:$0xf] %vm779_vm2, %v1878_v50  ;;  %v846_v54 = vadd.f32 %v1817_v42, %v845_v53 }
 0x239   : >> { %v762_v44 = vadd.f32 %v1808_v41, %v761_v43  ;;  %v1928_v57 = vpop.f32.mrf.mxu1 }
 0x23a   : >> { %v1919_v47 = vpop.f32.mrf.mxu0  ;;  %v1879_v58 = vpack.c.bf16 %v846_v54, %v846_v54 }
 0x23b   : >> { %v1874_v48 = vpack.c.bf16 %v762_v44, %v762_v44 }
 0x23c   : >> { %v764_v51 = vpop.f32.mrf.mxu0  ;;  %860 = vst.msk [vmem:[%s858_s2 + $0x4] sm:$0xf] %vm779_vm2, %v1879_v58 }
 0x23d   : >> { %780 = vst.msk [vmem:[%s778_s27] sm:$0xf] %vm779_vm2, %v1874_v48  ;;  %v765_v52 = vadd.f32 %v1808_v41, %v764_v51  ;;  %695 = sbr.rel (!%p693_p0) target bundleno = 361 (0x169), region = 194 }
 0x23e   : >> { %v1920_v55 = vpop.f32.mrf.mxu0 }
 0x23f   : >> { %v1875_v56 = vpack.c.bf16 %v765_v52, %v765_v52 }
 0x241   : >> { %781 = vst.msk [vmem:[%s778_s27 + $0x4] sm:$0xf] %vm779_vm2, %v1875_v56 }
 0x242 PF: > { %s1824_s25 = sshll.u32 %s2295_s21, 3  ;;  %vm864_vm3 = vcmask 261120   ;;  %v1825_v59 = vld [vmem:[%s2875_s10] ss:$0 sm:$0xff]  ;;  %v880_v63 = vlaneseq }
 0x243   : > { %s862_s22 = scalar_lea.vmem %s2534_s18, %s1824_s25  ;;  %s2601_s18 = smov 0  }
 0x244   : > { %v863_v60 = vld [vmem:[%s862_s22] sm:$0xff]  ;;  %v2587_v2 = vshrl.u32 %v880_v63, 7  ;;  %v2589_v3 = vand.u32 127, %v880_v63 }
 0x245   : > { %v865_v61 = vsel %vm864_vm3, %v863_v60, 0.0  ;;  %v906_v62 = vadd.f32 %v1825_v59, %v863_v60 }
 0x246   : > { %866 = vadd.xlane.f32.xlu0 %v865_v61  ;;  %vm898_vm4 = vcmp.le.s32.totalorder %v2589_v3, %v2587_v2  ;;  %v882_v12 = vsub.s32 0, %v2587_v2 }
 0x247   : > { %907 = vst.msk [vmem:[#allocation7] sm:$0xff] %vm864_vm3, %v906_v62 }
 0x248   : > { %v883_v13 = vrot.slane %v2519_v0, %v882_v12  ;;  %v890_v15 = vrot.slane %v2524_v1, %v882_v12 }
 0x2cf   : > { %v867_v4 = vpop.xlane.xlu0 %866 }
 0x2d0   : > { %v869_v5 = vmul.f32 0.03125, %v867_v4 }
 0x2d2   : > { %v870_v6 = vsub.f32 %v863_v60, %v869_v5 }
 0x2d4   : > { %v871_v7 = vmul.f32 %v870_v6, %v870_v6 }
 0x2d6   : > { %v872_v8 = vsel %vm864_vm3, %v871_v7, 0.0 }
 0x2d7   : > { %873 = vadd.xlane.f32.xlu0 %v872_v8 }
 0x360   : > { %v874_v9 = vpop.xlane.xlu0 %873 }
 0x361   : > { %v875_v10 = vmul.f32 0.03125, %v874_v9 }
 0x363   : > { %v876_v11 = vadd.f32 1e-05, %v875_v10 }
 0x365   : > { %2119 = vrsqrt.f32 %v876_v11 }
 0x372   : > { %v2120_v14 = vpop.eup %2119 }
 0x373   : > { %v878_v16 = vmul.f32 %v2120_v14, %v870_v6 }
 0x375   : > { %v885_v17 = vmul.f32 %v883_v13, %v878_v16 }
 0x377   : > { %v2597_v18 = vadd.f32 %v890_v15, %v885_v17 }
 0x379   : > { %v893_v19 = vpack.c.bf16 %v2597_v18, %v2597_v18 }
 0x37a LB: >> { %vm985_vm5 = vcmask 7168   ;;  %vm988_vm6 = vcmask 64512   ;;  %v2327_v0 = vmov 0.0   ;;  %v2328_v1 = vmov -1e+30   ;;  %s1881_s20 = sshll.u32 %s2319_s18, 4  ;;  %s2319_s18 = sphi %s2601_s18, %s913_s18  }
 0x37b   : >> { %1929 = vmatprep.subr.bf16.mxu0 %v2327_v0  ;;  %986 = vst.msk [vmem:[#allocation4] sm:$0xff] %vm985_vm5, %v2328_v1  ;;  %987 = vst.msk [vmem:[#allocation5] sm:$0xff] %vm985_vm5, %v2327_v0  ;;  %vm2329_vm7 = vmmov 0   ;;  %s2922_s27 = sld [smem:[#allocation26_spill]]  ;;  %p1832_p1 = scmp.le.s32.totalorder %s2295_s21, 0 }
 0x37c   : >> { %989 = vst.msk [vmem:[#allocation6] sm:$0xff] %vm988_vm6, %v2327_v0  ;;  %1933 = vmatprep.mubr.msk.bf16.mxu0 %vm2329_vm7, %v2327_v0  ;;  %s2923_s4 = sld [smem:[#allocation27_spill]] }
 0x381   : >> { %s916_s2 = scalar_lea.vmem %s2922_s27, %s1881_s20  ;;  %s2630_s20 = smov (!%p1832_p1), 0  }
 0x382   : >> { %v2121_v20 = vld [vmem:[%s916_s2 + $0x8] sm:$0xff]   ;;  %v2122_v21 = vld [vmem:[%s916_s2] sm:$0xff]   ;;  %s921_s22 = scalar_lea.vmem %s2923_s4, %s2319_s18 }
 0x383   : >> { %1930 = vmatpush3.bf16.msra.mxu0 %v2121_v20  ;;  %v1828_v22 = vld [vmem:[%s921_s22] ss:$0 sm:$0xff] }
 0x384   : >> { %1931 = vmatprep.subr.bf16.mxu0 %v2327_v0 }
 0x387   : >> { %1932 = vmatpush3.bf16.msra.mxu0 %v2122_v21 }
 0x38a   : >> { %1934 = vmatmul.mubr.msk.bf16.vlgmr.msra.gmra.mxu0 %vm864_vm3, %v893_v19 }
 0x44a   : >> { %v978_v23 = vpop.f32.mrf.mxu0 }
 0x44b   : >> { %v979_v24 = vadd.f32 %v1828_v22, %v978_v23 }
 0x44c   : >> { %v1935_v25 = vpop.f32.mrf.mxu0  ;;  %1737 = sbr.rel (%p1832_p1) target bundleno = 1803 (0x70b), region = 199 }
 0x44d   : >> { %v2627_v26 = vpack.c.bf16 %v979_v24, %v979_v24 }
 0x44e   : >> { %v981_v27 = vpop.f32.mrf.mxu0 }
 0x450   : >> { %v1936_v28 = vpop.f32.mrf.mxu0 }
 0x451 LB: >>> { %v2330_v29 = vmov 0.0   ;;  %s1834_s3 = sshll.u32 %s2319_s18, 1  ;;  %vm2331_vm8 = vmmov 0   ;;  %s1833_s29 = sshll.u32 %s2323_s20, 3  ;;  %v2332_v38 = vmov 0   ;;  %v1054_v39 = vld [vmem:[#allocation4] sm:$0xff]  ;;  %s2323_s20 = sphi %s2630_s20, %s993_s20  }
 0x452   : >>> { %1937 = vmatprep.subr.bf16.mxu0 %v2330_v29  ;;  %1939 = vmatprep.mubr.msk.bf16.mxu0 %vm2331_vm8, %v2330_v29  ;;  %s997_s27 = sshra.s32 %s1833_s29, 3  ;;  %vm1088_vm9 = vcmask 1043456   ;;  %v1070_v53 = vld [vmem:[#allocation5] sm:$0xff]  ;;  %v1077_v57 = vld [vmem:[#allocation6] sm:$0xff]  ;;  %s993_s20 = sadd.s32 1, %s2323_s20  }
 0x453   : >>> { %1943 = vmatprep.subr.bf16.mxu1 %v2330_v29  ;;  %1945 = vmatprep.mubr.msk.bf16.mxu1 %vm2331_vm8, %v2330_v29  ;;  %s1000_s2 = sadd.s32 %s1834_s3, %s997_s27  ;;  %p992_p2 = scmp.ge.s32.totalorder %s993_s20, %s2295_s21 }
 0x454   : >>> { %s1835_s26 = sshll.u32 %s1000_s2, 2  ;;  %2123 = vset.pattern.permute.xlu0 %v2332_v38  ;;  %2124 = vset.pattern.permute.xlu1 %v2332_v38 }
 0x455   : >>> { %s1002_s24 = scalar_lea.vmem [#allocation2], %s1835_s26  ;;  %s1005_s22 = scalar_lea.vmem [#allocation3], %s1835_s26 }
 0x456   : >>> { %v1003_v30 = vld [vmem:[%s1002_s24] sm:$0xf] }
 0x457   : >>> { %v1011_v31 = vsel %vm988_vm6, %v1003_v30, 0  ;;  %v1006_v43 = vld [vmem:[%s1005_s22] sm:$0xf] }
 0x458   : >>> { %1938 = vmatpush3.bf16.xpose.msra.mxu0 %v1011_v31  ;;  %v1090_v44 = vsel %vm1088_vm9, %v1006_v43, 0 }
 0x459   : >>> { %1944 = vmatpush3.bf16.msra.mxu1 %v1090_v44 }
 0x45f   : >>> { %1940 = vmatmul.mubr.msk.bf16.vlgmr.msra.gmra.mxu0 %vm988_vm6, %v2627_v26 }
 0x51f   : >>> { %v1047_v32 = vpop.f32.mrf.mxu0 }
 0x520   : >>> { %v1053_v33 = vmul.f32 0.35355338, %v1047_v32 }
 0x521   : >>> { %v1941_v34 = vpop.f32.mrf.mxu0 }
 0x522   : >>> { %v1055_v35 = vsel %vm988_vm6, %v1053_v33, -inf }
 0x523   : >>> { %1056 = vmax.xlane.f32.xlu0 %v1055_v35  ;;  %v1050_v36 = vpop.f32.mrf.mxu0 }
 0x525   : >>> { %v1942_v37 = vpop.f32.mrf.mxu0 }
 0x5ac   : >>> { %v1057_v40 = vpop.xlane.xlu0 %1056 }
 0x5ad   : >>> { %v1058_v41 = vmax.f32 %v1054_v39, %v1057_v40 }
 0x5af   : >>> { %v1059_v42 = vsub.f32 %v1054_v39, %v1058_v41  ;;  %1134 = vst.msk [vmem:[#allocation4] sm:$0xff] %vm985_vm5, %v1058_v41  ;;  %1064 = vperm.xlu0 %2123, %v1058_v41  }
 0x5b1   : >>> { %v1060_v49 = vmul.f32 1.442695, %v1059_v42 }
 0x62a   : >>> { %v1065_v45 = vpop.permute.xlu0 %1064 }
 0x62b   : >>> { %v1067_v46 = vsub.f32 %v1053_v33, %v1065_v45 }
 0x62d   : >>> { %v1068_v47 = vmul.f32 1.442695, %v1067_v46 }
 0x62f   : >>> { %2125 = vpow2.f32 %v1068_v47 }
 0x630   : >>> { %2127 = vpow2.f32 %v1060_v49 }
 0x63c   : >>> { %v2126_v48 = vpop.eup %2125 }
 0x63d   : >>> { %v1072_v50 = vsel %vm988_vm6, %v2126_v48, 0.0  ;;  %v1084_v51 = vpack.c.bf16 %v2126_v48, %v2126_v48  ;;  %v2128_v52 = vpop.eup %2127 }
 0x63e   : >>> { %1073 = vadd.xlane.f32.xlu1 %v1072_v50  ;;  %v1071_v54 = vmul.f32 %v2128_v52, %v1070_v53 }
 0x63f   : >>> { %1946 = vmatmul.mubr.msk.bf16.vlgmr.msra.gmra.mxu1 %vm988_vm6, %v1084_v51 }
 0x64f   : >>> { %1080 = vperm.xlu1 %2124, %v2128_v52  }
 0x6c7   : >>> { %v1074_v55 = vpop.xlane.xlu1 %1073 }
 0x6c8   : >>> { %v1075_v56 = vadd.f32 %v1074_v55, %v1071_v54 }
 0x6ca   : >>> { %1076 = vst.msk [vmem:[#allocation5] sm:$0xff] %vm985_vm5, %v1075_v56 }
 0x6cb   : >>> { %v1081_v58 = vpop.permute.xlu1 %1080 }
 0x6cc   : >>> { %v1083_v59 = vmul.f32 %v1081_v58, %v1077_v57 }
 0x6ff   : >>> { %v1126_v60 = vpop.f32.mrf.mxu1 }
 0x700   : >>> { %v1132_v61 = vadd.f32 %v1126_v60, %v1083_v59 }
 0x701   : >>> { %v1947_v62 = vpop.f32.mrf.mxu1 }
 0x702   : >>> { %1133 = vst.msk [vmem:[#allocation6] sm:$0xff] %vm988_vm6, %v1132_v61 }
 0x703   : >>> { %v1129_v63 = vpop.f32.mrf.mxu1 }
 0x705   : >>> { %v1948_v4 = vpop.f32.mrf.mxu1 }
 0x706   : >> { %995 = sbr.rel (!%p992_p2) target bundleno = 1105 (0x451), region = 205 }
 0x70b PF: >> { %1949 = vmatprep.subr.bf16.mxu0 %v2327_v0  ;;  %s1135_s3 = sshra.s32 %s1824_s25, 3  ;;  %s1839_s29 = sshll.u32 %s2319_s18, 1  ;;  %1951 = vmatprep.mubr.msk.bf16.mxu0 %vm2329_vm7, %v2327_v0  ;;  %v2333_v14 = vmov 0   ;;  %v1193_v15 = vld [vmem:[#allocation4] sm:$0xff]  ;;  %vm1227_vm10 = vcmask 1043456   ;;  %v1209_v32 = vld [vmem:[#allocation5] sm:$0xff] }
 0x70c   : >> { %s1138_s27 = sadd.s32 %s1839_s29, %s1135_s3  ;;  %1955 = vmatprep.subr.bf16.mxu1 %v2327_v0  ;;  %1957 = vmatprep.mubr.msk.bf16.mxu1 %vm2329_vm7, %v2327_v0  ;;  %s1844_s24 = sshll.u32 %s2319_s18, 2  ;;  %v1216_v38 = vld [vmem:[#allocation6] sm:$0xff]  ;;  %v1284_v49 = vld [vmem:[#allocation7] sm:$0xff] }
 0x70d   : >> { %s1840_s2 = sshll.u32 %s1138_s27, 2  ;;  %2129 = vset.pattern.permute.xlu0 %v2333_v14  ;;  %2130 = vset.pattern.permute.xlu1 %v2333_v14  ;;  %s1286_s29 = scalar_lea.vmem %s2874_s9, %s1844_s24 }
 0x70e   : >> { %s1140_s20 = scalar_lea.vmem [#allocation2], %s1840_s2  ;;  %s1143_s26 = scalar_lea.vmem [#allocation3], %s1840_s2  ;;  %v1287_v25 = vld [vmem:[%s1286_s29] sm:$0xf] }
 0x70f   : >> { %v1141_v5 = vld [vmem:[%s1140_s20] sm:$0xf]  ;;  %v1292_v28 = vsel %vm1227_vm10, %v1287_v25, 0  ;;  %s913_s18 = sadd.s32 1, %s2319_s18  }
 0x710   : >> { %v1149_v6 = vsel %vm988_vm6, %v1141_v5, 0  ;;  %v1144_v20 = vld [vmem:[%s1143_s26] sm:$0xf]  ;;  %p910_p4 = scmp.ge.s32.totalorder %s913_s18, 4  }
 0x711   : >> { %1950 = vmatpush3.bf16.xpose.msra.mxu0 %v1149_v6  ;;  %v1229_v21 = vsel %vm1227_vm10, %v1144_v20, 0  ;;  %v2137_v62 = vld [vmem:[%s2878_s13 + $0x8] sm:$0xff] (%p910_p4)   ;;  %v2334_v63 = vmov (%p910_p4), 0.0   ;;  %vm2335_vm11 = vmmov (%p910_p4), 0   ;;  %v2138_v2 = vld [vmem:[%s2878_s13] sm:$0xff] (%p910_p4)   ;;  %v2139_v3 = vld [vmem:[%s2880_s15 + $0x38] sm:$0xff] (%p910_p4)  }
 0x712   : >> { %1956 = vmatpush3.bf16.msra.mxu1 %v1229_v21  ;;  %1967 = vmatprep.subr.bf16.mxu0 (%p910_p4), %v2334_v63  ;;  %v2140_v18 = vld [vmem:[%s2880_s15 + $0x30] sm:$0xff] (%p910_p4)   ;;  %v2142_v14 = vld [vmem:[%s2880_s15 + $0x20] sm:$0xff] (%p910_p4)   ;;  %s1864_s24 = sshll.u32 (%p910_p4), %s2299_s1, 1  ;;  %s2924_s3 = sadd.s32 (%p910_p4), 4294967295, %s2311_s23  }
 0x713   : >> { %1961 = vmatprep.subr.bf16.mxu1 %v2327_v0  ;;  %v1848_v20 = vld [vmem:[%s2879_s14] ss:$0 sm:$0xff] (%p910_p4)  ;;  %s1576_s22 = sadd.s32 (%p910_p4), %s2295_s21, %s1864_s24  ;;  %s2736_s29 = sand.u32 (%p910_p4), 1, %s2924_s3  }
 0x714   : > { %s2738_s27 = sshll.u32 (%p910_p4), %s1576_s22, 7  ;;  %s2925_s18 = sld [smem:[#allocation31_spill]] (%p910_p4) }
 0x715   : > { %s1595_s26 = sshll.u32 (%p910_p4), %s624_s19, 4  ;;  %s2336_s21 = smov (%p910_p4), [#allocation10]   ;;  %s1596_s26 = int_to_ptr.vmem [resolvable:$true] %s1595_s26 }
 0x716   : > { %s2151_s0 = scalar_lea.vmem (%p910_p4), %s1596_s26, 128  ;;  %s2155_s1 = sshll.u32 (%p910_p4), %s2336_s21, 4  ;;  %s2156_s1 = int_to_ptr.vmem [resolvable:$false] %s2155_s1 }
 0x717   : > { %p2152_p5 = scmp.ne.s32.totalorder (%p910_p4), %s1596_s26, %s2151_s0  ;;  %s2157_s24 = scalar_lea.vmem (%p910_p4), %s2156_s1, 256 }
 0x718   : >> { %1952 = vmatmul.mubr.msk.bf16.vlgmr.msra.gmra.mxu0 %vm988_vm6, %v2627_v26  ;;  %p2158_p9 = scmp.lt.s32.totalorder (%p910_p4), %s1596_s26, %s2156_s1  ;;  %p2159_p10 = scmp.lt.s32.totalorder (%p910_p4), %s2157_s24, %s2151_s0 }
 0x719   : > { %1971 = vmatprep.mubr.msk.bf16.mxu0 (%p910_p4), %vm2335_vm11, %v2334_v63  ;;  %1968 = vmatpush3.bf16.msra.mxu0 (%p910_p4), %v2137_v62  ;;  %p2153_p6 = pnand (%p910_p4), %p2152_p5, %p2492_p3 }
 0x71a   : > { %1969 = vmatprep.subr.bf16.mxu0 (%p910_p4), %v2334_v63  ;;  %s1593_s20 = scalar_lea.hbm (%p910_p4), %s2925_s18, %s2738_s27  ;;  %p2160_p11 = por (%p910_p4), %p2159_p10, %p2158_p9 }
 0x71b   : > { %p2154_p7 = pneg (%p910_p4), %p2153_p6 }
 0x71d   : > { %1970 = vmatpush3.bf16.msra.mxu0 (%p910_p4), %v2138_v2  ;;  %p2161_p12 = pnand (%p910_p4), %p2160_p11, %p2154_p7 }
 0x7d8   : >> { %v1185_v7 = vpop.f32.mrf.mxu0 }
 0x7d9   : >> { %v1191_v8 = vmul.f32 0.35355338, %v1185_v7  ;;  %v1846_v7 = vld [vmem:[%s2876_s11] ss:$0 sm:$0xff] (%p910_p4) }
 0x7da   : >> { %v1953_v9 = vpop.f32.mrf.mxu0 }
 0x7db   : >> { %v1192_v10 = vsel %vm898_vm4, %v1191_v8, -1e+30  ;;  %v1847_v9 = vld [vmem:[%s2877_s12] ss:$0 sm:$0xff] (%p910_p4) }
 0x7dc   : >> { %v1188_v11 = vpop.f32.mrf.mxu0  ;;  %v1194_v12 = vsel %vm988_vm6, %v1192_v10, -inf }
 0x7dd   : >> { %1195 = vmax.xlane.f32.xlu0 %v1194_v12 }
 0x7de   : >> { %v1954_v13 = vpop.f32.mrf.mxu0 }
 0x7df   : > { %v2141_v13 = vld [vmem:[%s2880_s15 + $0x28] sm:$0xff] (%p910_p4)  }
 0x866   : >> { %v1196_v16 = vpop.xlane.xlu0 %1195 }
 0x867   : >> { %v1197_v17 = vmax.f32 %v1193_v15, %v1196_v16  ;;  %v2144_v16 = vld [vmem:[%s2880_s15 + $0x10] sm:$0xff] (%p910_p4)  }
 0x869   : >> { %v1198_v1 = vsub.f32 %v1193_v15, %v1197_v17  ;;  %1273 = vst.msk [vmem:[#allocation4] sm:$0xff] %vm985_vm5, %v1197_v17  ;;  %1203 = vperm.xlu0 %2129, %v1197_v17   ;;  %v2143_v15 = vld [vmem:[%s2880_s15 + $0x18] sm:$0xff] (%p910_p4)   ;;  %v2145_v17 = vld [vmem:[%s2880_s15 + $0x8] sm:$0xff] (%p910_p4)  }
 0x86b   : >> { %v1199_v27 = vmul.f32 1.442695, %v1198_v1  ;;  %v2146_v1 = vld [vmem:[%s2880_s15] sm:$0xff] (%p910_p4)  }
 0x8e4   : >> { %v1204_v22 = vpop.permute.xlu0 %1203 }
 0x8e5   : >> { %v1206_v23 = vsub.f32 %v1192_v10, %v1204_v22 }
 0x8e7   : >> { %v1207_v24 = vmul.f32 1.442695, %v1206_v23 }
 0x8e9   : >> { %2131 = vpow2.f32 %v1207_v24 }
 0x8ea   : >> { %2133 = vpow2.f32 %v1199_v27 }
 0x8f6   : >> { %v2132_v26 = vpop.eup %2131 }
 0x8f7   : >> { %v1211_v29 = vsel %vm988_vm6, %v2132_v26, 0.0  ;;  %v1223_v30 = vpack.c.bf16 %v2132_v26, %v2132_v26  ;;  %v2134_v31 = vpop.eup %2133 }
 0x8f8   : >> { %1212 = vadd.xlane.f32.xlu1 %v1211_v29  ;;  %v1210_v33 = vmul.f32 %v2134_v31, %v1209_v32 }
 0x8f9   : >> { %1958 = vmatmul.mubr.msk.bf16.vlgmr.msra.gmra.mxu1 %vm988_vm6, %v1223_v30 }
 0x8fa   : >> { %1962 = vmatpush3.bf16.msra.mxu1 %v1292_v28  ;;  %1963 = vmatprep.mubr.msk.bf16.mxu1 %vm2329_vm7, %v2327_v0 }
 0x8fb   : > { %1975 = vmatprep.subr.bf16.mxu1 (%p910_p4), %v2334_v63 }
 0x909   : >> { %1219 = vperm.xlu1 %2130, %v2134_v31  }
 0x981   : >> { %v1213_v34 = vpop.xlane.xlu1 %1212 }
 0x982   : >> { %v1214_v35 = vadd.f32 %v1213_v34, %v1210_v33 }
 0x984   : >> { %1215 = vst.msk [vmem:[#allocation5] sm:$0xff] %vm985_vm5, %v1214_v35 }
 0x985   : >> { %v1220_v39 = vpop.permute.xlu1 %1219 }
 0x986   : >> { %v1222_v40 = vmul.f32 %v1220_v39, %v1216_v38 }
 0x98b   : >> { %v1275_v36 = vld [vmem:[#allocation5] sm:$0xff] }
 0x98c   : >> { %2135 = vrcp.f32 %v1275_v36 }
 0x999   : >> { %v2136_v37 = vpop.eup %2135 }
 0x99a   : >> { %1279 = vperm.xlu1 %2130, %v2136_v37  }
 0x9b9   : >> { %v1265_v41 = vpop.f32.mrf.mxu1 }
 0x9ba   : >> { %v1271_v42 = vadd.f32 %v1265_v41, %v1222_v40 }
 0x9bb   : >> { %v1959_v43 = vpop.f32.mrf.mxu1 }
 0x9bc   : >> { %1272 = vst.msk [vmem:[#allocation6] sm:$0xff] %vm988_vm6, %v1271_v42 }
 0x9bd   : >> { %v1268_v0 = vpop.f32.mrf.mxu1 }
 0x9bf   : >> { %v1960_v44 = vpop.f32.mrf.mxu1 }
 0x9c3   : >> { %v1274_v45 = vld [vmem:[#allocation6] sm:$0xff] }
 0xa15   : >> { %v1280_v46 = vpop.permute.xlu1 %1279 }
 0xa16   : >> { %v1282_v47 = vmul.f32 %v1280_v46, %v1274_v45 }
 0xa18   : >> { %v1283_v48 = vpack.c.bf16 %v1282_v47, %v1282_v47 }
 0xa1a   : >> { %1964 = vmatmul.mubr.msk.bf16.vlgmr.msra.gmra.mxu1 %vm988_vm6, %v1283_v48 }
 0xa1b   : > { %1991 = vmatprep.mubr.msk.bf16.mxu1 (%p910_p4), %vm2335_vm11, %v2334_v63  ;;  %1976 = vmatpush3.bf16.msra.mxu1 (%p910_p4), %v2139_v3 }
 0xa1c   : > { %1977 = vmatprep.subr.bf16.mxu1 (%p910_p4), %v2334_v63 }
 0xa1f   : > { %1978 = vmatpush3.bf16.msra.mxu1 (%p910_p4), %v2140_v18 }
 0xa20   : > { %1979 = vmatprep.subr.bf16.mxu1 (%p910_p4), %v2334_v63 }
 0xa23   : > { %1980 = vmatpush3.bf16.msra.mxu1 (%p910_p4), %v2141_v13 }
 0xa24   : > { %1981 = vmatprep.subr.bf16.mxu1 (%p910_p4), %v2334_v63 }
 0xa27   : > { %1982 = vmatpush3.bf16.msra.mxu1 (%p910_p4), %v2142_v14 }
 0xa28   : > { %1983 = vmatprep.subr.bf16.mxu1 (%p910_p4), %v2334_v63 }
 0xa2b   : > { %1984 = vmatpush3.bf16.msra.mxu1 (%p910_p4), %v2143_v15 }
 0xa2c   : > { %1985 = vmatprep.subr.bf16.mxu1 (%p910_p4), %v2334_v63 }
 0xa2f   : > { %1986 = vmatpush3.bf16.msra.mxu1 (%p910_p4), %v2144_v16 }
 0xa30   : > { %1987 = vmatprep.subr.bf16.mxu1 (%p910_p4), %v2334_v63 }
 0xa33   : > { %1988 = vmatpush3.bf16.msra.mxu1 (%p910_p4), %v2145_v17 }
 0xa34   : > { %1989 = vmatprep.subr.bf16.mxu1 (%p910_p4), %v2334_v63 }
 0xa37   : > { %1990 = vmatpush3.bf16.msra.mxu1 (%p910_p4), %v2146_v1 }
 0xada   : >> { %v1328_v50 = vpop.f32.mrf.mxu1 }
 0xadb   : >> { %v1334_v51 = vadd.f32 %v1328_v50, %v1284_v49 }
 0xadc   : >> { %v1965_v52 = vpop.f32.mrf.mxu1  ;;  %912 = sbr.rel (!%p910_p4) target bundleno = 890 (0x37a), region = 216 }
 0xadd   : >> { %1335 = vst.msk [vmem:[#allocation7] sm:$0xff] %vm864_vm3, %v1334_v51 }
 0xade   : >> { %v1331_v53 = vpop.f32.mrf.mxu1 }
 0xae0   : >> { %v1966_v54 = vpop.f32.mrf.mxu1 }
 0xae4   : > { %v2683_v55 = vld [vmem:[#allocation7] sm:$0xff] }
 0xae5   : > { %v1339_v56 = vsel %vm864_vm3, %v2683_v55, 0.0 }
 0xae6   : > { %1340 = vadd.xlane.f32.xlu0 %v1339_v56 }
 0xb6f   : > { %v1341_v57 = vpop.xlane.xlu0 %1340 }
 0xb70   : > { %v1342_v58 = vmul.f32 0.03125, %v1341_v57 }
 0xb72   : > { %v1343_v59 = vsub.f32 %v2683_v55, %v1342_v58 }
 0xb74   : > { %v1344_v60 = vmul.f32 %v1343_v59, %v1343_v59 }
 0xb76   : > { %v1345_v61 = vsel %vm864_vm3, %v1344_v60, 0.0 }
 0xb77   : > { %1346 = vadd.xlane.f32.xlu0 %v1345_v61 }
 0xc00   : > { %v1347_v19 = vpop.xlane.xlu0 %1346 }
 0xc01   : > { %v1348_v4 = vmul.f32 0.03125, %v1347_v19 }
 0xc03   : > { %v1349_v5 = vadd.f32 1e-05, %v1348_v4 }
 0xc05   : > { %2147 = vrsqrt.f32 %v1349_v5 }
 0xc12   : > { %v2148_v6 = vpop.eup %2147 }
 0xc13   : > { %v1351_v8 = vmul.f32 %v2148_v6, %v1343_v59 }
 0xc15   : > { %v1358_v10 = vmul.f32 %v1846_v7, %v1351_v8 }
 0xc17   : > { %v1365_v11 = vadd.f32 %v1847_v9, %v1358_v10 }
 0xc19   : > { %v1366_v12 = vpack.c.bf16 %v1365_v11, %v1365_v11  ;;  %1552 = vst.msk [vmem:[%s624_s19] sm:$0xff] %vm864_vm3, %v1365_v11 }
 0xc1b   : > { %1972 = vmatmul.mubr.msk.bf16.vlgmr.msra.gmra.mxu0 %vm864_vm3, %v1366_v12 }
 0xcdb   : > { %v1427_v21 = vpop.f32.mrf.mxu0 }
 0xcdc   : > { %v1428_v22 = vadd.f32 %v1848_v20, %v1427_v21 }
 0xcdd   : > { %v1973_v23 = vpop.f32.mrf.mxu0 }
 0xcde   : > { %v1434_v24 = vmul.f32 0.70710677, %v1428_v22  ;;  %v1433_v28 = vmul.f32 0.5, %v1428_v22 }
 0xcdf   : > { %v1430_v25 = vpop.f32.mrf.mxu0 }
 0xce0   : > { %2149 = verf.f32 %v1434_v24 }
 0xce1   : > { %v1974_v26 = vpop.f32.mrf.mxu0 }
 0xced   : > { %v2150_v27 = vpop.eup %2149 }
 0xcee   : > { %v1436_v29 = vadd.f32 1.0, %v2150_v27 }
 0xcf0   : > { %v1437_v30 = vmul.f32 %v1436_v29, %v1433_v28 }
 0xcf2   : > { %v1438_v31 = vpack.c.bf16 %v1437_v30, %v1437_v30 }
 0xcf4   : > { %1992 = vmatmul.mubr.bf16.vlgmr.msra.gmra.mxu1 %v1438_v31 }
 0xcf5   : > { %2164 = shalt.err (!%p2161_p12)
}
 0xcf6   : > { %s2165_s22 = scalar_lea.hbm %s1593_s20, 128  ;;  %s2169_s2 = scalar_lea.hbm %s2925_s18, 512 }
 0xcf7   : > { %p2166_p13 = scmp.ne.s32.totalorder %s1593_s20, %s2165_s22  ;;  %p2170_p2 = scmp.lt.s32.totalorder %s1593_s20, %s2925_s18 }
 0xcf8   : > { %p2171_p4 = scmp.lt.s32.totalorder %s2169_s2, %s2165_s22 }
 0xcf9   : > { %p2167_p0 = pnand %p2166_p13, %p2492_p3 }
 0xcfa   : > { %p2172_p5 = por %p2171_p4, %p2170_p2 }
 0xcfb   : > { %p2168_p1 = pneg %p2167_p0 }
 0xcfd   : > { %p2173_p6 = pnand %p2172_p5, %p2168_p1 }
 0xcff   : > { %2176 = shalt.err (!%p2173_p6)
}
 0xd00   : > { %s2926_s0 = scalar_lea.sflag [#allocation11], %s2736_s29  ;;  %s2927_s24 = sld [smem:[#allocation29_spill]] }
 0xd01   : > { %1996 = dma.vmem_to_hbm [thread:$0]  (%p2492_p3), %s1596_s26, 128, %s1593_s20, %s2926_s0  }
 0xd02   : > { %s2928_s16 = scalar_lea.vmem [#allocation12], %s2528_s17  ;;  %s2929_s19 = scalar_lea.vmem [#allocation8], %s2528_s17 }
 0xd03   : > { %s1610_s22 = sshll.u32 %s2928_s16, 4  ;;  %s1580_s3 = sshll.u32 %s2929_s19, 4  ;;  %s2774_s22 = int_to_ptr.vmem [resolvable:$true] %s1610_s22  ;;  %s2786_s3 = int_to_ptr.vmem [resolvable:$true] %s1580_s3 }
 0xd04   : > { %s2930_s4 = sld [smem:[#allocation32_spill]]  ;;  %s2931_s20 = smov %s2928_s16 }
 0xd05   : > { %s2932_s21 = sld [smem:[#allocation30_spill]]  ;;  %s2177_s16 = scalar_lea.vmem %s2774_s22, 128 }
 0xd06   : > { %v1852_v32 = vld [vmem:[%s2927_s24] ss:$0 sm:$0xff]  ;;  %p2178_p7 = scmp.ne.s32.totalorder %s2774_s22, %s2177_s16  ;;  %s2337_s19 = smov [#allocation12]  }
 0xd07   : > { %s2181_s2 = sshll.u32 %s2337_s19, 4  ;;  %s2182_s2 = int_to_ptr.vmem [resolvable:$false] %s2181_s2 }
 0xd08   : > { %p2179_p9 = pnand %p2178_p7, %p2492_p3  ;;  %s2183_s25 = scalar_lea.vmem %s2182_s2, 256 }
 0xd09   : > { %p2184_p11 = scmp.lt.s32.totalorder %s2774_s22, %s2182_s2  ;;  %p2185_p12 = scmp.lt.s32.totalorder %s2183_s25, %s2177_s16 }
 0xd0a   : > { %s2772_s5 = scalar_lea.hbm %s2930_s4, %s2738_s27  ;;  %p2180_p10 = pneg %p2179_p9 }
 0xd0b   : > { %s2933_s24 = smov %s2932_s21  ;;  %s2784_s1 = scalar_lea.hbm %s2932_s21, %s2738_s27 }
 0xd0c   : > { %p2186_p13 = por %p2185_p12, %p2184_p11 }
 0xd0e   : > { %p2187_p0 = pnand %p2186_p13, %p2180_p10 }
 0xdb4   : > { %v1544_v33 = vpop.f32.mrf.mxu1 }
 0xdb5   : > { %v1545_v34 = vadd.f32 %v1852_v32, %v1544_v33 }
 0xdb6   : > { %v1993_v35 = vpop.f32.mrf.mxu1 }
 0xdb7   : > { %v1550_v36 = vadd.f32 %v1545_v34, %v2683_v55  ;;  %1553 = vst.msk [vmem:[%s2931_s20] sm:$0xff] %vm864_vm3, %v1545_v34 }
 0xdb8   : > { %v1547_v37 = vpop.f32.mrf.mxu1 }
 0xdb9   : > { %2190 = shalt.err (!%p2187_p0)
}
 0xdba   : > { %s2191_s27 = scalar_lea.hbm %s2772_s5, 128  ;;  %s2195_s0 = scalar_lea.hbm %s2930_s4, 512 }
 0xdbb   : > { %p2192_p1 = scmp.ne.s32.totalorder %s2772_s5, %s2191_s27  ;;  %p2196_p5 = scmp.lt.s32.totalorder %s2772_s5, %s2930_s4 }
 0xdbc   : > { %p2197_p6 = scmp.lt.s32.totalorder %s2195_s0, %s2191_s27 }
 0xdbd   : > { %p2193_p2 = pnand %p2192_p1, %p2492_p3 }
 0xdbe   : > { %p2198_p7 = por %p2197_p6, %p2196_p5 }
 0xdbf   : > { %p2194_p4 = pneg %p2193_p2 }
 0xdc1   : > { %p2199_p9 = pnand %p2198_p7, %p2194_p4 }
 0xdc3   : > { %2202 = shalt.err (!%p2199_p9)
}
 0xdc4   : > { %s2934_s16 = scalar_lea.sflag [#allocation11], %s2736_s29  ;;  %s2935_s2 = scalar_lea.vmem [#allocation8], %s2528_s17  ;;  %v1994_v38 = vpop.f32.mrf.mxu1 }
 0xdc5   : > { %1997 = dma.vmem_to_hbm [thread:$0]  (%p2492_p3), %s2774_s22, 128, %s2772_s5, %s2934_s16   ;;  %1551 = vst.msk [vmem:[%s2935_s2] sm:$0xff] %vm864_vm3, %v1550_v36 }
 0xdc6   : > { %s2936_s25 = sand.u32 1, %s2287_s30   ;;  %s2203_s20 = scalar_lea.vmem %s2786_s3, 128 }
 0xdc7   : > { %s1555_s27 = scalar_lea.sflag [#allocation9], %s2936_s25  ;;  %p2204_p10 = scmp.ne.s32.totalorder %s2786_s3, %s2203_s20 }
 0xdc8   : > { %s2338_s29 = smov [#allocation8]  }
 0xdc9   : > { %p2205_p11 = pnand %p2204_p10, %p2492_p3  ;;  %s2207_s26 = sshll.u32 %s2338_s29, 4  ;;  %s2208_s26 = int_to_ptr.vmem [resolvable:$false] %s2207_s26 }
 0xdca   : > { %s2209_s0 = scalar_lea.vmem %s2208_s26, 256  ;;  %p2210_p13 = scmp.lt.s32.totalorder %s2786_s3, %s2208_s26 }
 0xdcb   : > { %p2206_p12 = pneg %p2205_p11  ;;  %p2211_p0 = scmp.lt.s32.totalorder %s2209_s0, %s2203_s20 }
 0xdcd   : > { %p2212_p1 = por %p2211_p0, %p2210_p13 }
 0xdcf   : > { %p2213_p2 = pnand %p2212_p1, %p2206_p12 }
 0xdd1   : > { %2216 = shalt.err (!%p2213_p2)
}
 0xdd2   : > { %s2217_s5 = scalar_lea.hbm %s2784_s1, 128  ;;  %s2221_s21 = scalar_lea.hbm %s2933_s24, 512 }
 0xdd3   : > { %p2218_p4 = scmp.ne.s32.totalorder %s2784_s1, %s2217_s5  ;;  %p2222_p7 = scmp.lt.s32.totalorder %s2784_s1, %s2933_s24 }
 0xdd4   : > { %p2223_p9 = scmp.lt.s32.totalorder %s2221_s21, %s2217_s5 }
 0xdd5   : > { %p2219_p5 = pnand %p2218_p4, %p2492_p3 }
 0xdd6   : > { %p2224_p10 = por %p2223_p9, %p2222_p7 }
 0xdd7   : > { %p2220_p6 = pneg %p2219_p5 }
 0xdd9   : > { %p2225_p11 = pnand %p2224_p10, %p2220_p6 }
 0xddb   : > { %2228 = shalt.err (!%p2225_p11)
}
 0xddc   : > { %1995 = dma.vmem_to_hbm [thread:$0]  (%p2492_p3), %s2786_s3, 128, %s2784_s1, %s1555_s27  }
 0xddd PF: > { %s2937_s2 = sld [smem:[#allocation15_spill]]  ;;  %p2011_p12 = scmp.ge.s32.totalorder %s2311_s23, 2 }
 0xddf   : > { %p2002_p13 = pnand %p2011_p12, %p2503_p8 }
 0xde1   : > { %p2003_p0 = pneg %p2002_p13 }
 0xde3   : > { %s1622_s20 = sand.u32 1, %s2937_s2  }
 0xde4   : > { %s1623_s29 = scalar_lea.sflag [#allocation9], %s1622_s20 }
 0xde5   : > { %2274 = dma.done.wait (%p2003_p0), %s1623_s29, 128  }
 0xde6   : > { %2276 = vsyncadd (%p2003_p0), %s1623_s29, 4294967168  ;;  %s2939_s26 = sadd.s32 4294967294, %s2311_s23  }
 0xde7   : > { %s1631_s0 = sand.u32 1, %s2939_s26  }
 0xde8   : > { %s1632_s5 = scalar_lea.sflag [#allocation11], %s1631_s0 }
 0xde9   : > { %2278 = dma.done.wait (%p2003_p0), %s1632_s5, 256  }
 0xdea   : > { %2280 = vsyncadd (%p2003_p0), %s1632_s5, 4294967040  ;;  %s36_s23 = sadd.s32 1, %s2311_s23   ;;  %s2940_s28 = sld [smem:[#allocation16_spill]] }
 0xdeb   : > { %p33_p3 = scmp.ge.s32.totalorder %s36_s23, 6   ;;  %s2941_s20 = sld [smem:[#allocation22_spill]] }
 0xdec   : > { %s2942_s21 = sld [smem:[#allocation17_spill]]  ;;  %s2946_s0 = smov %s2287_s30 }
 0xded   : > { %s2943_s1 = sld [smem:[#allocation18_spill]]  ;;  %35 = sbr.rel (!%p33_p3) target bundleno = 18 (0x12), region = 227 }
 0xdee   : > { %s2944_s22 = sld [smem:[#allocation19_spill]] }
 0xdef   : > { %s2945_s2 = sld [smem:[#allocation20_spill]] }
 0xdf0   : > { %s2947_s30 = smov %s2940_s28 }
 0xdf2   :  { %1646 = vsyncpa [#allocation9], 1 }
 0xdf3   :  { %1648 = vsyncpa [#allocation9 + $0x1], 1 }
 0xdf4   :  { %1649 = vsyncpa [#allocation11], 1 }
 0xdf5   :  { %1651 = vsyncpa [#allocation11 + $0x1], 1 }

</bundles_post_ra>
